<compile_context>
chip_gen: v7x
topology: tpu7x:2x2x1
jax: 0.10.0
libtpu: 0.0.40
codegen_flags: <defaults>
</compile_context>

<pallas_src>
import jax
import jax.numpy as jnp
from jax.experimental import pallas as pl
from jax.experimental.pallas import tpu as pltpu


def _round_up(x, m):
    return (x + m - 1) // m * m


# -----------------------------------------------------------------------------
# quaternion helpers (real-first (w,x,y,z)) -- tiny glue for backward/return_qt
# -----------------------------------------------------------------------------
def quat_conj(q):
    return q * jnp.array([1.0, -1.0, -1.0, -1.0], dtype=q.dtype)


def quat_apply(q, v):
    w = q[..., :1]
    u = q[..., 1:]
    uv = jnp.cross(u, v)
    uuv = jnp.cross(u, uv)
    return v + 2.0 * (w * uv + uuv)


def axis_angle_to_quaternion(so3):
    angle = jnp.linalg.norm(so3, axis=-1, keepdims=True)
    half = 0.5 * angle
    small = angle < 1e-6
    sinc = jnp.where(small, 0.5 - angle * angle / 48.0,
                     jnp.sin(half) / jnp.where(small, 1.0, angle))
    return jnp.concatenate([jnp.cos(half), so3 * sinc], axis=-1)


def quaternion_translation_inverse(q, t):
    q_inv = quat_conj(q)
    return q_inv, -quat_apply(q_inv, t)


# -----------------------------------------------------------------------------
# Pallas kernel: one (frame, point-tile) grid step
# -----------------------------------------------------------------------------
def _dense_warp_kernel(feat_ref, pf_ref, wmid_ref, bmid_ref, wout_ref, bout_ref,
                       out_ref):
    """Per-tile fused CondMLP(trans) + CondMLP(rot) forward.

    feat_ref : (40, TP) f32   point features [xyz(3); sin(18); cos(18); ones(1)]
    pf_ref   : (4W, 40) bf16  per-frame stacked [A0_t; A0_r; A4_t; A4_r] where
                              A0 = [w0x | w0e@emb+b0], A4 = [w4x | w4e@emb+b4]
    wmid_ref : (10, W, W) bf16  [w1,w2,w3,w4h,w5] for trans then rot
    bmid_ref : (W, 10) f32      matching biases (skip slot unused)
    wout_ref : (2, 8, W) bf16   output heads (trans head pre-scaled), rows 3..7 zero
    bout_ref : (2, 8, 1) f32    output head biases
    out_ref  : (8, TP) f32      rows 0-2: xyz + trans, rows 3-5: so3, rows 6-7: 0
    """
    f32 = jnp.float32
    bf16 = jnp.bfloat16
    W = wmid_ref.shape[1]
    tp = feat_ref.shape[1]

    feat = feat_ref[...]                                               # (40, TP)
    # layer-0 + skip-layer point-feature matrices of BOTH heads: one K=40 dot
    z0 = jnp.dot(pf_ref[...], feat.astype(bf16),
                 preferred_element_type=f32)                           # (4W, TP)

    def run_mlp(h0, s4, base):
        h = jnp.maximum(h0, 0.0).astype(bf16)                          # layer 0
        for j in range(3):                                             # layers 1..3
            idx = base + j
            z = jnp.dot(wmid_ref[idx], h, preferred_element_type=f32)
            h = jnp.maximum(z + bmid_ref[:, idx:idx + 1], 0.0).astype(bf16)
        # layer 4 (skip): per-frame + point-feature part precomputed in s4
        z = jnp.dot(wmid_ref[base + 3], h, preferred_element_type=f32)
        h = jnp.maximum(z + s4, 0.0).astype(bf16)
        # layer 5
        z = jnp.dot(wmid_ref[base + 4], h, preferred_element_type=f32)
        h = jnp.maximum(z + bmid_ref[:, base + 4:base + 5], 0.0).astype(bf16)
        return h

    h_t = run_mlp(z0[0:W], z0[2 * W:3 * W], 0)                         # trans head
    h_r = run_mlp(z0[W:2 * W], z0[3 * W:4 * W], 5)                     # rot head

    trans = jnp.dot(wout_ref[0], h_t, preferred_element_type=f32) + bout_ref[0]
    so3 = jnp.dot(wout_ref[1], h_r, preferred_element_type=f32) + bout_ref[1]

    xyz = feat[0:3]
    out_ref[...] = jnp.concatenate(
        [xyz + trans[0:3], so3[0:3], jnp.zeros((2, tp), f32)], axis=0)


# -----------------------------------------------------------------------------
# Wrapper glue: per-frame conditioning, weight packing, layout, pallas_call
# -----------------------------------------------------------------------------
def _time_embedding(params, frame_id, M):
    nf = params["num_freq_t"]
    num_frames = params["num_frames"]
    freqs = 2.0 ** jnp.arange(nf, dtype=jnp.float32)
    if frame_id is None:
        t = (jnp.arange(num_frames, dtype=jnp.float32) + 0.5) / num_frames * 2.0 - 1.0
    else:
        t = (frame_id.astype(jnp.float32) + 0.5) / num_frames * 2.0 - 1.0
    ang = t[:, None] * freqs[None, :]
    four = jnp.concatenate([t[:, None], jnp.sin(ang), jnp.cos(ang)], axis=-1)
    te = four @ params["time_w"].T + params["time_b"]
    if frame_id is None:
        te = jnp.broadcast_to(jnp.mean(te, axis=0, keepdims=True), (M, te.shape[-1]))
    return te                                                           # (M, Ct)


def _inst_code(mp, inst_id, M):
    tbl = mp["inst_embed"]
    if inst_id is None:
        return jnp.broadcast_to(jnp.mean(tbl, axis=0, keepdims=True), (M, tbl.shape[1]))
    return tbl[inst_id]


def _per_frame_matrix(params, t_embed, inst_id, M):
    """(M, 4W, 40) bf16 = stacked [A0_t; A0_r; A4_t; A4_r], bias in column 39."""
    def one(mp):
        emb = jnp.concatenate([t_embed, _inst_code(mp, inst_id, M)], axis=-1)
        b0_eff = emb @ mp["w0e"].T + mp["b0"]                           # (M, W)
        b4_eff = emb @ mp["w4e"].T + mp["b4"]
        a0 = jnp.concatenate(
            [jnp.broadcast_to(mp["w0x"][None], (M,) + mp["w0x"].shape),
             b0_eff[..., None]], axis=-1)                               # (M, W, 40)
        a4 = jnp.concatenate(
            [jnp.broadcast_to(mp["w4x"][None], (M,) + mp["w4x"].shape),
             b4_eff[..., None]], axis=-1)
        return a0, a4

    a0_t, a4_t = one(params["trans"])
    a0_r, a4_r = one(params["rot"])
    return jnp.concatenate([a0_t, a0_r, a4_t, a4_r], axis=1).astype(jnp.bfloat16)


def _packed_weights(params):
    tp_, rp_ = params["trans"], params["rot"]
    W = tp_["w1"].shape[0]
    s = params["trans_scaling"]

    def mids(mp):
        return [mp["w1"], mp["w2"], mp["w3"], mp["w4h"], mp["w5"]]

    def bias_cols(mp):
        zero = jnp.zeros_like(mp["b1"])
        return [mp["b1"], mp["b2"], mp["b3"], zero, mp["b5"]]

    w_mid = jnp.stack(mids(tp_) + mids(rp_), axis=0).astype(jnp.bfloat16)   # (10, W, W)
    b_mid = jnp.stack(bias_cols(tp_) + bias_cols(rp_), axis=1)              # (W, 10)

    def head(mp, scale):
        w = jnp.concatenate([mp["wo"] * scale, jnp.zeros((5, W), jnp.float32)], axis=0)
        b = jnp.concatenate([mp["bo"] * scale, jnp.zeros((5,), jnp.float32)], axis=0)
        return w, b

    wo_t, bo_t = head(tp_, s)                  # trans_scaling folded in (free)
    wo_r, bo_r = head(rp_, jnp.float32(1.0))
    w_out = jnp.stack([wo_t, wo_r], axis=0).astype(jnp.bfloat16)            # (2, 8, W)
    b_out = jnp.stack([bo_t, bo_r], axis=0)[..., None]                      # (2, 8, 1)
    return w_mid, b_mid, w_out, b_out


def dense_warp_se3_forward(params, xyz, frame_id, inst_id, backward=False,
                           samples_dict=None, return_aux=False, return_qt=False):
    """DenseWarpSE3.forward with the per-point MLP hot path in Pallas."""
    M, N, Dp, _ = xyz.shape
    P = N * Dp
    W = params["trans"]["w1"].shape[0]
    F = params["num_freq_xyz"]

    # ---- per-frame conditioning + packed weights (point-independent glue) ---
    t_embed = _time_embedding(params, frame_id, M)
    pf = _per_frame_matrix(params, t_embed, inst_id, M)                 # (M, 4W, 40)
    w_mid, b_mid, w_out, b_out = _packed_weights(params)

    # ---- point features: one pad+transpose pass, sin/cos fused in -----------
    pp128 = _round_up(P, 128)
    TP = min(1024, pp128)
    if M == 1:
        # keep >= 2 grid steps so both v7x TensorCores have work
        TP = min(TP, max(128, _round_up(pp128 // 2, 128)))
    Pp = _round_up(P, TP)

    x_flat = jnp.pad(xyz.reshape(M, P, 3), ((0, 0), (0, Pp - P), (0, 0)))
    x_cm = jnp.transpose(x_flat, (0, 2, 1))                             # (M, 3, Pp)
    freqs = 2.0 ** jnp.arange(F, dtype=jnp.float32)
    ang = x_cm[:, None, :, :] * freqs[None, :, None, None]              # (M, F, 3, Pp)
    feat = jnp.concatenate(
        [x_cm,
         jnp.sin(ang).reshape(M, 3 * F, Pp),
         jnp.cos(ang).reshape(M, 3 * F, Pp),
         jnp.ones((M, 1, Pp), jnp.float32)], axis=1)                    # (M, 40, Pp)
    FC = feat.shape[1]

    grid = (M, Pp // TP)
    out8 = pl.pallas_call(
        _dense_warp_kernel,
        out_shape=jax.ShapeDtypeStruct((M, 8, Pp), jnp.float32),
        grid=grid,
        in_specs=[
            pl.BlockSpec((pl.Squeezed(), FC, TP), lambda m, p: (m, 0, p)),
            pl.BlockSpec((pl.Squeezed(), 4 * W, FC), lambda m, p: (m, 0, 0)),
            pl.BlockSpec((10, W, W), lambda m, p: (0, 0, 0)),
            pl.BlockSpec((W, 10), lambda m, p: (0, 0)),
            pl.BlockSpec((2, 8, W), lambda m, p: (0, 0, 0)),
            pl.BlockSpec((2, 8, 1), lambda m, p: (0, 0, 0)),
        ],
        out_specs=pl.BlockSpec((pl.Squeezed(), 8, TP), lambda m, p: (m, 0, p)),
        compiler_params=pltpu.CompilerParams(
            dimension_semantics=("parallel", "parallel"),
            vmem_limit_bytes=32 * 1024 * 1024),
    )(feat, pf, w_mid, b_mid, w_out, b_out)

    warped = jnp.transpose(out8[:, 0:3, :P], (0, 2, 1)).reshape(M, N, Dp, 3)

    if backward or return_qt:
        so3 = jnp.transpose(out8[:, 3:6, :P], (0, 2, 1)).reshape(M, N, Dp, 3)
        trans = warped - xyz
        qr = axis_angle_to_quaternion(so3)
        if backward:
            qr, trans = quaternion_translation_inverse(qr, trans)
        out = (qr, trans) if return_qt else xyz + trans
    else:
        out = warped

    if return_aux:
        return out, {}
    return out


# -----------------------------------------------------------------------------
# Pure-JAX reference (point-major, f32 highest) for a correctness check
# -----------------------------------------------------------------------------
def dense_warp_se3_reference(params, xyz, frame_id, inst_id, backward=False,
                             return_qt=False):
    M, N, Dp, _ = xyz.shape
    F = params["num_freq_xyz"]
    freqs = 2.0 ** jnp.arange(F, dtype=jnp.float32)
    ang = xyz[..., None, :] * freqs[:, None]                            # (M,N,Dp,F,3)
    posfeat = jnp.concatenate(
        [xyz, jnp.sin(ang).reshape(M, N, Dp, -1), jnp.cos(ang).reshape(M, N, Dp, -1)],
        axis=-1)                                                        # (...,39)
    t_embed = _time_embedding(params, frame_id, M)

    def cond_mlp(mp):
        emb = jnp.concatenate([t_embed, _inst_code(mp, inst_id, M)], axis=-1)
        emb_b = jnp.broadcast_to(emb[:, None, None, :], (M, N, Dp, emb.shape[-1]))
        x = jnp.concatenate([posfeat, emb_b], axis=-1)
        w0 = jnp.concatenate([mp["w0x"], mp["w0e"]], axis=1)
        h = jax.nn.relu(jnp.einsum("mndc,kc->mndk", x, w0, precision="highest") + mp["b0"])
        for wn, bn in (("w1", "b1"), ("w2", "b2"), ("w3", "b3")):
            h = jax.nn.relu(jnp.einsum("mndc,kc->mndk", h, mp[wn], precision="highest") + mp[bn])
        w4 = jnp.concatenate([mp["w4x"], mp["w4e"], mp["w4h"]], axis=1)
        h = jax.nn.relu(jnp.einsum("mndc,kc->mndk", jnp.concatenate([x, h], -1), w4,
                                   precision="highest") + mp["b4"])
        h = jax.nn.relu(jnp.einsum("mndc,kc->mndk", h, mp["w5"], precision="highest") + mp["b5"])
        return jnp.einsum("mndc,kc->mndk", h, mp["wo"], precision="highest") + mp["bo"]

    trans = cond_mlp(params["trans"]) * params["trans_scaling"]
    so3 = cond_mlp(params["rot"])
    qr = axis_angle_to_quaternion(so3)
    if backward:
        qr, trans = quaternion_translation_inverse(qr, trans)
    if return_qt:
        return qr, trans
    return xyz + trans


# -----------------------------------------------------------------------------
# Deterministic parameter init (shapes follow DenseWarpSE3.__init__, W=256//2)
# -----------------------------------------------------------------------------
def init_params(key, num_frames, num_inst, num_freq_xyz=6, num_freq_t=6,
                time_channels=64, inst_channels=32, W=128):
    pos_ch = 3 * (2 * num_freq_xyz + 1)                # 39
    t_four = 2 * num_freq_t + 1                        # 13
    Ce = time_channels + inst_channels                 # 96
    keys = iter(jax.random.split(key, 64))

    def lin_w(k, fan_in, shape):
        b = 1.0 / jnp.sqrt(jnp.float32(fan_in))
        return jax.random.uniform(k, shape, jnp.float32, -b, b)

    def mlp_params():
        cin0 = pos_ch + Ce
        cin4 = pos_ch + Ce + W
        return {
            "inst_embed": 0.1 * jax.random.normal(next(keys), (num_inst, inst_channels), jnp.float32),
            "w0x": lin_w(next(keys), cin0, (W, pos_ch)),
            "w0e": lin_w(next(keys), cin0, (W, Ce)),
            "b0": lin_w(next(keys), cin0, (W,)),
            "w1": lin_w(next(keys), W, (W, W)), "b1": lin_w(next(keys), W, (W,)),
            "w2": lin_w(next(keys), W, (W, W)), "b2": lin_w(next(keys), W, (W,)),
            "w3": lin_w(next(keys), W, (W, W)), "b3": lin_w(next(keys), W, (W,)),
            "w4x": lin_w(next(keys), cin4, (W, pos_ch)),
            "w4e": lin_w(next(keys), cin4, (W, Ce)),
            "w4h": lin_w(next(keys), cin4, (W, W)),
            "b4": lin_w(next(keys), cin4, (W,)),
            "w5": lin_w(next(keys), W, (W, W)), "b5": lin_w(next(keys), W, (W,)),
            "wo": lin_w(next(keys), W, (3, W)), "bo": lin_w(next(keys), W, (3,)),
        }

    return {
        "num_frames": num_frames,
        "num_inst": num_inst,
        "num_freq_xyz": num_freq_xyz,
        "num_freq_t": num_freq_t,
        "trans_scaling": jnp.float32(0.1),
        "time_w": lin_w(next(keys), t_four, (time_channels, t_four)),
        "time_b": lin_w(next(keys), t_four, (time_channels,)),
        "trans": mlp_params(),
        "rot": mlp_params(),
    }


if __name__ == "__main__":
    key = jax.random.PRNGKey(0)
    k_xyz, k_param = jax.random.split(key, 2)

    M, N, Dp = 2, 16, 16                 # xyz: (M, N, Dp, 3)
    num_frames, num_inst = 8, 2          # frame_info metadata

    xyz = jax.random.uniform(k_xyz, (M, N, Dp, 3), jnp.float32, -0.5, 0.5)
    frame_id = jnp.array([1, 5], dtype=jnp.int32)
    inst_id = jnp.array([0, 1], dtype=jnp.int32)

    params = init_params(k_param, num_frames, num_inst)

    warp_fn = jax.jit(lambda pts, fid, iid: dense_warp_se3_forward(params, pts, fid, iid))
    out = jax.block_until_ready(warp_fn(xyz, frame_id, inst_id))

    ref = dense_warp_se3_reference(params, xyz, frame_id, inst_id)
    assert out.shape == (M, N, Dp, 3) and out.dtype == jnp.float32
    max_err = float(jnp.max(jnp.abs(out - ref)))
    assert max_err < 2e-2, f"warped max abs error {max_err}"

    # exercise the rotation head via return_qt as well
    qr, tr = dense_warp_se3_forward(params, xyz, frame_id, inst_id, return_qt=True)
    qr_ref, tr_ref = dense_warp_se3_reference(params, xyz, frame_id, inst_id, return_qt=True)
    err_q = float(jnp.max(jnp.abs(qr - qr_ref)))
    err_t = float(jnp.max(jnp.abs(tr - tr_ref)))
    assert err_q < 2e-2 and err_t < 2e-2, f"qt errors {err_q} {err_t}"

    print("KERNEL_OK")
</pallas_src>

<mosaic_0001>
module attributes {stable_mosaic.version = 11 : i64} {
  func.func @_dense_warp_kernel(%arg0: i32, %arg1: i32, %arg2: memref<1x40x256xf32, #tpu.memory_space<vmem>>, %arg3: memref<1x512x40xbf16, #tpu.memory_space<vmem>>, %arg4: memref<10x128x128xbf16, #tpu.memory_space<vmem>>, %arg5: memref<128x10xf32, #tpu.memory_space<vmem>>, %arg6: memref<2x8x128xbf16, #tpu.memory_space<vmem>>, %arg7: memref<2x8x1xf32, #tpu.memory_space<vmem>>, %arg8: memref<1x8x256xf32, #tpu.memory_space<vmem>>) attributes {dimension_semantics = [#tpu.dimension_semantics<parallel>, #tpu.dimension_semantics<parallel>], iteration_bounds = array<i64: 2, 1>, scalar_prefetch = 0 : i64, scratch_operands = 0 : i64, tpu.core_type = #tpu.core_type<tc>, window_params = [{transform_indices = @transform_0, window_bounds = array<i64: 1, 40, 256>}, {transform_indices = @transform_1, window_bounds = array<i64: 1, 512, 40>}, {pipeline_mode = #tpu.pipeline_mode<synchronous>, transform_indices = @transform_2, window_bounds = array<i64: 10, 128, 128>}, {pipeline_mode = #tpu.pipeline_mode<synchronous>, transform_indices = @transform_3, window_bounds = array<i64: 128, 10>}, {pipeline_mode = #tpu.pipeline_mode<synchronous>, transform_indices = @transform_4, window_bounds = array<i64: 2, 8, 128>}, {pipeline_mode = #tpu.pipeline_mode<synchronous>, transform_indices = @transform_5, window_bounds = array<i64: 2, 8, 1>}, {transform_indices = @transform_6, window_bounds = array<i64: 1, 8, 256>}]} {
    %c0 = arith.constant 0 : index
    %c0_0 = arith.constant 0 : index
    %c0_1 = arith.constant 0 : index
    %0 = vector.load %arg2[%c0, %c0_0, %c0_1] : memref<1x40x256xf32, #tpu.memory_space<vmem>>, vector<1x40x256xf32>
    %1 = vector.shape_cast %0 : vector<1x40x256xf32> to vector<40x256xf32>
    %c0_2 = arith.constant 0 : index
    %c0_3 = arith.constant 0 : index
    %c0_4 = arith.constant 0 : index
    %2 = vector.load %arg3[%c0_2, %c0_3, %c0_4] : memref<1x512x40xbf16, #tpu.memory_space<vmem>>, vector<1x512x40xbf16>
    %3 = vector.shape_cast %2 : vector<1x512x40xbf16> to vector<512x40xbf16>
    %4 = arith.truncf %1 : vector<40x256xf32> to vector<40x256xbf16>
    %cst = arith.constant dense<0.000000e+00> : vector<512x256xf32>
    %5 = tpu.matmul %3, %4, %cst {dimension_numbers = #tpu.dot_dimension_numbers<[1], [0], [0], [1], [0, 0, 1, 1], [], []>} : vector<512x40xbf16>, vector<40x256xbf16>, vector<512x256xf32> -> vector<512x256xf32>
    %6 = vector.extract_strided_slice %5 {offsets = [0, 0], sizes = [128, 256], strides = [1, 1]} : vector<512x256xf32> to vector<128x256xf32>
    %7 = vector.extract_strided_slice %5 {offsets = [256, 0], sizes = [128, 256], strides = [1, 1]} : vector<512x256xf32> to vector<128x256xf32>
    %cst_5 = arith.constant 0.000000e+00 : f32
    %8 = vector.broadcast %cst_5 : f32 to vector<128x256xf32>
    %9 = arith.maximumf %6, %8 : vector<128x256xf32>
    %10 = arith.truncf %9 : vector<128x256xf32> to vector<128x256xbf16>
    %c0_6 = arith.constant 0 : index
    %c0_7 = arith.constant 0 : index
    %c0_8 = arith.constant 0 : index
    %11 = vector.load %arg4[%c0_6, %c0_7, %c0_8] : memref<10x128x128xbf16, #tpu.memory_space<vmem>>, vector<1x128x128xbf16>
    %12 = vector.shape_cast %11 : vector<1x128x128xbf16> to vector<128x128xbf16>
    %cst_9 = arith.constant dense<0.000000e+00> : vector<128x256xf32>
    %13 = tpu.matmul %12, %10, %cst_9 {dimension_numbers = #tpu.dot_dimension_numbers<[1], [0], [0], [1], [0, 0, 1, 1], [], []>} : vector<128x128xbf16>, vector<128x256xbf16>, vector<128x256xf32> -> vector<128x256xf32>
    %c0_10 = arith.constant 0 : index
    %c0_11 = arith.constant 0 : index
    %14 = vector.load %arg5[%c0_10, %c0_11] : memref<128x10xf32, #tpu.memory_space<vmem>>, vector<128x1xf32>
    %15 = vector.broadcast %14 : vector<128x1xf32> to vector<128x256xf32>
    %16 = arith.addf %13, %15 : vector<128x256xf32>
    %cst_12 = arith.constant 0.000000e+00 : f32
    %17 = vector.broadcast %cst_12 : f32 to vector<128x256xf32>
    %18 = arith.maximumf %16, %17 : vector<128x256xf32>
    %19 = arith.truncf %18 : vector<128x256xf32> to vector<128x256xbf16>
    %c1 = arith.constant 1 : index
    %c0_13 = arith.constant 0 : index
    %c0_14 = arith.constant 0 : index
    %20 = vector.load %arg4[%c1, %c0_13, %c0_14] : memref<10x128x128xbf16, #tpu.memory_space<vmem>>, vector<1x128x128xbf16>
    %21 = vector.shape_cast %20 : vector<1x128x128xbf16> to vector<128x128xbf16>
    %cst_15 = arith.constant dense<0.000000e+00> : vector<128x256xf32>
    %22 = tpu.matmul %21, %19, %cst_15 {dimension_numbers = #tpu.dot_dimension_numbers<[1], [0], [0], [1], [0, 0, 1, 1], [], []>} : vector<128x128xbf16>, vector<128x256xbf16>, vector<128x256xf32> -> vector<128x256xf32>
    %c0_16 = arith.constant 0 : index
    %c1_17 = arith.constant 1 : index
    %23 = vector.load %arg5[%c0_16, %c1_17] : memref<128x10xf32, #tpu.memory_space<vmem>>, vector<128x1xf32>
    %24 = vector.broadcast %23 : vector<128x1xf32> to vector<128x256xf32>
    %25 = arith.addf %22, %24 : vector<128x256xf32>
    %cst_18 = arith.constant 0.000000e+00 : f32
    %26 = vector.broadcast %cst_18 : f32 to vector<128x256xf32>
    %27 = arith.maximumf %25, %26 : vector<128x256xf32>
    %28 = arith.truncf %27 : vector<128x256xf32> to vector<128x256xbf16>
    %c2 = arith.constant 2 : index
    %c0_19 = arith.constant 0 : index
    %c0_20 = arith.constant 0 : index
    %29 = vector.load %arg4[%c2, %c0_19, %c0_20] : memref<10x128x128xbf16, #tpu.memory_space<vmem>>, vector<1x128x128xbf16>
    %30 = vector.shape_cast %29 : vector<1x128x128xbf16> to vector<128x128xbf16>
    %cst_21 = arith.constant dense<0.000000e+00> : vector<128x256xf32>
    %31 = tpu.matmul %30, %28, %cst_21 {dimension_numbers = #tpu.dot_dimension_numbers<[1], [0], [0], [1], [0, 0, 1, 1], [], []>} : vector<128x128xbf16>, vector<128x256xbf16>, vector<128x256xf32> -> vector<128x256xf32>
    %c0_22 = arith.constant 0 : index
    %c2_23 = arith.constant 2 : index
    %32 = vector.load %arg5[%c0_22, %c2_23] : memref<128x10xf32, #tpu.memory_space<vmem>>, vector<128x1xf32>
    %33 = vector.broadcast %32 : vector<128x1xf32> to vector<128x256xf32>
    %34 = arith.addf %31, %33 : vector<128x256xf32>
    %cst_24 = arith.constant 0.000000e+00 : f32
    %35 = vector.broadcast %cst_24 : f32 to vector<128x256xf32>
    %36 = arith.maximumf %34, %35 : vector<128x256xf32>
    %37 = arith.truncf %36 : vector<128x256xf32> to vector<128x256xbf16>
    %c3 = arith.constant 3 : index
    %c0_25 = arith.constant 0 : index
    %c0_26 = arith.constant 0 : index
    %38 = vector.load %arg4[%c3, %c0_25, %c0_26] : memref<10x128x128xbf16, #tpu.memory_space<vmem>>, vector<1x128x128xbf16>
    %39 = vector.shape_cast %38 : vector<1x128x128xbf16> to vector<128x128xbf16>
    %cst_27 = arith.constant dense<0.000000e+00> : vector<128x256xf32>
    %40 = tpu.matmul %39, %37, %cst_27 {dimension_numbers = #tpu.dot_dimension_numbers<[1], [0], [0], [1], [0, 0, 1, 1], [], []>} : vector<128x128xbf16>, vector<128x256xbf16>, vector<128x256xf32> -> vector<128x256xf32>
    %41 = arith.addf %40, %7 : vector<128x256xf32>
    %cst_28 = arith.constant 0.000000e+00 : f32
    %42 = vector.broadcast %cst_28 : f32 to vector<128x256xf32>
    %43 = arith.maximumf %41, %42 : vector<128x256xf32>
    %44 = arith.truncf %43 : vector<128x256xf32> to vector<128x256xbf16>
    %c4 = arith.constant 4 : index
    %c0_29 = arith.constant 0 : index
    %c0_30 = arith.constant 0 : index
    %45 = vector.load %arg4[%c4, %c0_29, %c0_30] : memref<10x128x128xbf16, #tpu.memory_space<vmem>>, vector<1x128x128xbf16>
    %46 = vector.shape_cast %45 : vector<1x128x128xbf16> to vector<128x128xbf16>
    %cst_31 = arith.constant dense<0.000000e+00> : vector<128x256xf32>
    %47 = tpu.matmul %46, %44, %cst_31 {dimension_numbers = #tpu.dot_dimension_numbers<[1], [0], [0], [1], [0, 0, 1, 1], [], []>} : vector<128x128xbf16>, vector<128x256xbf16>, vector<128x256xf32> -> vector<128x256xf32>
    %c0_32 = arith.constant 0 : index
    %c4_33 = arith.constant 4 : index
    %48 = vector.load %arg5[%c0_32, %c4_33] : memref<128x10xf32, #tpu.memory_space<vmem>>, vector<128x1xf32>
    %49 = vector.broadcast %48 : vector<128x1xf32> to vector<128x256xf32>
    %50 = arith.addf %47, %49 : vector<128x256xf32>
    %cst_34 = arith.constant 0.000000e+00 : f32
    %51 = vector.broadcast %cst_34 : f32 to vector<128x256xf32>
    %52 = arith.maximumf %50, %51 : vector<128x256xf32>
    %53 = arith.truncf %52 : vector<128x256xf32> to vector<128x256xbf16>
    %54 = vector.extract_strided_slice %5 {offsets = [128, 0], sizes = [128, 256], strides = [1, 1]} : vector<512x256xf32> to vector<128x256xf32>
    %55 = vector.extract_strided_slice %5 {offsets = [384, 0], sizes = [128, 256], strides = [1, 1]} : vector<512x256xf32> to vector<128x256xf32>
    %cst_35 = arith.constant 0.000000e+00 : f32
    %56 = vector.broadcast %cst_35 : f32 to vector<128x256xf32>
    %57 = arith.maximumf %54, %56 : vector<128x256xf32>
    %58 = arith.truncf %57 : vector<128x256xf32> to vector<128x256xbf16>
    %c5 = arith.constant 5 : index
    %c0_36 = arith.constant 0 : index
    %c0_37 = arith.constant 0 : index
    %59 = vector.load %arg4[%c5, %c0_36, %c0_37] : memref<10x128x128xbf16, #tpu.memory_space<vmem>>, vector<1x128x128xbf16>
    %60 = vector.shape_cast %59 : vector<1x128x128xbf16> to vector<128x128xbf16>
    %cst_38 = arith.constant dense<0.000000e+00> : vector<128x256xf32>
    %61 = tpu.matmul %60, %58, %cst_38 {dimension_numbers = #tpu.dot_dimension_numbers<[1], [0], [0], [1], [0, 0, 1, 1], [], []>} : vector<128x128xbf16>, vector<128x256xbf16>, vector<128x256xf32> -> vector<128x256xf32>
    %c0_39 = arith.constant 0 : index
    %c5_40 = arith.constant 5 : index
    %62 = vector.load %arg5[%c0_39, %c5_40] : memref<128x10xf32, #tpu.memory_space<vmem>>, vector<128x1xf32>
    %63 = vector.broadcast %62 : vector<128x1xf32> to vector<128x256xf32>
    %64 = arith.addf %61, %63 : vector<128x256xf32>
    %cst_41 = arith.constant 0.000000e+00 : f32
    %65 = vector.broadcast %cst_41 : f32 to vector<128x256xf32>
    %66 = arith.maximumf %64, %65 : vector<128x256xf32>
    %67 = arith.truncf %66 : vector<128x256xf32> to vector<128x256xbf16>
    %c6 = arith.constant 6 : index
    %c0_42 = arith.constant 0 : index
    %c0_43 = arith.constant 0 : index
    %68 = vector.load %arg4[%c6, %c0_42, %c0_43] : memref<10x128x128xbf16, #tpu.memory_space<vmem>>, vector<1x128x128xbf16>
    %69 = vector.shape_cast %68 : vector<1x128x128xbf16> to vector<128x128xbf16>
    %cst_44 = arith.constant dense<0.000000e+00> : vector<128x256xf32>
    %70 = tpu.matmul %69, %67, %cst_44 {dimension_numbers = #tpu.dot_dimension_numbers<[1], [0], [0], [1], [0, 0, 1, 1], [], []>} : vector<128x128xbf16>, vector<128x256xbf16>, vector<128x256xf32> -> vector<128x256xf32>
    %c0_45 = arith.constant 0 : index
    %c6_46 = arith.constant 6 : index
    %71 = vector.load %arg5[%c0_45, %c6_46] : memref<128x10xf32, #tpu.memory_space<vmem>>, vector<128x1xf32>
    %72 = vector.broadcast %71 : vector<128x1xf32> to vector<128x256xf32>
    %73 = arith.addf %70, %72 : vector<128x256xf32>
    %cst_47 = arith.constant 0.000000e+00 : f32
    %74 = vector.broadcast %cst_47 : f32 to vector<128x256xf32>
    %75 = arith.maximumf %73, %74 : vector<128x256xf32>
    %76 = arith.truncf %75 : vector<128x256xf32> to vector<128x256xbf16>
    %c7 = arith.constant 7 : index
    %c0_48 = arith.constant 0 : index
    %c0_49 = arith.constant 0 : index
    %77 = vector.load %arg4[%c7, %c0_48, %c0_49] : memref<10x128x128xbf16, #tpu.memory_space<vmem>>, vector<1x128x128xbf16>
    %78 = vector.shape_cast %77 : vector<1x128x128xbf16> to vector<128x128xbf16>
    %cst_50 = arith.constant dense<0.000000e+00> : vector<128x256xf32>
    %79 = tpu.matmul %78, %76, %cst_50 {dimension_numbers = #tpu.dot_dimension_numbers<[1], [0], [0], [1], [0, 0, 1, 1], [], []>} : vector<128x128xbf16>, vector<128x256xbf16>, vector<128x256xf32> -> vector<128x256xf32>
    %c0_51 = arith.constant 0 : index
    %c7_52 = arith.constant 7 : index
    %80 = vector.load %arg5[%c0_51, %c7_52] : memref<128x10xf32, #tpu.memory_space<vmem>>, vector<128x1xf32>
    %81 = vector.broadcast %80 : vector<128x1xf32> to vector<128x256xf32>
    %82 = arith.addf %79, %81 : vector<128x256xf32>
    %cst_53 = arith.constant 0.000000e+00 : f32
    %83 = vector.broadcast %cst_53 : f32 to vector<128x256xf32>
    %84 = arith.maximumf %82, %83 : vector<128x256xf32>
    %85 = arith.truncf %84 : vector<128x256xf32> to vector<128x256xbf16>
    %c8 = arith.constant 8 : index
    %c0_54 = arith.constant 0 : index
    %c0_55 = arith.constant 0 : index
    %86 = vector.load %arg4[%c8, %c0_54, %c0_55] : memref<10x128x128xbf16, #tpu.memory_space<vmem>>, vector<1x128x128xbf16>
    %87 = vector.shape_cast %86 : vector<1x128x128xbf16> to vector<128x128xbf16>
    %cst_56 = arith.constant dense<0.000000e+00> : vector<128x256xf32>
    %88 = tpu.matmul %87, %85, %cst_56 {dimension_numbers = #tpu.dot_dimension_numbers<[1], [0], [0], [1], [0, 0, 1, 1], [], []>} : vector<128x128xbf16>, vector<128x256xbf16>, vector<128x256xf32> -> vector<128x256xf32>
    %89 = arith.addf %88, %55 : vector<128x256xf32>
    %cst_57 = arith.constant 0.000000e+00 : f32
    %90 = vector.broadcast %cst_57 : f32 to vector<128x256xf32>
    %91 = arith.maximumf %89, %90 : vector<128x256xf32>
    %92 = arith.truncf %91 : vector<128x256xf32> to vector<128x256xbf16>
    %c9 = arith.constant 9 : index
    %c0_58 = arith.constant 0 : index
    %c0_59 = arith.constant 0 : index
    %93 = vector.load %arg4[%c9, %c0_58, %c0_59] : memref<10x128x128xbf16, #tpu.memory_space<vmem>>, vector<1x128x128xbf16>
    %94 = vector.shape_cast %93 : vector<1x128x128xbf16> to vector<128x128xbf16>
    %cst_60 = arith.constant dense<0.000000e+00> : vector<128x256xf32>
    %95 = tpu.matmul %94, %92, %cst_60 {dimension_numbers = #tpu.dot_dimension_numbers<[1], [0], [0], [1], [0, 0, 1, 1], [], []>} : vector<128x128xbf16>, vector<128x256xbf16>, vector<128x256xf32> -> vector<128x256xf32>
    %c0_61 = arith.constant 0 : index
    %c9_62 = arith.constant 9 : index
    %96 = vector.load %arg5[%c0_61, %c9_62] : memref<128x10xf32, #tpu.memory_space<vmem>>, vector<128x1xf32>
    %97 = vector.broadcast %96 : vector<128x1xf32> to vector<128x256xf32>
    %98 = arith.addf %95, %97 : vector<128x256xf32>
    %cst_63 = arith.constant 0.000000e+00 : f32
    %99 = vector.broadcast %cst_63 : f32 to vector<128x256xf32>
    %100 = arith.maximumf %98, %99 : vector<128x256xf32>
    %101 = arith.truncf %100 : vector<128x256xf32> to vector<128x256xbf16>
    %c0_64 = arith.constant 0 : index
    %c0_65 = arith.constant 0 : index
    %c0_66 = arith.constant 0 : index
    %102 = vector.load %arg6[%c0_64, %c0_65, %c0_66] : memref<2x8x128xbf16, #tpu.memory_space<vmem>>, vector<1x8x128xbf16>
    %103 = vector.shape_cast %102 : vector<1x8x128xbf16> to vector<8x128xbf16>
    %cst_67 = arith.constant dense<0.000000e+00> : vector<8x256xf32>
    %104 = tpu.matmul %103, %53, %cst_67 {dimension_numbers = #tpu.dot_dimension_numbers<[1], [0], [0], [1], [0, 0, 1, 1], [], []>} : vector<8x128xbf16>, vector<128x256xbf16>, vector<8x256xf32> -> vector<8x256xf32>
    %c0_68 = arith.constant 0 : index
    %c0_69 = arith.constant 0 : index
    %c0_70 = arith.constant 0 : index
    %105 = vector.load %arg7[%c0_68, %c0_69, %c0_70] : memref<2x8x1xf32, #tpu.memory_space<vmem>>, vector<1x8x1xf32>
    %106 = vector.shape_cast %105 : vector<1x8x1xf32> to vector<8x1xf32>
    %107 = vector.broadcast %106 : vector<8x1xf32> to vector<8x256xf32>
    %108 = arith.addf %104, %107 : vector<8x256xf32>
    %c1_71 = arith.constant 1 : index
    %c0_72 = arith.constant 0 : index
    %c0_73 = arith.constant 0 : index
    %109 = vector.load %arg6[%c1_71, %c0_72, %c0_73] : memref<2x8x128xbf16, #tpu.memory_space<vmem>>, vector<1x8x128xbf16>
    %110 = vector.shape_cast %109 : vector<1x8x128xbf16> to vector<8x128xbf16>
    %cst_74 = arith.constant dense<0.000000e+00> : vector<8x256xf32>
    %111 = tpu.matmul %110, %101, %cst_74 {dimension_numbers = #tpu.dot_dimension_numbers<[1], [0], [0], [1], [0, 0, 1, 1], [], []>} : vector<8x128xbf16>, vector<128x256xbf16>, vector<8x256xf32> -> vector<8x256xf32>
    %c1_75 = arith.constant 1 : index
    %c0_76 = arith.constant 0 : index
    %c0_77 = arith.constant 0 : index
    %112 = vector.load %arg7[%c1_75, %c0_76, %c0_77] : memref<2x8x1xf32, #tpu.memory_space<vmem>>, vector<1x8x1xf32>
    %113 = vector.shape_cast %112 : vector<1x8x1xf32> to vector<8x1xf32>
    %114 = vector.broadcast %113 : vector<8x1xf32> to vector<8x256xf32>
    %115 = arith.addf %111, %114 : vector<8x256xf32>
    %116 = vector.extract_strided_slice %1 {offsets = [0, 0], sizes = [3, 256], strides = [1, 1]} : vector<40x256xf32> to vector<3x256xf32>
    %117 = vector.extract_strided_slice %108 {offsets = [0, 0], sizes = [3, 256], strides = [1, 1]} : vector<8x256xf32> to vector<3x256xf32>
    %118 = arith.addf %116, %117 : vector<3x256xf32>
    %119 = vector.extract_strided_slice %115 {offsets = [0, 0], sizes = [3, 256], strides = [1, 1]} : vector<8x256xf32> to vector<3x256xf32>
    %cst_78 = arith.constant 0.000000e+00 : f32
    %120 = vector.broadcast %cst_78 : f32 to vector<2x256xf32>
    %121 = tpu.concatenate %118, %119, %120 in 0 : vector<3x256xf32>, vector<3x256xf32>, vector<2x256xf32> -> vector<8x256xf32>
    %c0_79 = arith.constant 0 : index
    %c0_80 = arith.constant 0 : index
    %c0_81 = arith.constant 0 : index
    %122 = vector.load %arg8[%c0_79, %c0_80, %c0_81] : memref<1x8x256xf32, #tpu.memory_space<vmem>>, vector<1x8x256xf32>
    %123 = vector.shape_cast %122 : vector<1x8x256xf32> to vector<8x256xf32>
    %124 = vector.shape_cast %121 : vector<8x256xf32> to vector<1x8x256xf32>
    tpu.vector_store %arg8[%c0_79, %c0_80, %c0_81], %124 {strides = array<i32>} : memref<1x8x256xf32, #tpu.memory_space<vmem>>, vector<1x8x256xf32>,
    return
  }
  func.func @transform_0(%arg0: i32, %arg1: i32) -> (i32, i32, i32) {
    %c0_i32 = arith.constant 0 : i32
    %c0_i32_0 = arith.constant 0 : i32
    return %arg0, %c0_i32, %arg1 : i32, i32, i32
  }
  func.func @transform_1(%arg0: i32, %arg1: i32) -> (i32, i32, i32) {
    %c0_i32 = arith.constant 0 : i32
    %c0_i32_0 = arith.constant 0 : i32
    %c0_i32_1 = arith.constant 0 : i32
    return %arg0, %c0_i32, %c0_i32_0 : i32, i32, i32
  }
  func.func @transform_2(%arg0: i32, %arg1: i32) -> (i32, i32, i32) {
    %c0_i32 = arith.constant 0 : i32
    %c0_i32_0 = arith.constant 0 : i32
    %c0_i32_1 = arith.constant 0 : i32
    %c0_i32_2 = arith.constant 0 : i32
    return %c0_i32, %c0_i32_0, %c0_i32_1 : i32, i32, i32
  }
  func.func @transform_3(%arg0: i32, %arg1: i32) -> (i32, i32) {
    %c0_i32 = arith.constant 0 : i32
    %c0_i32_0 = arith.constant 0 : i32
    %c0_i32_1 = arith.constant 0 : i32
    return %c0_i32, %c0_i32_0 : i32, i32
  }
  func.func @transform_4(%arg0: i32, %arg1: i32) -> (i32, i32, i32) {
    %c0_i32 = arith.constant 0 : i32
    %c0_i32_0 = arith.constant 0 : i32
    %c0_i32_1 = arith.constant 0 : i32
    %c0_i32_2 = arith.constant 0 : i32
    return %c0_i32, %c0_i32_0, %c0_i32_1 : i32, i32, i32
  }
  func.func @transform_5(%arg0: i32, %arg1: i32) -> (i32, i32, i32) {
    %c0_i32 = arith.constant 0 : i32
    %c0_i32_0 = arith.constant 0 : i32
    %c0_i32_1 = arith.constant 0 : i32
    %c0_i32_2 = arith.constant 0 : i32
    return %c0_i32, %c0_i32_0, %c0_i32_1 : i32, i32, i32
  }
  func.func @transform_6(%arg0: i32, %arg1: i32) -> (i32, i32, i32) {
    %c0_i32 = arith.constant 0 : i32
    %c0_i32_0 = arith.constant 0 : i32
    return %arg0, %c0_i32, %arg1 : i32, i32, i32
  }
}

</mosaic_0001>

<bundles_post_ra>
// kernel: _lambda_.1
= control target key start
LH: loop header
LB: loop body
LE: loop exit
PB: predicated region body
PF: predicated region fallthrough
CT: control target
= control target key end

     0   :  { %s4753_s21 = smov 0   ;;  %s4755_s22 = smov 0   ;;  %s5895_s0 = inlined_call_operand.vmem [shape: f32[2,40,256], index: 0, kind: input, shape index: {}]   ;;  %s5896_s1 = inlined_call_operand.vmem [shape: bf16[2,512,40], index: 1, kind: input, shape index: {}]   ;;  %s5897_s2 = inlined_call_operand.vmem [shape: bf16[10,128,128], index: 2, kind: input, shape index: {}]   ;;  %s5898_s3 = inlined_call_operand.vmem [shape: f32[128,10], index: 3, kind: input, shape index: {}]   ;;  %s5899_s4 = inlined_call_operand.vmem [shape: bf16[2,8,128], index: 4, kind: input, shape index: {}]   ;;  %s5900_s5 = inlined_call_operand.vmem [shape: f32[2,8,1], index: 5, kind: input, shape index: {}]   ;;  %s5901_s6 = inlined_call_operand.vmem [shape: f32[2,8,256], index: 6, kind: output, shape index: {}]  }
   0x1   :  { %s4757_s23 = smov 0  }
   0x2 LB: > { %s28_s24 = sadd.s32 1, %s4704_s22  ;;  %p4125_p0 = scmp.ge.s32.totalorder %s4708_s23, 1  ;;  %s4708_s23 = sphi %s4757_s23, %s16_s23   ;;  %s4704_s22 = sphi %s4755_s22, %s5996_s22   ;;  %s4700_s21 = sphi %s4753_s21, %s5995_s21  }
   0x3   : > { %p30_p1 = scmp.ge.s32.totalorder %s28_s24, 2  ;;  %p243_p2 = scmp.lt.s32.totalorder %s4708_s23, 3 }
   0x5   : > { %s5998_s24 = smov (%p30_p1, %s28_s24), 0  ;;  %p244_p3 = pnand %p4125_p0, %p243_p2 }
   0x7   : > { %247 = sbr.rel (%p244_p3) target bundleno = 3123 (0xc33), region = 44 }
   0xe   : > { %p287_p4 = scmp.lt.s32.totalorder %s4700_s21, 1  ;;  %v5902_v0 = vmov 0   ;;  %vm649_vm0 = vcmask 1043456   ;;  %vm552_vm1 = vcmask 326656   ;;  %v4826_v26 = vld [vmem:[%s5898_s3] sm:$0xff]  ;;  %v4831_v27 = vld [vmem:[%s5898_s3 + $0x10] sm:$0xff] }
   0xf   : > { %688 = vmatprep.mubr.bf16.mxu0 %v5902_v0  ;;  %1249 = vmatprep.mubr.bf16.mxu1 %v5902_v0  ;;  %v4838_v28 = vld [vmem:[%s5898_s3 + $0x8] sm:$0xff]  ;;  %v4843_v29 = vld [vmem:[%s5898_s3 + $0x18] sm:$0xff]  ;;  %v4850_v33 = vld [vmem:[%s5898_s3 + $0x20] sm:$0xff]  ;;  %vm4014_vm2 = vcmask 1042432   ;;  %vm4017_vm3 = vcmask 1045504  }
  0x10   : > { %s6000_s21 = smov (!%p287_p4, %s4700_s21), 1  ;;  %4523 = vset.pattern.permute.xlu0 %v5902_v0  ;;  %4524 = vset.pattern.permute.xlu1 %v5902_v0  ;;  %v4855_v34 = vld [vmem:[%s5898_s3 + $0x28] sm:$0xff]  ;;  %v4862_v42 = vld [vmem:[%s5898_s3 + $0x30] sm:$0xff]  ;;  %v4867_v43 = vld [vmem:[%s5898_s3 + $0x38] sm:$0xff] }
  0x11   : > { %s4490_s25 = smul.u32 80, %s6000_s21  ;;  %s4424_s26 = sshll.u32 %s6000_s21, 8  ;;  %1091 = vperm.xlu0 %4523, %v4826_v26   ;;  %1101 = vperm.xlu1 %4524, %v4831_v27   ;;  %v4874_v47 = vld [vmem:[%s5898_s3 + $0x40] sm:$0xff]  ;;  %v4879_v51 = vld [vmem:[%s5898_s3 + $0x48] sm:$0xff]  ;;  %v4886_v56 = vld [vmem:[%s5898_s3 + $0x50] sm:$0xff] }
  0x12   : > { %s4782_s29 = scalar_lea.vmem %s5896_s1, %s4424_s26  ;;  %v4891_v57 = vld [vmem:[%s5898_s3 + $0x58] sm:$0xff]  ;;  %v4898_v61 = vld [vmem:[%s5898_s3 + $0x60] sm:$0xff] }
  0x13   : > { %s4787_s8 = scalar_lea.vmem %s5895_s0, %s4490_s25  ;;  %v4556_v18 = vld [vmem:[%s4782_s29] sm:$0xff]   ;;  %v4557_v19 = vld [vmem:[%s4782_s29 + $0x8] sm:$0xff]   ;;  %v4558_v20 = vld [vmem:[%s4782_s29 + $0x10] sm:$0xff]  }
  0x14   : > { %v313_v1 = vld [vmem:[%s4787_s8 + $0x8] sm:$0xff]  ;;  %v315_v2 = vld [vmem:[%s4787_s8 + $0x18] sm:$0xff]  ;;  %v312_v3 = vld [vmem:[%s4787_s8] sm:$0xff] }
  0x15   : > { %v387_v4 = vpack.c.bf16 %v315_v2, %v313_v1  ;;  %v314_v5 = vld [vmem:[%s4787_s8 + $0x10] sm:$0xff]  ;;  %v317_v6 = vld [vmem:[%s4787_s8 + $0x28] sm:$0xff]  ;;  %v319_v7 = vld [vmem:[%s4787_s8 + $0x38] sm:$0xff]  ;;  %1096 = vperm.xlu0 %4523, %v4838_v28   ;;  %1106 = vperm.xlu1 %4524, %v4843_v29  }
  0x16   : > { %v386_v8 = vpack.c.bf16 %v314_v5, %v312_v3  ;;  %v389_v9 = vpack.c.bf16 %v319_v7, %v317_v6  ;;  %v316_v10 = vld [vmem:[%s4787_s8 + $0x20] sm:$0xff]  ;;  %v318_v11 = vld [vmem:[%s4787_s8 + $0x30] sm:$0xff]  ;;  %v321_v12 = vld [vmem:[%s4787_s8 + $0x48] sm:$0xff] }
  0x17   : > { %656 = vmatprep.subr.bf16.mxu0 %v387_v4  ;;  %v320_v13 = vld [vmem:[%s4787_s8 + $0x40] sm:$0xff]  ;;  %v388_v14 = vpack.c.bf16 %v318_v11, %v316_v10  ;;  %v391_v15 = vpack.c.bf16 %v321_v12, %v321_v12  ;;  %v4559_v21 = vld [vmem:[%s4782_s29 + $0x18] sm:$0xff]   ;;  %v4561_v23 = vld [vmem:[%s4782_s29 + $0x28] sm:$0xff]  }
  0x18   : > { %657 = vmatpush1.bf16.msra.mxu0 %v386_v8  ;;  %v390_v16 = vpack.c.bf16 %v320_v13, %v320_v13  ;;  %v4560_v22 = vld [vmem:[%s4782_s29 + $0x20] sm:$0xff]   ;;  %v4562_v24 = vld [vmem:[%s4782_s29 + $0x30] sm:$0xff]   ;;  %v4563_v25 = vld [vmem:[%s4782_s29 + $0x38] sm:$0xff]  }
  0x19   : > { %658 = vmatprep.subr.bf16.mxu0 %v389_v9  ;;  %1111 = vperm.xlu0 %4523, %v4850_v33   ;;  %v4903_v2 = vld [vmem:[%s5898_s3 + $0x68] sm:$0xff]  ;;  %v4910_v7 = vld [vmem:[%s5898_s3 + $0x70] sm:$0xff]  ;;  %v4915_v8 = vld [vmem:[%s5898_s3 + $0x78] sm:$0xff] }
  0x1a   : > { %v651_v17 = vsel %vm649_vm0, %v390_v16, 0  ;;  %1116 = vperm.xlu1 %4524, %v4855_v34  }
  0x1c   : > { %659 = vmatpush1.bf16.msra.mxu0 %v388_v14 }
  0x1d   : > { %4163 = vmatprep.subr.msk.bf16.mxu0 %vm649_vm0, %v391_v15  ;;  %1121 = vperm.xlu0 %4523, %v4862_v42  }
  0x1e   : > { %1126 = vperm.xlu1 %4524, %v4867_v43  }
  0x20   : > { %661 = vmatpush1.bf16.msra.mxu0 %v651_v17 }
  0x21   : > { %1131 = vperm.xlu0 %4523, %v4874_v47  }
  0x22   : > { %1136 = vperm.xlu1 %4524, %v4879_v51  }
  0x23   : > { %4164 = vmatmul.mubr.msk.bf16.vlgmr.msra.gmra.mrb[0].mxu0 %vm552_vm1, %v4556_v18 }
  0x24   : > { %698 = vmatprep.mubr.bf16.mxu0 %v5902_v0 }
  0x25   : > { %1141 = vperm.xlu0 %4523, %v4886_v56  }
  0x26   : > { %1146 = vperm.xlu1 %4524, %v4891_v57  }
  0x29   : > { %1151 = vperm.xlu0 %4523, %v4898_v61  }
  0x2a   : > { %1156 = vperm.xlu1 %4524, %v4903_v2  }
  0x2b   : > { %4165 = vmatmul.mubr.msk.bf16.gmra.mrb[4].mxu0 %vm552_vm1, %v4557_v19 }
  0x2c   : > { %708 = vmatprep.mubr.bf16.mxu0 %v5902_v0 }
  0x2d   : > { %1161 = vperm.xlu0 %4523, %v4910_v7  }
  0x2e   : > { %1166 = vperm.xlu1 %4524, %v4915_v8  }
  0x33   : > { %4166 = vmatmul.mubr.msk.bf16.gmra.mrb[8].mxu0 %vm552_vm1, %v4558_v20 }
  0x34   : > { %718 = vmatprep.mubr.bf16.mxu0 %v5902_v0 }
  0x3b   : > { %4167 = vmatmul.mubr.msk.bf16.gmra.mrb[12].mxu0 %vm552_vm1, %v4559_v21 }
  0x3c   : > { %728 = vmatprep.mubr.bf16.mxu0 %v5902_v0 }
  0x43   : > { %4168 = vmatmul.mubr.msk.bf16.gmra.mrb[16].mxu0 %vm552_vm1, %v4560_v22 }
  0x44   : > { %738 = vmatprep.mubr.bf16.mxu0 %v5902_v0 }
  0x4b   : > { %4169 = vmatmul.mubr.msk.bf16.gmra.mrb[20].mxu0 %vm552_vm1, %v4561_v23 }
  0x4c   : > { %748 = vmatprep.mubr.bf16.mxu0 %v5902_v0 }
  0x53   : > { %4170 = vmatmul.mubr.msk.bf16.gmra.mrb[24].mxu0 %vm552_vm1, %v4562_v24 }
  0x54   : > { %758 = vmatprep.mubr.bf16.mxu0 %v5902_v0 }
  0x5b   : > { %4171 = vmatmul.mubr.msk.bf16.gmra.mrb[28].mxu0 %vm552_vm1, %v4563_v25 }
  0x5c   : > { %768 = vmatprep.mubr.bf16.mxu0 %v5902_v0 }
  0xf6   : > { %v690_v30 = vpop.f32.mrb[0].mxu0 }
  0xf7   : > { %v692_v31 = vpop.f32.mrb[1].mxu0  ;;  %v1009_v35 = vmax.f32 %v690_v30, 0.0 }
  0xf8   : > { %v694_v32 = vpop.f32.mrb[2].mxu0  ;;  %v1010_v38 = vmax.f32 %v692_v31, 0.0 }
  0xf9   : > { %v1011_v36 = vmax.f32 %v694_v32, 0.0  ;;  %v696_v37 = vpop.f32.mrb[3].mxu0 }
  0xfa   : > { %v1012_v39 = vmax.f32 %v696_v37, 0.0 }
  0xfb   : > { %v1041_v40 = vpack.c.bf16 %v1011_v36, %v1009_v35 }
  0xfc   : > { %v1042_v41 = vpack.c.bf16 %v1012_v39, %v1010_v38 }
  0xfe   : > { %v700_v44 = vpop.f32.mrb[4].mxu0  ;;  %1217 = vmatprep.subr.bf16.mxu1 %v1042_v41 }
  0xff   : > { %v702_v45 = vpop.f32.mrb[5].mxu0  ;;  %1218 = vmatpush1.bf16.msra.mxu1 %v1041_v40  ;;  %v1013_v48 = vmax.f32 %v700_v44, 0.0 }
 0x100   : > { %v704_v46 = vpop.f32.mrb[6].mxu0  ;;  %v1014_v52 = vmax.f32 %v702_v45, 0.0 }
 0x101   : > { %v1015_v49 = vmax.f32 %v704_v46, 0.0  ;;  %v706_v50 = vpop.f32.mrb[7].mxu0 }
 0x102   : > { %v1016_v53 = vmax.f32 %v706_v50, 0.0 }
 0x103   : > { %v1043_v54 = vpack.c.bf16 %v1015_v49, %v1013_v48 }
 0x104   : > { %v1044_v55 = vpack.c.bf16 %v1016_v53, %v1014_v52 }
 0x106   : > { %v710_v58 = vpop.f32.mrb[8].mxu0  ;;  %1219 = vmatprep.subr.bf16.mxu1 %v1044_v55 }
 0x107   : > { %v712_v59 = vpop.f32.mrb[9].mxu0  ;;  %1220 = vmatpush1.bf16.msra.mxu1 %v1043_v54  ;;  %v1017_v62 = vmax.f32 %v710_v58, 0.0 }
 0x108   : > { %v714_v60 = vpop.f32.mrb[10].mxu0  ;;  %v1018_v3 = vmax.f32 %v712_v59, 0.0 }
 0x109   : > { %v1019_v63 = vmax.f32 %v714_v60, 0.0  ;;  %v716_v1 = vpop.f32.mrb[11].mxu0 }
 0x10a   : > { %v1020_v4 = vmax.f32 %v716_v1, 0.0 }
 0x10b   : > { %v1045_v5 = vpack.c.bf16 %v1019_v63, %v1017_v62 }
 0x10c   : > { %v1046_v6 = vpack.c.bf16 %v1020_v4, %v1018_v3 }
 0x10e   : > { %v720_v9 = vpop.f32.mrb[12].mxu0  ;;  %1221 = vmatprep.subr.bf16.mxu1 %v1046_v6 }
 0x10f   : > { %v722_v10 = vpop.f32.mrb[13].mxu0  ;;  %1222 = vmatpush1.bf16.msra.mxu1 %v1045_v5  ;;  %v1021_v12 = vmax.f32 %v720_v9, 0.0 }
 0x110   : > { %v724_v11 = vpop.f32.mrb[14].mxu0  ;;  %v1022_v15 = vmax.f32 %v722_v10, 0.0 }
 0x111   : > { %v1023_v13 = vmax.f32 %v724_v11, 0.0  ;;  %v726_v14 = vpop.f32.mrb[15].mxu0 }
 0x112   : > { %v1024_v16 = vmax.f32 %v726_v14, 0.0  ;;  %v4566_v14 = vld [vmem:[%s5897_s2 + $0x10] sm:$0xff]  }
 0x113   : > { %v1047_v17 = vpack.c.bf16 %v1023_v13, %v1021_v12  ;;  %v4564_v12 = vld [vmem:[%s5897_s2] sm:$0xff]   ;;  %v4565_v13 = vld [vmem:[%s5897_s2 + $0x8] sm:$0xff]  }
 0x114   : > { %v1048_v18 = vpack.c.bf16 %v1024_v16, %v1022_v15  ;;  %v4567_v15 = vld [vmem:[%s5897_s2 + $0x18] sm:$0xff]   ;;  %v4568_v16 = vld [vmem:[%s5897_s2 + $0x20] sm:$0xff]  }
 0x116   : > { %v730_v19 = vpop.f32.mrb[16].mxu0  ;;  %1223 = vmatprep.subr.bf16.mxu1 %v1048_v18  ;;  %v4570_v18 = vld [vmem:[%s5897_s2 + $0x30] sm:$0xff]  }
 0x117   : > { %v732_v20 = vpop.f32.mrb[17].mxu0  ;;  %1224 = vmatpush1.bf16.msra.mxu1 %v1047_v17  ;;  %v1025_v22 = vmax.f32 %v730_v19, 0.0  ;;  %v4569_v17 = vld [vmem:[%s5897_s2 + $0x28] sm:$0xff]   ;;  %v4571_v19 = vld [vmem:[%s5897_s2 + $0x38] sm:$0xff]  }
 0x118   : > { %v734_v21 = vpop.f32.mrb[18].mxu0  ;;  %v1026_v25 = vmax.f32 %v732_v20, 0.0  ;;  %v1092_v20 = vpop.permute.xlu0 %1091 }
 0x119   : > { %v1027_v23 = vmax.f32 %v734_v21, 0.0  ;;  %v736_v24 = vpop.f32.mrb[19].mxu0  ;;  %v4711_v21 = vmov 1  }
 0x11a   : > { %v1028_v30 = vmax.f32 %v736_v24, 0.0  ;;  %4525 = vset.pattern.permute.xlu0 %v4711_v21  ;;  %4526 = vset.pattern.permute.xlu1 %v4711_v21 }
 0x11b   : > { %v1049_v31 = vpack.c.bf16 %v1027_v23, %v1025_v22  ;;  %1396 = vperm.xlu0 %4525, %v4826_v26   ;;  %1400 = vperm.xlu1 %4526, %v4838_v28  }
 0x11c   : > { %v1050_v32 = vpack.c.bf16 %v1028_v30, %v1026_v25  ;;  %v1097_v23 = vpop.permute.xlu0 %1096 }
 0x11e   : > { %v740_v35 = vpop.f32.mrb[20].mxu0  ;;  %1225 = vmatprep.subr.bf16.mxu1 %v1050_v32 }
 0x11f   : > { %v742_v36 = vpop.f32.mrb[21].mxu0  ;;  %1226 = vmatpush1.bf16.msra.mxu1 %v1049_v31  ;;  %v1029_v38 = vmax.f32 %v740_v35, 0.0  ;;  %1404 = vperm.xlu1 %4526, %v4831_v27  }
 0x120   : > { %v744_v37 = vpop.f32.mrb[22].mxu0  ;;  %v1030_v41 = vmax.f32 %v742_v36, 0.0  ;;  %v1102_v36 = vpop.permute.xlu1 %1101  ;;  %1408 = vperm.xlu0 %4525, %v4843_v29  }
 0x121   : > { %v1031_v39 = vmax.f32 %v744_v37, 0.0  ;;  %v746_v40 = vpop.f32.mrb[23].mxu0 }
 0x122   : > { %v1032_v44 = vmax.f32 %v746_v40, 0.0 }
 0x123   : > { %v1051_v45 = vpack.c.bf16 %v1031_v39, %v1029_v38  ;;  %1412 = vperm.xlu1 %4526, %v4850_v33  }
 0x124   : > { %v1052_v46 = vpack.c.bf16 %v1032_v44, %v1030_v41  ;;  %1416 = vperm.xlu0 %4525, %v4855_v34  }
 0x126   : > { %v750_v48 = vpop.f32.mrb[24].mxu0  ;;  %1227 = vmatprep.subr.bf16.mxu1 %v1052_v46 }
 0x127   : > { %v752_v49 = vpop.f32.mrb[25].mxu0  ;;  %1228 = vmatpush1.bf16.msra.mxu1 %v1051_v45  ;;  %v1033_v52 = vmax.f32 %v750_v48, 0.0  ;;  %1420 = vperm.xlu1 %4526, %v4862_v42  }
 0x128   : > { %v754_v50 = vpop.f32.mrb[26].mxu0  ;;  %v1034_v55 = vmax.f32 %v752_v49, 0.0  ;;  %1424 = vperm.xlu0 %4525, %v4867_v43  }
 0x129   : > { %v1035_v53 = vmax.f32 %v754_v50, 0.0  ;;  %v756_v54 = vpop.f32.mrb[27].mxu0  ;;  %v1107_v50 = vpop.permute.xlu1 %1106 }
 0x12a   : > { %v1036_v58 = vmax.f32 %v756_v54, 0.0 }
 0x12b   : > { %v1053_v59 = vpack.c.bf16 %v1035_v53, %v1033_v52  ;;  %1428 = vperm.xlu1 %4526, %v4874_v47  }
 0x12c   : > { %v1054_v60 = vpack.c.bf16 %v1036_v58, %v1034_v55  ;;  %1432 = vperm.xlu0 %4525, %v4879_v51  }
 0x12e   : > { %v760_v62 = vpop.f32.mrb[28].mxu0  ;;  %1229 = vmatprep.subr.bf16.mxu1 %v1054_v60 }
 0x12f   : > { %v762_v63 = vpop.f32.mrb[29].mxu0  ;;  %1230 = vmatpush1.bf16.msra.mxu1 %v1053_v59  ;;  %v1037_v3 = vmax.f32 %v760_v62, 0.0  ;;  %1436 = vperm.xlu1 %4526, %v4886_v56  }
 0x130   : > { %v764_v1 = vpop.f32.mrb[30].mxu0  ;;  %v1038_v6 = vmax.f32 %v762_v63, 0.0  ;;  %1440 = vperm.xlu0 %4525, %v4891_v57  }
 0x131   : > { %v1039_v4 = vmax.f32 %v764_v1, 0.0  ;;  %v766_v5 = vpop.f32.mrb[31].mxu0 }
 0x132   : > { %v1040_v9 = vmax.f32 %v766_v5, 0.0 }
 0x133   : > { %v1055_v10 = vpack.c.bf16 %v1039_v4, %v1037_v3  ;;  %v1112_v3 = vpop.permute.xlu0 %1111  ;;  %1444 = vperm.xlu1 %4526, %v4898_v61  }
 0x134   : > { %v1056_v11 = vpack.c.bf16 %v1040_v9, %v1038_v6  ;;  %1448 = vperm.xlu0 %4525, %v4903_v2  }
 0x136   : > { %1231 = vmatprep.subr.bf16.mxu1 %v1056_v11 }
 0x137   : > { %1232 = vmatpush1.bf16.msra.mxu1 %v1055_v10  ;;  %v1117_v10 = vpop.permute.xlu1 %1116  ;;  %v1122_v21 = vpop.permute.xlu0 %1121  ;;  %1452 = vperm.xlu1 %4526, %v4910_v7  }
 0x138   : > { %1456 = vperm.xlu0 %4525, %v4915_v8  }
 0x13a   : > { %1250 = vmatmul.mubr.bf16.vlgmr.msra.gmra.mrb[0].mxu1 %v4564_v12 }
 0x13b   : > { %1259 = vmatprep.mubr.bf16.mxu1 %v5902_v0 }
 0x142   : > { %1260 = vmatmul.mubr.bf16.gmra.mrb[4].mxu1 %v4565_v13 }
 0x143   : > { %1269 = vmatprep.mubr.bf16.mxu1 %v5902_v0 }
 0x14a   : > { %1270 = vmatmul.mubr.bf16.gmra.mrb[8].mxu1 %v4566_v14 }
 0x14b   : > { %1279 = vmatprep.mubr.bf16.mxu1 %v5902_v0 }
 0x152   : > { %1280 = vmatmul.mubr.bf16.gmra.mrb[12].mxu1 %v4567_v15 }
 0x153   : > { %1289 = vmatprep.mubr.bf16.mxu1 %v5902_v0 }
 0x15a   : > { %1290 = vmatmul.mubr.bf16.gmra.mrb[16].mxu1 %v4568_v16 }
 0x15b   : > { %1299 = vmatprep.mubr.bf16.mxu1 %v5902_v0 }
 0x162   : > { %1300 = vmatmul.mubr.bf16.gmra.mrb[20].mxu1 %v4569_v17 }
 0x163   : > { %1309 = vmatprep.mubr.bf16.mxu1 %v5902_v0 }
 0x16a   : > { %1310 = vmatmul.mubr.bf16.gmra.mrb[24].mxu1 %v4570_v18 }
 0x16b   : > { %1319 = vmatprep.mubr.bf16.mxu1 %v5902_v0 }
 0x172   : > { %1320 = vmatmul.mubr.bf16.gmra.mrb[28].mxu1 %v4571_v19 }
 0x173   : > { %1539 = vmatprep.mubr.bf16.mxu1 %v5902_v0 }
 0x20d   : > { %v1251_v22 = vpop.f32.mrb[0].mxu1 }
 0x20e   : > { %v1252_v24 = vadd.f32 %v1251_v22, %v1092_v20  ;;  %v1253_v25 = vpop.f32.mrb[1].mxu1 }
 0x20f   : > { %v1254_v30 = vadd.f32 %v1253_v25, %v1092_v20  ;;  %v1255_v31 = vpop.f32.mrb[2].mxu1 }
 0x210   : > { %v1256_v32 = vadd.f32 %v1255_v31, %v1097_v23  ;;  %v1257_v35 = vpop.f32.mrb[3].mxu1  ;;  %v1330_v38 = vmax.f32 %v1252_v24, 0.0 }
 0x211   : > { %v1258_v37 = vadd.f32 %v1257_v35, %v1097_v23  ;;  %v1331_v40 = vmax.f32 %v1254_v30, 0.0  ;;  %v1127_v30 = vpop.permute.xlu1 %1126 }
 0x212   : > { %v1332_v39 = vmax.f32 %v1256_v32, 0.0 }
 0x213   : > { %v1333_v41 = vmax.f32 %v1258_v37, 0.0 }
 0x214   : > { %v1362_v44 = vpack.c.bf16 %v1332_v39, %v1330_v38 }
 0x215   : > { %v1363_v45 = vpack.c.bf16 %v1333_v41, %v1331_v40  ;;  %v1261_v46 = vpop.f32.mrb[4].mxu1 }
 0x216   : > { %v1262_v48 = vadd.f32 %v1261_v46, %v1102_v36  ;;  %v1263_v49 = vpop.f32.mrb[5].mxu1 }
 0x217   : > { %v1264_v52 = vadd.f32 %v1263_v49, %v1102_v36  ;;  %v1265_v53 = vpop.f32.mrb[6].mxu1  ;;  %1507 = vmatprep.subr.bf16.mxu1 %v1363_v45  ;;  %v1132_v45 = vpop.permute.xlu0 %1131 }
 0x218   : > { %v1266_v54 = vadd.f32 %v1265_v53, %v1107_v50  ;;  %v1267_v55 = vpop.f32.mrb[7].mxu1  ;;  %1508 = vmatpush1.bf16.msra.mxu1 %v1362_v44  ;;  %v1334_v59 = vmax.f32 %v1262_v48, 0.0 }
 0x219   : > { %v1268_v58 = vadd.f32 %v1267_v55, %v1107_v50  ;;  %v1335_v62 = vmax.f32 %v1264_v52, 0.0  ;;  %v1137_v52 = vpop.permute.xlu1 %1136 }
 0x21a   : > { %v1336_v60 = vmax.f32 %v1266_v54, 0.0 }
 0x21b   : > { %v1337_v63 = vmax.f32 %v1268_v58, 0.0 }
 0x21c   : > { %v1364_v1 = vpack.c.bf16 %v1336_v60, %v1334_v59 }
 0x21d   : > { %v1365_v4 = vpack.c.bf16 %v1337_v63, %v1335_v62  ;;  %v1271_v5 = vpop.f32.mrb[8].mxu1 }
 0x21e   : > { %v1272_v6 = vadd.f32 %v1271_v5, %v1112_v3  ;;  %v1273_v9 = vpop.f32.mrb[9].mxu1 }
 0x21f   : > { %v1274_v11 = vadd.f32 %v1273_v9, %v1112_v3  ;;  %v1275_v12 = vpop.f32.mrb[10].mxu1  ;;  %1509 = vmatprep.subr.bf16.mxu1 %v1365_v4  ;;  %v1142_v4 = vpop.permute.xlu0 %1141 }
 0x220   : > { %v1276_v13 = vadd.f32 %v1275_v12, %v1117_v10  ;;  %v1277_v14 = vpop.f32.mrb[11].mxu1  ;;  %1510 = vmatpush1.bf16.msra.mxu1 %v1364_v1  ;;  %v1338_v16 = vmax.f32 %v1272_v6, 0.0 }
 0x221   : > { %v1278_v15 = vadd.f32 %v1277_v14, %v1117_v10  ;;  %v1339_v18 = vmax.f32 %v1274_v11, 0.0  ;;  %v1147_v11 = vpop.permute.xlu1 %1146 }
 0x222   : > { %v1340_v17 = vmax.f32 %v1276_v13, 0.0 }
 0x223   : > { %v1341_v19 = vmax.f32 %v1278_v15, 0.0 }
 0x224   : > { %v1366_v20 = vpack.c.bf16 %v1340_v17, %v1338_v16 }
 0x225   : > { %v1367_v22 = vpack.c.bf16 %v1341_v19, %v1339_v18  ;;  %v1281_v23 = vpop.f32.mrb[12].mxu1 }
 0x226   : > { %v1282_v24 = vadd.f32 %v1281_v23, %v1122_v21  ;;  %v1283_v25 = vpop.f32.mrb[13].mxu1 }
 0x227   : > { %v1284_v31 = vadd.f32 %v1283_v25, %v1122_v21  ;;  %v1285_v32 = vpop.f32.mrb[14].mxu1  ;;  %1511 = vmatprep.subr.bf16.mxu1 %v1367_v22  ;;  %v1152_v22 = vpop.permute.xlu0 %1151 }
 0x228   : > { %v1286_v35 = vadd.f32 %v1285_v32, %v1127_v30  ;;  %v1287_v36 = vpop.f32.mrb[15].mxu1  ;;  %1512 = vmatpush1.bf16.msra.mxu1 %v1366_v20  ;;  %v1342_v38 = vmax.f32 %v1282_v24, 0.0 }
 0x229   : > { %v1288_v37 = vadd.f32 %v1287_v36, %v1127_v30  ;;  %v1343_v40 = vmax.f32 %v1284_v31, 0.0  ;;  %v1157_v31 = vpop.permute.xlu1 %1156 }
 0x22a   : > { %v1344_v39 = vmax.f32 %v1286_v35, 0.0 }
 0x22b   : > { %v1345_v41 = vmax.f32 %v1288_v37, 0.0 }
 0x22c   : > { %v1368_v44 = vpack.c.bf16 %v1344_v39, %v1342_v38 }
 0x22d   : > { %v1369_v46 = vpack.c.bf16 %v1345_v41, %v1343_v40  ;;  %v1291_v48 = vpop.f32.mrb[16].mxu1 }
 0x22e   : > { %v1292_v49 = vadd.f32 %v1291_v48, %v1132_v45  ;;  %v1293_v50 = vpop.f32.mrb[17].mxu1 }
 0x22f   : > { %v1294_v53 = vadd.f32 %v1293_v50, %v1132_v45  ;;  %v1295_v54 = vpop.f32.mrb[18].mxu1  ;;  %1513 = vmatprep.subr.bf16.mxu1 %v1369_v46  ;;  %v1162_v46 = vpop.permute.xlu0 %1161 }
 0x230   : > { %v1296_v55 = vadd.f32 %v1295_v54, %v1137_v52  ;;  %v1297_v58 = vpop.f32.mrb[19].mxu1  ;;  %1514 = vmatpush1.bf16.msra.mxu1 %v1368_v44  ;;  %v1346_v60 = vmax.f32 %v1292_v49, 0.0 }
 0x231   : > { %v1298_v59 = vadd.f32 %v1297_v58, %v1137_v52  ;;  %v1347_v63 = vmax.f32 %v1294_v53, 0.0  ;;  %v1167_v53 = vpop.permute.xlu1 %1166 }
 0x232   : > { %v1348_v62 = vmax.f32 %v1296_v55, 0.0 }
 0x233   : > { %v1349_v1 = vmax.f32 %v1298_v59, 0.0 }
 0x234   : > { %v1370_v3 = vpack.c.bf16 %v1348_v62, %v1346_v60 }
 0x235   : > { %v1371_v5 = vpack.c.bf16 %v1349_v1, %v1347_v63  ;;  %v1301_v6 = vpop.f32.mrb[20].mxu1 }
 0x236   : > { %v1302_v9 = vadd.f32 %v1301_v6, %v1142_v4  ;;  %v1303_v10 = vpop.f32.mrb[21].mxu1  ;;  %v4572_v6 = vld [vmem:[%s5897_s2 + $0x40] sm:$0xff]  }
 0x237   : > { %v1304_v12 = vadd.f32 %v1303_v10, %v1142_v4  ;;  %v1305_v13 = vpop.f32.mrb[22].mxu1  ;;  %1515 = vmatprep.subr.bf16.mxu1 %v1371_v5  ;;  %v4574_v10 = vld [vmem:[%s5897_s2 + $0x50] sm:$0xff]  }
 0x238   : > { %v1306_v14 = vadd.f32 %v1305_v13, %v1147_v11  ;;  %v1307_v15 = vpop.f32.mrb[23].mxu1  ;;  %1516 = vmatpush1.bf16.msra.mxu1 %v1370_v3  ;;  %v1350_v17 = vmax.f32 %v1302_v9, 0.0  ;;  %v4573_v9 = vld [vmem:[%s5897_s2 + $0x48] sm:$0xff]  }
 0x239   : > { %v1308_v16 = vadd.f32 %v1307_v15, %v1147_v11  ;;  %v1351_v19 = vmax.f32 %v1304_v12, 0.0  ;;  %v4575_v11 = vld [vmem:[%s5897_s2 + $0x58] sm:$0xff]   ;;  %v4576_v12 = vld [vmem:[%s5897_s2 + $0x60] sm:$0xff]   ;;  %v4577_v13 = vld [vmem:[%s5897_s2 + $0x68] sm:$0xff]  }
 0x23a   : > { %v1352_v18 = vmax.f32 %v1306_v14, 0.0  ;;  %v4578_v14 = vld [vmem:[%s5897_s2 + $0x70] sm:$0xff]   ;;  %v4579_v15 = vld [vmem:[%s5897_s2 + $0x78] sm:$0xff]  }
 0x23b   : > { %v1353_v20 = vmax.f32 %v1308_v16, 0.0  ;;  %v4712_v16 = vmov 2  }
 0x23c   : > { %v1372_v21 = vpack.c.bf16 %v1352_v18, %v1350_v17  ;;  %4527 = vset.pattern.permute.xlu1 %v4712_v16  ;;  %4528 = vset.pattern.permute.xlu0 %v4712_v16  ;;  %v1397_v17 = vpop.permute.xlu0 %1396  ;;  %v4588_v18 = vld [vmem:[%s4782_s29 + $0x40] sm:$0xff]  }
 0x23d   : > { %v1373_v23 = vpack.c.bf16 %v1353_v20, %v1351_v19  ;;  %v1311_v24 = vpop.f32.mrb[24].mxu1  ;;  %1686 = vperm.xlu1 %4527, %v4826_v26   ;;  %1690 = vperm.xlu0 %4528, %v4838_v28   ;;  %v1401_v20 = vpop.permute.xlu1 %1400 }
 0x23e   : > { %v1312_v25 = vadd.f32 %v1311_v24, %v1152_v22  ;;  %v1313_v30 = vpop.f32.mrb[25].mxu1  ;;  %4172 = vmatmul.mubr.msk.bf16.gmra.mrb[32].mxu0 %vm552_vm1, %v4588_v18 }
 0x23f   : > { %v1314_v32 = vadd.f32 %v1313_v30, %v1152_v22  ;;  %v1315_v35 = vpop.f32.mrb[26].mxu1  ;;  %1517 = vmatprep.subr.bf16.mxu1 %v1373_v23  ;;  %778 = vmatprep.mubr.bf16.mxu0 %v5902_v0 }
 0x240   : > { %v1316_v36 = vadd.f32 %v1315_v35, %v1157_v31  ;;  %v1317_v37 = vpop.f32.mrb[27].mxu1  ;;  %1518 = vmatpush1.bf16.msra.mxu1 %v1372_v21  ;;  %v1354_v39 = vmax.f32 %v1312_v25, 0.0 }
 0x241   : > { %v1318_v38 = vadd.f32 %v1317_v37, %v1157_v31  ;;  %v1355_v41 = vmax.f32 %v1314_v32, 0.0  ;;  %1694 = vperm.xlu1 %4527, %v4831_v27   ;;  %1702 = vperm.xlu0 %4528, %v4850_v33   ;;  %v1405_v31 = vpop.permute.xlu1 %1404 }
 0x242   : > { %v1356_v40 = vmax.f32 %v1316_v36, 0.0 }
 0x243   : > { %v1357_v44 = vmax.f32 %v1318_v38, 0.0 }
 0x244   : > { %v1374_v45 = vpack.c.bf16 %v1356_v40, %v1354_v39 }
 0x245   : > { %v1375_v48 = vpack.c.bf16 %v1357_v44, %v1355_v41  ;;  %v1321_v49 = vpop.f32.mrb[28].mxu1  ;;  %1698 = vperm.xlu1 %4527, %v4843_v29   ;;  %1710 = vperm.xlu0 %4528, %v4862_v42   ;;  %v4589_v29 = vld [vmem:[%s4782_s29 + $0x48] sm:$0xff]  }
 0x246   : > { %v1322_v50 = vadd.f32 %v1321_v49, %v1162_v46  ;;  %v1323_v52 = vpop.f32.mrb[29].mxu1  ;;  %4173 = vmatmul.mubr.msk.bf16.gmra.mrb[36].mxu0 %vm552_vm1, %v4589_v29 }
 0x247   : > { %v1324_v54 = vadd.f32 %v1323_v52, %v1162_v46  ;;  %v1325_v55 = vpop.f32.mrb[30].mxu1  ;;  %1519 = vmatprep.subr.bf16.mxu1 %v1375_v48  ;;  %788 = vmatprep.mubr.bf16.mxu0 %v5902_v0 }
 0x248   : > { %v1326_v58 = vadd.f32 %v1325_v55, %v1167_v53  ;;  %v1327_v59 = vpop.f32.mrb[31].mxu1  ;;  %1520 = vmatpush1.bf16.msra.mxu1 %v1374_v45  ;;  %v1358_v62 = vmax.f32 %v1322_v50, 0.0  ;;  %v4590_v45 = vld [vmem:[%s4782_s29 + $0x50] sm:$0xff]   ;;  %v1413_v50 = vpop.permute.xlu1 %1412 }
 0x249   : > { %v1328_v60 = vadd.f32 %v1327_v59, %v1167_v53  ;;  %v1359_v1 = vmax.f32 %v1324_v54, 0.0  ;;  %1706 = vperm.xlu1 %4527, %v4855_v34   ;;  %1718 = vperm.xlu0 %4528, %v4874_v47   ;;  %v1409_v34 = vpop.permute.xlu0 %1408 }
 0x24a   : > { %v1360_v63 = vmax.f32 %v1326_v58, 0.0 }
 0x24b   : > { %v1361_v3 = vmax.f32 %v1328_v60, 0.0 }
 0x24c   : > { %v1376_v4 = vpack.c.bf16 %v1360_v63, %v1358_v62 }
 0x24d   : > { %v1377_v5 = vpack.c.bf16 %v1361_v3, %v1359_v1  ;;  %1714 = vperm.xlu1 %4527, %v4867_v43   ;;  %1726 = vperm.xlu0 %4528, %v4886_v56  }
 0x24e   : > { %4174 = vmatmul.mubr.msk.bf16.gmra.mrb[40].mxu0 %vm552_vm1, %v4590_v45 }
 0x24f   : > { %1521 = vmatprep.subr.bf16.mxu1 %v1377_v5  ;;  %798 = vmatprep.mubr.bf16.mxu0 %v5902_v0  ;;  %v1421_v5 = vpop.permute.xlu1 %1420 }
 0x250   : > { %1522 = vmatpush1.bf16.msra.mxu1 %v1376_v4 }
 0x251   : > { %1722 = vperm.xlu1 %4527, %v4879_v51   ;;  %1734 = vperm.xlu0 %4528, %v4898_v61   ;;  %v1417_v51 = vpop.permute.xlu0 %1416 }
 0x253   : > { %1540 = vmatmul.mubr.bf16.vlgmr.msra.gmra.mrb[32].mxu1 %v4572_v6 }
 0x254   : > { %1549 = vmatprep.mubr.bf16.mxu1 %v5902_v0 }
 0x255   : > { %1730 = vperm.xlu1 %4527, %v4891_v57   ;;  %1742 = vperm.xlu0 %4528, %v4910_v7   ;;  %v4591_v7 = vld [vmem:[%s4782_s29 + $0x58] sm:$0xff]  }
 0x256   : > { %4175 = vmatmul.mubr.msk.bf16.gmra.mrb[44].mxu0 %vm552_vm1, %v4591_v7 }
 0x257   : > { %808 = vmatprep.mubr.bf16.mxu0 %v5902_v0 }
 0x259   : > { %1738 = vperm.xlu1 %4527, %v4903_v2  }
 0x25b   : > { %1550 = vmatmul.mubr.bf16.gmra.mrb[36].mxu1 %v4573_v9 }
 0x25c   : > { %1559 = vmatprep.mubr.bf16.mxu1 %v5902_v0 }
 0x25d   : > { %1746 = vperm.xlu1 %4527, %v4915_v8  }
 0x263   : > { %1560 = vmatmul.mubr.bf16.gmra.mrb[40].mxu1 %v4574_v10 }
 0x264   : > { %1569 = vmatprep.mubr.bf16.mxu1 %v5902_v0 }
 0x26b   : > { %1570 = vmatmul.mubr.bf16.gmra.mrb[44].mxu1 %v4575_v11 }
 0x26c   : > { %1579 = vmatprep.mubr.bf16.mxu1 %v5902_v0 }
 0x273   : > { %1580 = vmatmul.mubr.bf16.gmra.mrb[48].mxu1 %v4576_v12  ;;  %v1425_v12 = vpop.permute.xlu0 %1424 }
 0x274   : > { %1589 = vmatprep.mubr.bf16.mxu1 %v5902_v0 }
 0x27b   : > { %1590 = vmatmul.mubr.bf16.gmra.mrb[52].mxu1 %v4577_v13 }
 0x27c   : > { %1599 = vmatprep.mubr.bf16.mxu1 %v5902_v0 }
 0x283   : > { %1600 = vmatmul.mubr.bf16.gmra.mrb[56].mxu1 %v4578_v14 }
 0x284   : > { %1609 = vmatprep.mubr.bf16.mxu1 %v5902_v0 }
 0x28b   : > { %1610 = vmatmul.mubr.bf16.gmra.mrb[60].mxu1 %v4579_v15 }
 0x28c   : > { %1829 = vmatprep.mubr.bf16.mxu1 %v5902_v0 }
 0x326   : > { %v1541_v19 = vpop.f32.mrb[32].mxu1 }
 0x327   : > { %v1542_v21 = vadd.f32 %v1541_v19, %v1397_v17  ;;  %v1543_v22 = vpop.f32.mrb[33].mxu1  ;;  %v4592_v19 = vld [vmem:[%s4782_s29 + $0x60] sm:$0xff]  }
 0x328   : > { %v1544_v26 = vadd.f32 %v1543_v22, %v1397_v17  ;;  %v1545_v23 = vpop.f32.mrb[34].mxu1  ;;  %v1429_v22 = vpop.permute.xlu1 %1428  ;;  %4176 = vmatmul.mubr.msk.bf16.gmra.mrb[48].mxu0 %vm552_vm1, %v4592_v19 }
 0x329   : > { %v1546_v27 = vadd.f32 %v1545_v23, %v1401_v20  ;;  %v1547_v28 = vpop.f32.mrb[35].mxu1  ;;  %v1620_v24 = vmax.f32 %v1542_v21, 0.0  ;;  %818 = vmatprep.mubr.bf16.mxu0 %v5902_v0 }
 0x32a   : > { %v1548_v33 = vadd.f32 %v1547_v28, %v1401_v20  ;;  %v1621_v30 = vmax.f32 %v1544_v26, 0.0 }
 0x32b   : > { %v1622_v25 = vmax.f32 %v1546_v27, 0.0 }
 0x32c   : > { %v1623_v42 = vmax.f32 %v1548_v33, 0.0  ;;  %v1433_v33 = vpop.permute.xlu0 %1432 }
 0x32d   : > { %v1652_v32 = vpack.c.bf16 %v1622_v25, %v1620_v24 }
 0x32e   : > { %v1653_v35 = vpack.c.bf16 %v1623_v42, %v1621_v30  ;;  %v1551_v36 = vpop.f32.mrb[36].mxu1 }
 0x32f   : > { %v1552_v37 = vadd.f32 %v1551_v36, %v1405_v31  ;;  %v1553_v38 = vpop.f32.mrb[37].mxu1 }
 0x330   : > { %v1554_v47 = vadd.f32 %v1553_v38, %v1405_v31  ;;  %v1555_v39 = vpop.f32.mrb[38].mxu1  ;;  %1797 = vmatprep.subr.bf16.mxu1 %v1653_v35  ;;  %v4593_v35 = vld [vmem:[%s4782_s29 + $0x68] sm:$0xff]  }
 0x331   : > { %v1556_v40 = vadd.f32 %v1555_v39, %v1409_v34  ;;  %v1557_v41 = vpop.f32.mrb[39].mxu1  ;;  %1798 = vmatpush1.bf16.msra.mxu1 %v1652_v32  ;;  %v1624_v43 = vmax.f32 %v1552_v37, 0.0  ;;  %4177 = vmatmul.mubr.msk.bf16.gmra.mrb[52].mxu0 %vm552_vm1, %v4593_v35  ;;  %v4600_v35 = vld [vmem:[%s4782_s29 + $0xa0] sm:$0xff]  }
 0x332   : > { %v1558_v44 = vadd.f32 %v1557_v41, %v1409_v34  ;;  %v1625_v46 = vmax.f32 %v1554_v47, 0.0  ;;  %v1437_v34 = vpop.permute.xlu1 %1436  ;;  %828 = vmatprep.mubr.bf16.mxu0 %v5902_v0 }
 0x333   : > { %v1626_v56 = vmax.f32 %v1556_v40, 0.0 }
 0x334   : > { %v1627_v48 = vmax.f32 %v1558_v44, 0.0  ;;  %v1441_v44 = vpop.permute.xlu0 %1440 }
 0x335   : > { %v1654_v49 = vpack.c.bf16 %v1626_v56, %v1624_v43 }
 0x336   : > { %v1655_v52 = vpack.c.bf16 %v1627_v48, %v1625_v46  ;;  %v1561_v53 = vpop.f32.mrb[40].mxu1 }
 0x337   : > { %v1562_v54 = vadd.f32 %v1561_v53, %v1413_v50  ;;  %v1563_v55 = vpop.f32.mrb[41].mxu1 }
 0x338   : > { %v1564_v61 = vadd.f32 %v1563_v55, %v1413_v50  ;;  %v1565_v58 = vpop.f32.mrb[42].mxu1  ;;  %1799 = vmatprep.subr.bf16.mxu1 %v1655_v52  ;;  %v4594_v52 = vld [vmem:[%s4782_s29 + $0x70] sm:$0xff]  }
 0x339   : > { %v1566_v59 = vadd.f32 %v1565_v58, %v1417_v51  ;;  %v1567_v60 = vpop.f32.mrb[43].mxu1  ;;  %1800 = vmatpush1.bf16.msra.mxu1 %v1654_v49  ;;  %v1628_v57 = vmax.f32 %v1562_v54, 0.0  ;;  %4178 = vmatmul.mubr.msk.bf16.gmra.mrb[56].mxu0 %vm552_vm1, %v4594_v52 }
 0x33a   : > { %v1568_v62 = vadd.f32 %v1567_v60, %v1417_v51  ;;  %v1629_v1 = vmax.f32 %v1564_v61, 0.0  ;;  %v1445_v51 = vpop.permute.xlu1 %1444  ;;  %838 = vmatprep.mubr.bf16.mxu0 %v5902_v0 }
 0x33b   : > { %v1630_v63 = vmax.f32 %v1566_v59, 0.0 }
 0x33c   : > { %v1631_v3 = vmax.f32 %v1568_v62, 0.0  ;;  %v1449_v62 = vpop.permute.xlu0 %1448 }
 0x33d   : > { %v1656_v4 = vpack.c.bf16 %v1630_v63, %v1628_v57 }
 0x33e   : > { %v1657_v6 = vpack.c.bf16 %v1631_v3, %v1629_v1  ;;  %v1571_v9 = vpop.f32.mrb[44].mxu1 }
 0x33f   : > { %v1572_v10 = vadd.f32 %v1571_v9, %v1421_v5  ;;  %v1573_v11 = vpop.f32.mrb[45].mxu1 }
 0x340   : > { %v1574_v13 = vadd.f32 %v1573_v11, %v1421_v5  ;;  %v1575_v14 = vpop.f32.mrb[46].mxu1  ;;  %1801 = vmatprep.subr.bf16.mxu1 %v1657_v6  ;;  %v4595_v6 = vld [vmem:[%s4782_s29 + $0x78] sm:$0xff]  }
 0x341   : > { %v1576_v2 = vadd.f32 %v1575_v14, %v1425_v12  ;;  %v1577_v15 = vpop.f32.mrb[47].mxu1  ;;  %1802 = vmatpush1.bf16.msra.mxu1 %v1656_v4  ;;  %v1632_v17 = vmax.f32 %v1572_v10, 0.0  ;;  %4179 = vmatmul.mubr.msk.bf16.gmra.mrb[60].mxu0 %vm552_vm1, %v4595_v6 }
 0x342   : > { %v1578_v16 = vadd.f32 %v1577_v15, %v1425_v12  ;;  %v1633_v20 = vmax.f32 %v1574_v13, 0.0  ;;  %v1453_v12 = vpop.permute.xlu1 %1452  ;;  %848 = vmatprep.mubr.bf16.mxu0 %v5902_v0 }
 0x343   : > { %v1634_v18 = vmax.f32 %v1576_v2, 0.0 }
 0x344   : > { %v1635_v21 = vmax.f32 %v1578_v16, 0.0  ;;  %v1457_v16 = vpop.permute.xlu0 %1456 }
 0x345   : > { %v1658_v8 = vpack.c.bf16 %v1634_v18, %v1632_v17 }
 0x346   : > { %v1659_v26 = vpack.c.bf16 %v1635_v21, %v1633_v20  ;;  %v1581_v23 = vpop.f32.mrb[48].mxu1 }
 0x347   : > { %v1582_v27 = vadd.f32 %v1581_v23, %v1429_v22  ;;  %v1583_v28 = vpop.f32.mrb[49].mxu1 }
 0x348   : > { %v1584_v24 = vadd.f32 %v1583_v28, %v1429_v22  ;;  %v1585_v25 = vpop.f32.mrb[50].mxu1  ;;  %1803 = vmatprep.subr.bf16.mxu1 %v1659_v26  ;;  %v4596_v26 = vld [vmem:[%s4782_s29 + $0x80] sm:$0xff]  }
 0x349   : > { %v1586_v29 = vadd.f32 %v1585_v25, %v1433_v33  ;;  %v1587_v30 = vpop.f32.mrb[51].mxu1  ;;  %1804 = vmatpush1.bf16.msra.mxu1 %v1658_v8  ;;  %v1636_v31 = vmax.f32 %v1582_v27, 0.0  ;;  %4180 = vmatmul.mubr.msk.bf16.gmra.mrb[64].mxu0 %vm552_vm1, %v4596_v26  ;;  %v4597_v25 = vld [vmem:[%s4782_s29 + $0x88] sm:$0xff]  }
 0x34a   : > { %v1588_v42 = vadd.f32 %v1587_v30, %v1433_v33  ;;  %v1637_v36 = vmax.f32 %v1584_v24, 0.0  ;;  %v4580_v24 = vld [vmem:[%s5897_s2 + $0x80] sm:$0xff]   ;;  %858 = vmatprep.mubr.bf16.mxu0 %v5902_v0  ;;  %v4598_v30 = vld [vmem:[%s4782_s29 + $0x90] sm:$0xff]  }
 0x34b   : > { %v1638_v32 = vmax.f32 %v1586_v29, 0.0  ;;  %v4581_v29 = vld [vmem:[%s5897_s2 + $0x88] sm:$0xff]  }
 0x34c   : > { %v1639_v37 = vmax.f32 %v1588_v42, 0.0  ;;  %v4582_v42 = vld [vmem:[%s5897_s2 + $0x90] sm:$0xff]  }
 0x34d   : > { %v1660_v38 = vpack.c.bf16 %v1638_v32, %v1636_v31  ;;  %v4599_v31 = vld [vmem:[%s4782_s29 + $0x98] sm:$0xff]  }
 0x34e   : > { %v1661_v47 = vpack.c.bf16 %v1639_v37, %v1637_v36  ;;  %v1591_v39 = vpop.f32.mrb[52].mxu1  ;;  %v4583_v32 = vld [vmem:[%s5897_s2 + $0x98] sm:$0xff]   ;;  %v4584_v36 = vld [vmem:[%s5897_s2 + $0xa0] sm:$0xff]   ;;  %v4601_v37 = vld [vmem:[%s4782_s29 + $0xa8] sm:$0xff]  }
 0x34f   : > { %v1592_v40 = vadd.f32 %v1591_v39, %v1437_v34  ;;  %v1593_v41 = vpop.f32.mrb[53].mxu1  ;;  %v4603_v39 = vld [vmem:[%s4782_s29 + $0xb8] sm:$0xff]  }
 0x350   : > { %v1594_v43 = vadd.f32 %v1593_v41, %v1437_v34  ;;  %v1595_v56 = vpop.f32.mrb[54].mxu1  ;;  %1805 = vmatprep.subr.bf16.mxu1 %v1661_v47  ;;  %v4602_v34 = vld [vmem:[%s4782_s29 + $0xb0] sm:$0xff]   ;;  %v4604_v41 = vld [vmem:[%s4782_s29 + $0xc0] sm:$0xff]  }
 0x351   : > { %v1596_v45 = vadd.f32 %v1595_v56, %v1441_v44  ;;  %v1597_v46 = vpop.f32.mrb[55].mxu1  ;;  %1806 = vmatpush1.bf16.msra.mxu1 %v1660_v38  ;;  %v1640_v49 = vmax.f32 %v1592_v40, 0.0  ;;  %4181 = vmatmul.mubr.msk.bf16.gmra.mrb[68].mxu0 %vm552_vm1, %v4597_v25  ;;  %v4585_v38 = vld [vmem:[%s5897_s2 + $0xa8] sm:$0xff]   ;;  %v4586_v47 = vld [vmem:[%s5897_s2 + $0xb0] sm:$0xff]   ;;  %v4587_v40 = vld [vmem:[%s5897_s2 + $0xb8] sm:$0xff]  }
 0x352   : > { %v1598_v48 = vadd.f32 %v1597_v46, %v1441_v44  ;;  %v1641_v53 = vmax.f32 %v1594_v43, 0.0  ;;  %868 = vmatprep.mubr.bf16.mxu0 %v5902_v0  ;;  %v4605_v44 = vld [vmem:[%s4782_s29 + $0xc8] sm:$0xff]   ;;  %v4606_v43 = vld [vmem:[%s4782_s29 + $0xd0] sm:$0xff]   ;;  %v4607_v56 = vld [vmem:[%s4782_s29 + $0xd8] sm:$0xff]  }
 0x353   : > { %v1642_v50 = vmax.f32 %v1596_v45, 0.0  ;;  %v4608_v45 = vld [vmem:[%s4782_s29 + $0xe0] sm:$0xff]   ;;  %v4609_v46 = vld [vmem:[%s4782_s29 + $0xe8] sm:$0xff]  }
 0x354   : > { %v1643_v54 = vmax.f32 %v1598_v48, 0.0  ;;  %v4610_v48 = vld [vmem:[%s4782_s29 + $0xf0] sm:$0xff]  }
 0x355   : > { %v1662_v55 = vpack.c.bf16 %v1642_v50, %v1640_v49  ;;  %v4611_v49 = vld [vmem:[%s4782_s29 + $0xf8] sm:$0xff]   ;;  %v770_v50 = vpop.f32.mrb[32].mxu0  ;;  %s4425_s29 = sshll.u32 %s6000_s21, 4 }
 0x356   : > { %v1663_v61 = vpack.c.bf16 %v1643_v54, %v1641_v53  ;;  %v1601_v58 = vpop.f32.mrb[56].mxu1  ;;  %v772_v52 = vpop.f32.mrb[33].mxu0  ;;  %s309_s19 = scalar_lea.vmem %s5901_s6, %s4425_s29 }
 0x357   : > { %v1602_v59 = vadd.f32 %v1601_v58, %v1445_v51  ;;  %v1603_v60 = vpop.f32.mrb[57].mxu1  ;;  %v774_v53 = vpop.f32.mrb[34].mxu0 }
 0x358   : > { %v1604_v57 = vadd.f32 %v1603_v60, %v1445_v51  ;;  %v1605_v63 = vpop.f32.mrb[58].mxu1  ;;  %1807 = vmatprep.subr.bf16.mxu1 %v1663_v61  ;;  %v776_v54 = vpop.f32.mrb[35].mxu0  ;;  %v2475_v51 = vmax.f32 %v772_v52, 0.0  ;;  %v2476_v61 = vmax.f32 %v774_v53, 0.0 }
 0x359   : > { %v1606_v7 = vadd.f32 %v1605_v63, %v1449_v62  ;;  %v1607_v1 = vpop.f32.mrb[59].mxu1  ;;  %1808 = vmatpush1.bf16.msra.mxu1 %v1662_v55  ;;  %v1644_v4 = vmax.f32 %v1602_v59, 0.0  ;;  %4182 = vmatmul.mubr.msk.bf16.gmra.mrb[72].mxu0 %vm552_vm1, %v4598_v30  ;;  %v2474_v55 = vmax.f32 %v770_v50, 0.0  ;;  %v2477_v58 = vmax.f32 %v776_v54, 0.0 }
 0x35a   : > { %v1608_v3 = vadd.f32 %v1607_v1, %v1449_v62  ;;  %v1645_v9 = vmax.f32 %v1604_v57, 0.0  ;;  %878 = vmatprep.mubr.bf16.mxu0 %v5902_v0  ;;  %v780_v62 = vpop.f32.mrb[36].mxu0 }
 0x35b   : > { %v1646_v5 = vmax.f32 %v1606_v7, 0.0  ;;  %v5119_v59 = vpack.c.bf16 %v2476_v61, %v2474_v55  ;;  %v5121_v60 = vpack.c.bf16 %v2477_v58, %v2475_v51  ;;  %v782_v57 = vpop.f32.mrb[37].mxu0  ;;  %v2478_v1 = vmax.f32 %v780_v62, 0.0 }
 0x35c   : > { %v1647_v10 = vmax.f32 %v1608_v3, 0.0  ;;  %v784_v63 = vpop.f32.mrb[38].mxu0  ;;  %v2479_v3 = vmax.f32 %v782_v57, 0.0 }
 0x35d   : > { %v1664_v11 = vpack.c.bf16 %v1646_v5, %v1644_v4  ;;  %v786_v7 = vpop.f32.mrb[39].mxu0  ;;  %v2480_v4 = vmax.f32 %v784_v63, 0.0 }
 0x35e   : > { %v1665_v13 = vpack.c.bf16 %v1647_v10, %v1645_v9  ;;  %v1611_v14 = vpop.f32.mrb[60].mxu1  ;;  %v2481_v5 = vmax.f32 %v786_v7, 0.0  ;;  %v790_v10 = vpop.f32.mrb[40].mxu0 }
 0x35f   : > { %v1612_v2 = vadd.f32 %v1611_v14, %v1453_v12  ;;  %v1613_v15 = vpop.f32.mrb[61].mxu1  ;;  %v5123_v6 = vpack.c.bf16 %v2480_v4, %v2478_v1  ;;  %v2482_v14 = vmax.f32 %v790_v10, 0.0 }
 0x360   : > { %v1614_v17 = vadd.f32 %v1613_v15, %v1453_v12  ;;  %v1615_v18 = vpop.f32.mrb[62].mxu1  ;;  %1809 = vmatprep.subr.bf16.mxu1 %v1665_v13  ;;  %v5125_v9 = vpack.c.bf16 %v2481_v5, %v2479_v3 }
 0x361   : > { %v1616_v19 = vadd.f32 %v1615_v18, %v1457_v16  ;;  %v1617_v20 = vpop.f32.mrb[63].mxu1  ;;  %1810 = vmatpush1.bf16.msra.mxu1 %v1664_v11  ;;  %v1648_v8 = vmax.f32 %v1612_v2, 0.0  ;;  %4183 = vmatmul.mubr.msk.bf16.gmra.mrb[76].mxu0 %vm552_vm1, %v4599_v31  ;;  %v792_v11 = vpop.f32.mrb[41].mxu0 }
 0x362   : > { %v1618_v21 = vadd.f32 %v1617_v20, %v1457_v16  ;;  %v1649_v23 = vmax.f32 %v1614_v17, 0.0  ;;  %888 = vmatprep.mubr.bf16.mxu0 %v5902_v0  ;;  %v794_v12 = vpop.f32.mrb[42].mxu0  ;;  %v2483_v2 = vmax.f32 %v792_v11, 0.0 }
 0x363   : > { %v1650_v22 = vmax.f32 %v1616_v19, 0.0  ;;  %v796_v13 = vpop.f32.mrb[43].mxu0  ;;  %v2484_v15 = vmax.f32 %v794_v12, 0.0 }
 0x364   : > { %v1651_v27 = vmax.f32 %v1618_v21, 0.0  ;;  %v2485_v16 = vmax.f32 %v796_v13, 0.0  ;;  %v800_v19 = vpop.f32.mrb[44].mxu0 }
 0x365   : > { %v1666_v28 = vpack.c.bf16 %v1650_v22, %v1648_v8  ;;  %v5127_v17 = vpack.c.bf16 %v2484_v15, %v2482_v14  ;;  %v802_v20 = vpop.f32.mrb[45].mxu0  ;;  %v2486_v22 = vmax.f32 %v800_v19, 0.0 }
 0x366   : > { %v1667_v33 = vpack.c.bf16 %v1651_v27, %v1649_v23  ;;  %v5129_v18 = vpack.c.bf16 %v2485_v16, %v2483_v2  ;;  %v804_v21 = vpop.f32.mrb[46].mxu0  ;;  %v2487_v26 = vmax.f32 %v802_v20, 0.0 }
 0x367   : > { %v806_v8 = vpop.f32.mrb[47].mxu0  ;;  %v2488_v23 = vmax.f32 %v804_v21, 0.0 }
 0x368   : > { %1811 = vmatprep.subr.bf16.mxu1 %v1667_v33  ;;  %v2489_v27 = vmax.f32 %v806_v8, 0.0 }
 0x369   : > { %1812 = vmatpush1.bf16.msra.mxu1 %v1666_v28  ;;  %4184 = vmatmul.mubr.msk.bf16.gmra.mrb[80].mxu0 %vm552_vm1, %v4600_v35  ;;  %v5131_v28 = vpack.c.bf16 %v2488_v23, %v2486_v22 }
 0x36a   : > { %898 = vmatprep.mubr.bf16.mxu0 %v5902_v0  ;;  %v5133_v33 = vpack.c.bf16 %v2489_v27, %v2487_v26 }
 0x36c   : > { %1830 = vmatmul.mubr.bf16.vlgmr.msra.gmra.mrb[64].mxu1 %v4580_v24 }
 0x36d   : > { %1839 = vmatprep.mubr.bf16.mxu1 %v5902_v0 }
 0x371   : > { %4185 = vmatmul.mubr.msk.bf16.gmra.mrb[84].mxu0 %vm552_vm1, %v4601_v37 }
 0x372   : > { %908 = vmatprep.mubr.bf16.mxu0 %v5902_v0 }
 0x374   : > { %1840 = vmatmul.mubr.bf16.gmra.mrb[68].mxu1 %v4581_v29 }
 0x375   : > { %1849 = vmatprep.mubr.bf16.mxu1 %v5902_v0 }
 0x379   : > { %4186 = vmatmul.mubr.msk.bf16.gmra.mrb[88].mxu0 %vm552_vm1, %v4602_v34 }
 0x37a   : > { %918 = vmatprep.mubr.bf16.mxu0 %v5902_v0 }
 0x37c   : > { %1850 = vmatmul.mubr.bf16.gmra.mrb[72].mxu1 %v4582_v42 }
 0x37d   : > { %1859 = vmatprep.mubr.bf16.mxu1 %v5902_v0 }
 0x381   : > { %4187 = vmatmul.mubr.msk.bf16.gmra.mrb[92].mxu0 %vm552_vm1, %v4603_v39 }
 0x382   : > { %928 = vmatprep.mubr.bf16.mxu0 %v5902_v0 }
 0x384   : > { %1860 = vmatmul.mubr.bf16.gmra.mrb[76].mxu1 %v4583_v32 }
 0x385   : > { %1869 = vmatprep.mubr.bf16.mxu1 %v5902_v0 }
 0x389   : > { %4188 = vmatmul.mubr.msk.bf16.gmra.mrb[96].mxu0 %vm552_vm1, %v4604_v41 }
 0x38a   : > { %938 = vmatprep.mubr.bf16.mxu0 %v5902_v0 }
 0x38c   : > { %1870 = vmatmul.mubr.bf16.gmra.mrb[80].mxu1 %v4584_v36 }
 0x38d   : > { %1879 = vmatprep.mubr.bf16.mxu1 %v5902_v0 }
 0x391   : > { %4189 = vmatmul.mubr.msk.bf16.gmra.mrb[100].mxu0 %vm552_vm1, %v4605_v44 }
 0x392   : > { %948 = vmatprep.mubr.bf16.mxu0 %v5902_v0 }
 0x394   : > { %1880 = vmatmul.mubr.bf16.gmra.mrb[84].mxu1 %v4585_v38  ;;  %v1687_v38 = vpop.permute.xlu1 %1686 }
 0x395   : > { %1889 = vmatprep.mubr.bf16.mxu1 %v5902_v0 }
 0x398   : > { %v1695_v62 = vpop.permute.xlu1 %1694 }
 0x399   : > { %4190 = vmatmul.mubr.msk.bf16.gmra.mrb[104].mxu0 %vm552_vm1, %v4606_v43 }
 0x39a   : > { %958 = vmatprep.mubr.bf16.mxu0 %v5902_v0 }
 0x39c   : > { %1890 = vmatmul.mubr.bf16.gmra.mrb[88].mxu1 %v4586_v47  ;;  %v1691_v47 = vpop.permute.xlu0 %1690 }
 0x39d   : > { %1899 = vmatprep.mubr.bf16.mxu1 %v5902_v0 }
 0x3a1   : > { %4191 = vmatmul.mubr.msk.bf16.gmra.mrb[108].mxu0 %vm552_vm1, %v4607_v56 }
 0x3a2   : > { %968 = vmatprep.mubr.bf16.mxu0 %v5902_v0 }
 0x3a4   : > { %1900 = vmatmul.mubr.bf16.gmra.mrb[92].mxu1 %v4587_v40 }
 0x3a5   : > { %2345 = vmatprep.mubr.bf16.mxu1 %v5902_v0 }
 0x3a9   : > { %4192 = vmatmul.mubr.msk.bf16.gmra.mrb[112].mxu0 %vm552_vm1, %v4608_v45 }
 0x3aa   : > { %978 = vmatprep.mubr.bf16.mxu0 %v5902_v0 }
 0x3b1   : > { %4193 = vmatmul.mubr.msk.bf16.gmra.mrb[116].mxu0 %vm552_vm1, %v4609_v46 }
 0x3b2   : > { %988 = vmatprep.mubr.bf16.mxu0 %v5902_v0 }
 0x3b9   : > { %4194 = vmatmul.mubr.msk.bf16.gmra.mrb[120].mxu0 %vm552_vm1, %v4610_v48 }
 0x3ba   : > { %998 = vmatprep.mubr.bf16.mxu0 %v5902_v0 }
 0x3c1   : > { %4195 = vmatmul.mubr.msk.bf16.gmra.mrb[124].mxu0 %vm552_vm1, %v4611_v49 }
 0x3c2   : > { %2055 = vmatprep.mubr.bf16.mxu0 %v5902_v0 }
 0x3fb   : > { %v810_v24 = vpop.f32.mrb[48].mxu0 }
 0x3fc   : > { %v812_v25 = vpop.f32.mrb[49].mxu0  ;;  %v2490_v42 = vmax.f32 %v810_v24, 0.0 }
 0x3fd   : > { %v814_v29 = vpop.f32.mrb[50].mxu0  ;;  %v2491_v31 = vmax.f32 %v812_v25, 0.0 }
 0x3fe   : > { %v816_v30 = vpop.f32.mrb[51].mxu0  ;;  %v2492_v32 = vmax.f32 %v814_v29, 0.0  ;;  %v1699_v29 = vpop.permute.xlu1 %1698 }
 0x3ff   : > { %v2493_v35 = vmax.f32 %v816_v30, 0.0 }
 0x400   : > { %v5135_v36 = vpack.c.bf16 %v2492_v32, %v2490_v42 }
 0x401   : > { %v5137_v37 = vpack.c.bf16 %v2493_v35, %v2491_v31 }
 0x404   : > { %v820_v34 = vpop.f32.mrb[52].mxu0 }
 0x405   : > { %v2494_v39 = vmax.f32 %v820_v34, 0.0  ;;  %v822_v40 = vpop.f32.mrb[53].mxu0 }
 0x406   : > { %v2495_v44 = vmax.f32 %v822_v40, 0.0  ;;  %v824_v43 = vpop.f32.mrb[54].mxu0 }
 0x407   : > { %v2496_v46 = vmax.f32 %v824_v43, 0.0  ;;  %v826_v48 = vpop.f32.mrb[55].mxu0 }
 0x408   : > { %v2497_v52 = vmax.f32 %v826_v48, 0.0 }
 0x409   : > { %v5139_v51 = vpack.c.bf16 %v2496_v46, %v2494_v39 }
 0x40a   : > { %v5141_v63 = vpack.c.bf16 %v2497_v52, %v2495_v44 }
 0x40c   : > { %v830_v53 = vpop.f32.mrb[56].mxu0 }
 0x40d   : > { %v2498_v61 = vmax.f32 %v830_v53, 0.0  ;;  %v832_v58 = vpop.f32.mrb[57].mxu0 }
 0x40e   : > { %v2499_v7 = vmax.f32 %v832_v58, 0.0  ;;  %v834_v1 = vpop.f32.mrb[58].mxu0 }
 0x40f   : > { %v2500_v5 = vmax.f32 %v834_v1, 0.0  ;;  %v836_v10 = vpop.f32.mrb[59].mxu0 }
 0x410   : > { %v2501_v13 = vmax.f32 %v836_v10, 0.0 }
 0x411   : > { %v5143_v15 = vpack.c.bf16 %v2500_v5, %v2498_v61 }
 0x412   : > { %v5145_v8 = vpack.c.bf16 %v2501_v13, %v2499_v7 }
 0x414   : > { %v840_v14 = vpop.f32.mrb[60].mxu0 }
 0x415   : > { %v2502_v16 = vmax.f32 %v840_v14, 0.0  ;;  %v842_v19 = vpop.f32.mrb[61].mxu0 }
 0x416   : > { %v2503_v22 = vmax.f32 %v842_v19, 0.0  ;;  %v844_v26 = vpop.f32.mrb[62].mxu0 }
 0x417   : > { %v2504_v24 = vmax.f32 %v844_v26, 0.0  ;;  %v846_v25 = vpop.f32.mrb[63].mxu0 }
 0x418   : > { %v2505_v31 = vmax.f32 %v846_v25, 0.0 }
 0x43f   : > { %v1831_v41 = vpop.f32.mrb[64].mxu1 }
 0x440   : > { %v1832_v56 = vadd.f32 %v1831_v41, %v1687_v38  ;;  %v1833_v45 = vpop.f32.mrb[65].mxu1 }
 0x441   : > { %v1834_v49 = vadd.f32 %v1833_v45, %v1687_v38  ;;  %v1835_v50 = vpop.f32.mrb[66].mxu1  ;;  %v5147_v38 = vpack.c.bf16 %v2504_v24, %v2502_v16 }
 0x442   : > { %v1836_v54 = vadd.f32 %v1835_v50, %v1691_v47  ;;  %v1837_v55 = vpop.f32.mrb[67].mxu1  ;;  %v1910_v3 = vmax.f32 %v1832_v56, 0.0  ;;  %v1703_v56 = vpop.permute.xlu0 %1702 }
 0x443   : > { %v1838_v57 = vadd.f32 %v1837_v55, %v1691_v47  ;;  %v1911_v11 = vmax.f32 %v1834_v49, 0.0  ;;  %v5149_v47 = vpack.c.bf16 %v2505_v31, %v2503_v22  ;;  %v1707_v50 = vpop.permute.xlu1 %1706 }
 0x444   : > { %v1912_v4 = vmax.f32 %v1836_v54, 0.0 }
 0x445   : > { %v1913_v12 = vmax.f32 %v1838_v57, 0.0 }
 0x446   : > { %v1942_v2 = vpack.c.bf16 %v1912_v4, %v1910_v3  ;;  %v1711_v3 = vpop.permute.xlu0 %1710 }
 0x447   : > { %v1943_v20 = vpack.c.bf16 %v1913_v12, %v1911_v11  ;;  %v1841_v21 = vpop.f32.mrb[68].mxu1  ;;  %v1715_v12 = vpop.permute.xlu1 %1714 }
 0x448   : > { %v1842_v23 = vadd.f32 %v1841_v21, %v1695_v62  ;;  %v1843_v27 = vpop.f32.mrb[69].mxu1 }
 0x449   : > { %v1844_v30 = vadd.f32 %v1843_v27, %v1695_v62  ;;  %v1845_v42 = vpop.f32.mrb[70].mxu1  ;;  %2023 = vmatprep.subr.bf16.mxu0 %v1943_v20 }
 0x44a   : > { %v1846_v32 = vadd.f32 %v1845_v42, %v1699_v29  ;;  %v1847_v35 = vpop.f32.mrb[71].mxu1  ;;  %2024 = vmatpush1.bf16.msra.mxu0 %v1942_v2  ;;  %v1914_v39 = vmax.f32 %v1842_v23, 0.0  ;;  %v1719_v27 = vpop.permute.xlu0 %1718 }
 0x44b   : > { %v1848_v34 = vadd.f32 %v1847_v35, %v1699_v29  ;;  %v1915_v41 = vmax.f32 %v1844_v30, 0.0  ;;  %v1723_v42 = vpop.permute.xlu1 %1722 }
 0x44c   : > { %v1916_v40 = vmax.f32 %v1846_v32, 0.0 }
 0x44d   : > { %v1917_v44 = vmax.f32 %v1848_v34, 0.0 }
 0x44e   : > { %v1944_v43 = vpack.c.bf16 %v1916_v40, %v1914_v39 }
 0x44f   : > { %v1945_v45 = vpack.c.bf16 %v1917_v44, %v1915_v41  ;;  %v1851_v46 = vpop.f32.mrb[72].mxu1 }
 0x450   : > { %v1852_v48 = vadd.f32 %v1851_v46, %v1703_v56  ;;  %v1853_v49 = vpop.f32.mrb[73].mxu1 }
 0x451   : > { %v1854_v52 = vadd.f32 %v1853_v49, %v1703_v56  ;;  %v1855_v53 = vpop.f32.mrb[74].mxu1  ;;  %2025 = vmatprep.subr.bf16.mxu0 %v1945_v45  ;;  %v1727_v45 = vpop.permute.xlu0 %1726 }
 0x452   : > { %v1856_v54 = vadd.f32 %v1855_v53, %v1707_v50  ;;  %v1857_v55 = vpop.f32.mrb[75].mxu1  ;;  %2026 = vmatpush1.bf16.msra.mxu0 %v1944_v43  ;;  %v1918_v58 = vmax.f32 %v1852_v48, 0.0 }
 0x453   : > { %v1858_v61 = vadd.f32 %v1857_v55, %v1707_v50  ;;  %v1919_v57 = vmax.f32 %v1854_v52, 0.0  ;;  %v1731_v52 = vpop.permute.xlu1 %1730 }
 0x454   : > { %v1920_v62 = vmax.f32 %v1856_v54, 0.0 }
 0x455   : > { %v1921_v7 = vmax.f32 %v1858_v61, 0.0 }
 0x456   : > { %v1946_v1 = vpack.c.bf16 %v1920_v62, %v1918_v58 }
 0x457   : > { %v1947_v4 = vpack.c.bf16 %v1921_v7, %v1919_v57  ;;  %v1861_v5 = vpop.f32.mrb[76].mxu1 }
 0x458   : > { %v1862_v10 = vadd.f32 %v1861_v5, %v1711_v3  ;;  %v1863_v11 = vpop.f32.mrb[77].mxu1 }
 0x459   : > { %v1864_v13 = vadd.f32 %v1863_v11, %v1711_v3  ;;  %v1865_v14 = vpop.f32.mrb[78].mxu1  ;;  %2027 = vmatprep.subr.bf16.mxu0 %v1947_v4  ;;  %v1735_v4 = vpop.permute.xlu0 %1734 }
 0x45a   : > { %v1866_v2 = vadd.f32 %v1865_v14, %v1715_v12  ;;  %v1867_v16 = vpop.f32.mrb[79].mxu1  ;;  %2028 = vmatpush1.bf16.msra.mxu0 %v1946_v1  ;;  %v1922_v20 = vmax.f32 %v1862_v10, 0.0 }
 0x45b   : > { %v1868_v19 = vadd.f32 %v1867_v16, %v1715_v12  ;;  %v1923_v22 = vmax.f32 %v1864_v13, 0.0  ;;  %v1739_v13 = vpop.permute.xlu1 %1738 }
 0x45c   : > { %v1924_v21 = vmax.f32 %v1866_v2, 0.0 }
 0x45d   : > { %v1925_v26 = vmax.f32 %v1868_v19, 0.0 }
 0x45e   : > { %v1948_v23 = vpack.c.bf16 %v1924_v21, %v1922_v20 }
 0x45f   : > { %v1949_v24 = vpack.c.bf16 %v1925_v26, %v1923_v22  ;;  %v1871_v25 = vpop.f32.mrb[80].mxu1 }
 0x460   : > { %v1872_v29 = vadd.f32 %v1871_v25, %v1719_v27  ;;  %v1873_v30 = vpop.f32.mrb[81].mxu1 }
 0x461   : > { %v1874_v31 = vadd.f32 %v1873_v30, %v1719_v27  ;;  %v1875_v32 = vpop.f32.mrb[82].mxu1  ;;  %2029 = vmatprep.subr.bf16.mxu0 %v1949_v24  ;;  %v1743_v24 = vpop.permute.xlu0 %1742 }
 0x462   : > { %v1876_v35 = vadd.f32 %v1875_v32, %v1723_v42  ;;  %v1877_v34 = vpop.f32.mrb[83].mxu1  ;;  %2030 = vmatpush1.bf16.msra.mxu0 %v1948_v23  ;;  %v1926_v40 = vmax.f32 %v1872_v29, 0.0 }
 0x463   : > { %v1878_v39 = vadd.f32 %v1877_v34, %v1723_v42  ;;  %v1927_v44 = vmax.f32 %v1874_v31, 0.0  ;;  %v1747_v31 = vpop.permute.xlu1 %1746 }
 0x464   : > { %v1928_v41 = vmax.f32 %v1876_v35, 0.0 }
 0x465   : > { %v1929_v43 = vmax.f32 %v1878_v39, 0.0 }
 0x466   : > { %v1950_v56 = vpack.c.bf16 %v1928_v41, %v1926_v40 }
 0x467   : > { %v1951_v46 = vpack.c.bf16 %v1929_v43, %v1927_v44  ;;  %v1881_v48 = vpop.f32.mrb[84].mxu1 }
 0x468   : > { %v1882_v49 = vadd.f32 %v1881_v48, %v1727_v45  ;;  %v1883_v50 = vpop.f32.mrb[85].mxu1  ;;  %v4612_v48 = vld [vmem:[%s5897_s2 + $0xc0] sm:$0xff]  }
 0x469   : > { %v1884_v53 = vadd.f32 %v1883_v50, %v1727_v45  ;;  %v1885_v54 = vpop.f32.mrb[86].mxu1  ;;  %2031 = vmatprep.subr.bf16.mxu0 %v1951_v46  ;;  %v4614_v50 = vld [vmem:[%s5897_s2 + $0xd0] sm:$0xff]  }
 0x46a   : > { %v1886_v55 = vadd.f32 %v1885_v54, %v1731_v52  ;;  %v1887_v61 = vpop.f32.mrb[87].mxu1  ;;  %2032 = vmatpush1.bf16.msra.mxu0 %v1950_v56  ;;  %v1930_v62 = vmax.f32 %v1882_v49, 0.0  ;;  %v4613_v49 = vld [vmem:[%s5897_s2 + $0xc8] sm:$0xff]  }
 0x46b   : > { %v1888_v58 = vadd.f32 %v1887_v61, %v1731_v52  ;;  %v1931_v7 = vmax.f32 %v1884_v53, 0.0  ;;  %v4615_v52 = vld [vmem:[%s5897_s2 + $0xd8] sm:$0xff]   ;;  %v4616_v53 = vld [vmem:[%s5897_s2 + $0xe0] sm:$0xff]   ;;  %v4617_v54 = vld [vmem:[%s5897_s2 + $0xe8] sm:$0xff]  }
 0x46c   : > { %v1932_v57 = vmax.f32 %v1886_v55, 0.0  ;;  %v4618_v55 = vld [vmem:[%s5897_s2 + $0xf0] sm:$0xff]   ;;  %v4619_v61 = vld [vmem:[%s5897_s2 + $0xf8] sm:$0xff]  }
 0x46d   : > { %v1933_v1 = vmax.f32 %v1888_v58, 0.0  ;;  %v4713_v58 = vmov 5  }
 0x46e   : > { %v1952_v3 = vpack.c.bf16 %v1932_v57, %v1930_v62  ;;  %4530 = vset.pattern.permute.xlu1 %v4713_v58  ;;  %4529 = vset.pattern.permute.xlu0 %v4713_v58  ;;  %v5186_v62 = vld [vmem:[%s5898_s3 + $0x8] sm:$0xff]  ;;  %v5192_v57 = vld [vmem:[%s5898_s3] sm:$0xff] }
 0x46f   : > { %v1953_v5 = vpack.c.bf16 %v1933_v1, %v1931_v7  ;;  %v1891_v10 = vpop.f32.mrb[88].mxu1  ;;  %2544 = vperm.xlu1 %4530, %v5186_v62   ;;  %2540 = vperm.xlu0 %4529, %v5192_v57   ;;  %v5198_v7 = vld [vmem:[%s5898_s3 + $0x10] sm:$0xff]  ;;  %v5204_v1 = vld [vmem:[%s5898_s3 + $0x18] sm:$0xff] }
 0x470   : > { %v1892_v11 = vadd.f32 %v1891_v10, %v1735_v4  ;;  %v1893_v12 = vpop.f32.mrb[89].mxu1  ;;  %v5228_v10 = vld [vmem:[%s5898_s3 + $0x38] sm:$0xff] }
 0x471   : > { %v1894_v14 = vadd.f32 %v1893_v12, %v1735_v4  ;;  %v1895_v2 = vpop.f32.mrb[90].mxu1  ;;  %2033 = vmatprep.subr.bf16.mxu0 %v1953_v5  ;;  %v5216_v4 = vld [vmem:[%s5898_s3 + $0x28] sm:$0xff]  ;;  %v5222_v5 = vld [vmem:[%s5898_s3 + $0x30] sm:$0xff] }
 0x472   : > { %v1896_v16 = vadd.f32 %v1895_v2, %v1739_v13  ;;  %v1897_v19 = vpop.f32.mrb[91].mxu1  ;;  %2034 = vmatpush1.bf16.msra.mxu0 %v1952_v3  ;;  %v1934_v21 = vmax.f32 %v1892_v11, 0.0  ;;  %v5210_v3 = vld [vmem:[%s5898_s3 + $0x20] sm:$0xff]  ;;  %v5240_v12 = vld [vmem:[%s5898_s3 + $0x48] sm:$0xff] }
 0x473   : > { %v1898_v20 = vadd.f32 %v1897_v19, %v1739_v13  ;;  %v1935_v26 = vmax.f32 %v1894_v14, 0.0  ;;  %2548 = vperm.xlu1 %4530, %v5198_v7   ;;  %2552 = vperm.xlu0 %4529, %v5204_v1   ;;  %v5234_v11 = vld [vmem:[%s5898_s3 + $0x40] sm:$0xff]  ;;  %v5246_v13 = vld [vmem:[%s5898_s3 + $0x50] sm:$0xff]  ;;  %v5252_v14 = vld [vmem:[%s5898_s3 + $0x58] sm:$0xff] }
 0x474   : > { %v1936_v22 = vmax.f32 %v1896_v16, 0.0  ;;  %v5258_v2 = vld [vmem:[%s5898_s3 + $0x60] sm:$0xff]  ;;  %v5264_v16 = vld [vmem:[%s5898_s3 + $0x68] sm:$0xff]  ;;  %v5270_v19 = vld [vmem:[%s5898_s3 + $0x70] sm:$0xff] }
 0x475   : > { %v1937_v23 = vmax.f32 %v1898_v20, 0.0  ;;  %v5276_v20 = vld [vmem:[%s5898_s3 + $0x78] sm:$0xff] }
 0x476   : > { %v1954_v27 = vpack.c.bf16 %v1936_v22, %v1934_v21  ;;  %v4714_v21 = vmov 6   ;;  %v4715_v22 = vmov 7  }
 0x477   : > { %v1955_v25 = vpack.c.bf16 %v1937_v23, %v1935_v26  ;;  %v1901_v29 = vpop.f32.mrb[92].mxu1  ;;  %2556 = vperm.xlu1 %4530, %v5210_v3   ;;  %2560 = vperm.xlu0 %4529, %v5216_v4   ;;  %v4716_v26 = vmov 4  }
 0x478   : > { %v1902_v30 = vadd.f32 %v1901_v29, %v1743_v24  ;;  %v1903_v42 = vpop.f32.mrb[93].mxu1 }
 0x479   : > { %v1904_v32 = vadd.f32 %v1903_v42, %v1743_v24  ;;  %v1905_v35 = vpop.f32.mrb[94].mxu1  ;;  %2035 = vmatprep.subr.bf16.mxu0 %v1955_v25 }
 0x47a   : > { %v1906_v34 = vadd.f32 %v1905_v35, %v1747_v31  ;;  %v1907_v39 = vpop.f32.mrb[95].mxu1  ;;  %2036 = vmatpush1.bf16.msra.mxu0 %v1954_v27  ;;  %v1938_v41 = vmax.f32 %v1902_v30, 0.0  ;;  %v4717_v27 = vmov 9  }
 0x47b   : > { %v1908_v40 = vadd.f32 %v1907_v39, %v1747_v31  ;;  %v1939_v43 = vmax.f32 %v1904_v32, 0.0  ;;  %2564 = vperm.xlu1 %4530, %v5222_v5   ;;  %2568 = vperm.xlu0 %4529, %v5228_v10  }
 0x47c   : > { %v1940_v44 = vmax.f32 %v1906_v34, 0.0 }
 0x47d   : > { %v1941_v56 = vmax.f32 %v1908_v40, 0.0 }
 0x47e   : > { %v1956_v45 = vpack.c.bf16 %v1940_v44, %v1938_v41 }
 0x47f   : > { %v1957_v46 = vpack.c.bf16 %v1941_v56, %v1939_v43  ;;  %2572 = vperm.xlu1 %4530, %v5234_v11   ;;  %2576 = vperm.xlu0 %4529, %v5240_v12  }
 0x481   : > { %2037 = vmatprep.subr.bf16.mxu0 %v1957_v46 }
 0x482   : > { %2038 = vmatpush1.bf16.msra.mxu0 %v1956_v45 }
 0x483   : > { %2580 = vperm.xlu1 %4530, %v5246_v13   ;;  %2584 = vperm.xlu0 %4529, %v5252_v14  }
 0x485   : > { %2056 = vmatmul.mubr.bf16.vlgmr.msra.gmra.mrb[64].mxu0 %v4612_v48 }
 0x486   : > { %2065 = vmatprep.mubr.bf16.mxu0 %v5902_v0 }
 0x487   : > { %2588 = vperm.xlu1 %4530, %v5258_v2   ;;  %2592 = vperm.xlu0 %4529, %v5264_v16  }
 0x48b   : > { %2596 = vperm.xlu1 %4530, %v5270_v19   ;;  %2600 = vperm.xlu0 %4529, %v5276_v20  }
 0x48d   : > { %2066 = vmatmul.mubr.bf16.gmra.mrb[68].mxu0 %v4613_v49 }
 0x48e   : > { %2075 = vmatprep.mubr.bf16.mxu0 %v5902_v0 }
 0x48f   : > { %4531 = vset.pattern.permute.xlu1 %v4714_v21  ;;  %4532 = vset.pattern.permute.xlu0 %v4714_v21 }
 0x490   : > { %2830 = vperm.xlu1 %4531, %v5192_v57   ;;  %2834 = vperm.xlu0 %4532, %v5186_v62  }
 0x494   : > { %2838 = vperm.xlu1 %4531, %v5198_v7   ;;  %2846 = vperm.xlu0 %4532, %v5210_v3  }
 0x495   : > { %2076 = vmatmul.mubr.bf16.gmra.mrb[72].mxu0 %v4614_v50 }
 0x496   : > { %2085 = vmatprep.mubr.bf16.mxu0 %v5902_v0 }
 0x498   : > { %2842 = vperm.xlu1 %4531, %v5204_v1   ;;  %2854 = vperm.xlu0 %4532, %v5222_v5  }
 0x49c   : > { %2850 = vperm.xlu1 %4531, %v5216_v4   ;;  %2862 = vperm.xlu0 %4532, %v5234_v11  }
 0x49d   : > { %2086 = vmatmul.mubr.bf16.gmra.mrb[76].mxu0 %v4615_v52 }
 0x49e   : > { %2095 = vmatprep.mubr.bf16.mxu0 %v5902_v0 }
 0x4a0   : > { %2858 = vperm.xlu1 %4531, %v5228_v10   ;;  %2870 = vperm.xlu0 %4532, %v5246_v13  }
 0x4a4   : > { %2866 = vperm.xlu1 %4531, %v5240_v12   ;;  %2878 = vperm.xlu0 %4532, %v5258_v2  }
 0x4a5   : > { %2096 = vmatmul.mubr.bf16.gmra.mrb[80].mxu0 %v4616_v53 }
 0x4a6   : > { %2105 = vmatprep.mubr.bf16.mxu0 %v5902_v0 }
 0x4a8   : > { %2874 = vperm.xlu1 %4531, %v5252_v14   ;;  %2886 = vperm.xlu0 %4532, %v5270_v19  }
 0x4ac   : > { %2882 = vperm.xlu1 %4531, %v5264_v16   ;;  %4533 = vset.pattern.permute.xlu0 %v4715_v22 }
 0x4ad   : > { %2106 = vmatmul.mubr.bf16.gmra.mrb[84].mxu0 %v4617_v54  ;;  %3120 = vperm.xlu0 %4533, %v5192_v57  }
 0x4ae   : > { %2115 = vmatprep.mubr.bf16.mxu0 %v5902_v0 }
 0x4b0   : > { %2890 = vperm.xlu1 %4531, %v5276_v20  }
 0x4b1   : > { %3132 = vperm.xlu0 %4533, %v5204_v1  }
 0x4b4   : > { %4534 = vset.pattern.permute.xlu1 %v4715_v22 }
 0x4b5   : > { %2116 = vmatmul.mubr.bf16.gmra.mrb[88].mxu0 %v4618_v55  ;;  %3124 = vperm.xlu1 %4534, %v5186_v62  }
 0x4b6   : > { %2125 = vmatprep.mubr.bf16.mxu0 %v5902_v0  ;;  %3140 = vperm.xlu0 %4533, %v5216_v4  }
 0x4b9   : > { %3128 = vperm.xlu1 %4534, %v5198_v7  }
 0x4ba   : > { %3148 = vperm.xlu0 %4533, %v5228_v10  }
 0x4bd   : > { %2126 = vmatmul.mubr.bf16.gmra.mrb[92].mxu0 %v4619_v61  ;;  %3136 = vperm.xlu1 %4534, %v5210_v3  }
 0x4be   : > { %2973 = vmatprep.mubr.bf16.mxu0 %v5902_v0  ;;  %3156 = vperm.xlu0 %4533, %v5240_v12  }
 0x4c1   : > { %3144 = vperm.xlu1 %4534, %v5222_v5  }
 0x4c2   : > { %3164 = vperm.xlu0 %4533, %v5252_v14  }
 0x4c5   : > { %3152 = vperm.xlu1 %4534, %v5234_v11  }
 0x4c6   : > { %3172 = vperm.xlu0 %4533, %v5264_v16  }
 0x4c9   : > { %3160 = vperm.xlu1 %4534, %v5246_v13  }
 0x4ca   : > { %3180 = vperm.xlu0 %4533, %v5276_v20  }
 0x4cd   : > { %3168 = vperm.xlu1 %4534, %v5258_v2  }
 0x4ce   : > { %4538 = vset.pattern.permute.xlu0 %v4717_v27 }
 0x4cf   : > { %3644 = vperm.xlu0 %4538, %v5198_v7  }
 0x4d1   : > { %3176 = vperm.xlu1 %4534, %v5270_v19  }
 0x4d3   : > { %3660 = vperm.xlu0 %4538, %v5222_v5  }
 0x4d5   : > { %4535 = vset.pattern.permute.xlu1 %v4716_v26 }
 0x4d6   : > { %2202 = vperm.xlu1 %4535, %v5192_v57  }
 0x4d7   : > { %3676 = vperm.xlu0 %4538, %v5246_v13  }
 0x4da   : > { %4536 = vset.pattern.permute.xlu1 %v4717_v27 }
 0x4db   : > { %3636 = vperm.xlu1 %4536, %v5192_v57   ;;  %4547 = vset.pattern.permute.xlu0 %v4716_v26 }
 0x4dc   : > { %2206 = vperm.xlu0 %4547, %v5186_v62  }
 0x4df   : > { %3640 = vperm.xlu1 %4536, %v5186_v62  }
 0x4e0   : > { %2210 = vperm.xlu0 %4547, %v5198_v7  }
 0x4e3   : > { %4537 = vset.pattern.permute.xlu1 %v4716_v26 }
 0x4e4   : > { %2214 = vperm.xlu1 %4537, %v5204_v1   ;;  %2222 = vperm.xlu0 %4547, %v5216_v4  }
 0x4e8   : > { %4539 = vset.pattern.permute.xlu1 %v4717_v27  ;;  %2226 = vperm.xlu0 %4547, %v5222_v5  }
 0x4e9   : > { %3648 = vperm.xlu1 %4539, %v5204_v1  }
 0x4ec   : > { %2238 = vperm.xlu0 %4547, %v5240_v12  }
 0x4ed   : > { %4540 = vset.pattern.permute.xlu1 %v4716_v26 }
 0x4ee   : > { %2218 = vperm.xlu1 %4540, %v5210_v3  }
 0x4f0   : > { %2242 = vperm.xlu0 %4547, %v5246_v13  }
 0x4f2   : > { %4541 = vset.pattern.permute.xlu1 %v4717_v27 }
 0x4f3   : > { %3652 = vperm.xlu1 %4541, %v5210_v3  }
 0x4f4   : > { %2254 = vperm.xlu0 %4547, %v5264_v16  }
 0x4f7   : > { %3656 = vperm.xlu1 %4541, %v5216_v4  }
 0x4f8   : > { %2258 = vperm.xlu0 %4547, %v5270_v19  }
 0x4fb   : > { %4542 = vset.pattern.permute.xlu1 %v4716_v26 }
 0x4fc   : > { %2230 = vperm.xlu1 %4542, %v5228_v10   ;;  %4552 = vset.pattern.permute.xlu0 %v4717_v27 }
 0x4fd   : > { %3692 = vperm.xlu0 %4552, %v5270_v19  }
 0x500   : > { %4543 = vset.pattern.permute.xlu1 %v4717_v27 }
 0x501   : > { %3664 = vperm.xlu1 %4543, %v5228_v10   ;;  %4555 = vset.pattern.permute.xlu0 %v5902_v0 }
 0x505   : > { %4544 = vset.pattern.permute.xlu1 %v4716_v26 }
 0x506   : > { %2234 = vperm.xlu1 %4544, %v5234_v11  }
 0x50a   : > { %4545 = vset.pattern.permute.xlu1 %v4717_v27 }
 0x50b   : > { %3668 = vperm.xlu1 %4545, %v5234_v11  }
 0x50f   : > { %3672 = vperm.xlu1 %4545, %v5240_v12   ;;  %v4620_v12 = vld [vmem:[%s5897_s2 + $0x100] sm:$0xff]  }
 0x513   : > { %4546 = vset.pattern.permute.xlu1 %v4716_v26 }
 0x514   : > { %2246 = vperm.xlu1 %4546, %v5252_v14  }
 0x518   : > { %4548 = vset.pattern.permute.xlu1 %v4717_v27 }
 0x519   : > { %3680 = vperm.xlu1 %4548, %v5252_v14   ;;  %v4621_v14 = vld [vmem:[%s5897_s2 + $0x108] sm:$0xff]  }
 0x51d   : > { %4549 = vset.pattern.permute.xlu1 %v4716_v26 }
 0x51e   : > { %2250 = vperm.xlu1 %4549, %v5258_v2  }
 0x522   : > { %4550 = vset.pattern.permute.xlu1 %v4717_v27 }
 0x523   : > { %3684 = vperm.xlu1 %4550, %v5258_v2   ;;  %v4628_v2 = vld [vmem:[%s5897_s2 + $0x140] sm:$0xff]  }
 0x527   : > { %3688 = vperm.xlu1 %4550, %v5264_v16  }
 0x52b   : > { %4551 = vset.pattern.permute.xlu1 %v4716_v26 }
 0x52c   : > { %2262 = vperm.xlu1 %4551, %v5276_v20  }
 0x530   : > { %4553 = vset.pattern.permute.xlu1 %v4717_v27  ;;  %v4629_v27 = vld [vmem:[%s5897_s2 + $0x148] sm:$0xff]  }
 0x531   : > { %3696 = vperm.xlu1 %4553, %v5276_v20  }
 0x535   : > { %4554 = vset.pattern.permute.xlu1 %v5902_v0 }
 0x558   : > { %v2057_v23 = vpop.f32.mrb[64].mxu0 }
 0x559   : > { %v2059_v24 = vpop.f32.mrb[65].mxu0  ;;  %v2136_v29 = vmax.f32 %v2057_v23, 0.0 }
 0x55a   : > { %v2061_v25 = vpop.f32.mrb[66].mxu0  ;;  %v2137_v31 = vmax.f32 %v2059_v24, 0.0 }
 0x55b   : > { %v2138_v30 = vmax.f32 %v2061_v25, 0.0  ;;  %v2063_v42 = vpop.f32.mrb[67].mxu0 }
 0x55c   : > { %v2139_v32 = vmax.f32 %v2063_v42, 0.0 }
 0x55d   : > { %v2168_v35 = vpack.c.bf16 %v2138_v30, %v2136_v29 }
 0x55e   : > { %v2169_v34 = vpack.c.bf16 %v2139_v32, %v2137_v31 }
 0x560   : > { %v2067_v39 = vpop.f32.mrb[68].mxu0  ;;  %2313 = vmatprep.subr.bf16.mxu1 %v2169_v34 }
 0x561   : > { %v2069_v40 = vpop.f32.mrb[69].mxu0  ;;  %2314 = vmatpush1.bf16.msra.mxu1 %v2168_v35  ;;  %v2140_v44 = vmax.f32 %v2067_v39, 0.0 }
 0x562   : > { %v2071_v41 = vpop.f32.mrb[70].mxu0  ;;  %v2141_v45 = vmax.f32 %v2069_v40, 0.0 }
 0x563   : > { %v2142_v43 = vmax.f32 %v2071_v41, 0.0  ;;  %v2073_v56 = vpop.f32.mrb[71].mxu0 }
 0x564   : > { %v2143_v46 = vmax.f32 %v2073_v56, 0.0 }
 0x565   : > { %v2170_v48 = vpack.c.bf16 %v2142_v43, %v2140_v44 }
 0x566   : > { %v2171_v49 = vpack.c.bf16 %v2143_v46, %v2141_v45 }
 0x568   : > { %v2077_v50 = vpop.f32.mrb[72].mxu0  ;;  %2315 = vmatprep.subr.bf16.mxu1 %v2171_v49 }
 0x569   : > { %v2079_v52 = vpop.f32.mrb[73].mxu0  ;;  %2316 = vmatpush1.bf16.msra.mxu1 %v2170_v48  ;;  %v2144_v54 = vmax.f32 %v2077_v50, 0.0 }
 0x56a   : > { %v2081_v53 = vpop.f32.mrb[74].mxu0  ;;  %v2145_v58 = vmax.f32 %v2079_v52, 0.0 }
 0x56b   : > { %v2146_v55 = vmax.f32 %v2081_v53, 0.0  ;;  %v2083_v61 = vpop.f32.mrb[75].mxu0 }
 0x56c   : > { %v2147_v57 = vmax.f32 %v2083_v61, 0.0 }
 0x56d   : > { %v2172_v21 = vpack.c.bf16 %v2146_v55, %v2144_v54 }
 0x56e   : > { %v2173_v1 = vpack.c.bf16 %v2147_v57, %v2145_v58 }
 0x570   : > { %v2087_v62 = vpop.f32.mrb[76].mxu0  ;;  %2317 = vmatprep.subr.bf16.mxu1 %v2173_v1 }
 0x571   : > { %v2089_v22 = vpop.f32.mrb[77].mxu0  ;;  %2318 = vmatpush1.bf16.msra.mxu1 %v2172_v21  ;;  %v2148_v24 = vmax.f32 %v2087_v62, 0.0 }
 0x572   : > { %v2091_v23 = vpop.f32.mrb[78].mxu0  ;;  %v2149_v29 = vmax.f32 %v2089_v22, 0.0 }
 0x573   : > { %v2150_v25 = vmax.f32 %v2091_v23, 0.0  ;;  %v2093_v7 = vpop.f32.mrb[79].mxu0 }
 0x574   : > { %v2151_v30 = vmax.f32 %v2093_v7, 0.0 }
 0x575   : > { %v2174_v42 = vpack.c.bf16 %v2150_v25, %v2148_v24 }
 0x576   : > { %v2175_v31 = vpack.c.bf16 %v2151_v30, %v2149_v29 }
 0x578   : > { %v2097_v32 = vpop.f32.mrb[80].mxu0  ;;  %2319 = vmatprep.subr.bf16.mxu1 %v2175_v31 }
 0x579   : > { %v2099_v35 = vpop.f32.mrb[81].mxu0  ;;  %2320 = vmatpush1.bf16.msra.mxu1 %v2174_v42  ;;  %v2152_v34 = vmax.f32 %v2097_v32, 0.0 }
 0x57a   : > { %v2101_v3 = vpop.f32.mrb[82].mxu0  ;;  %v2153_v40 = vmax.f32 %v2099_v35, 0.0 }
 0x57b   : > { %v2154_v39 = vmax.f32 %v2101_v3, 0.0  ;;  %v2103_v5 = vpop.f32.mrb[83].mxu0 }
 0x57c   : > { %v2155_v41 = vmax.f32 %v2103_v5, 0.0 }
 0x57d   : > { %v2176_v4 = vpack.c.bf16 %v2154_v39, %v2152_v34  ;;  %v4630_v34 = vld [vmem:[%s5897_s2 + $0x150] sm:$0xff]  }
 0x57e   : > { %v2177_v44 = vpack.c.bf16 %v2155_v41, %v2153_v40  ;;  %v4631_v40 = vld [vmem:[%s5897_s2 + $0x158] sm:$0xff]  }
 0x580   : > { %v2107_v43 = vpop.f32.mrb[84].mxu0  ;;  %2321 = vmatprep.subr.bf16.mxu1 %v2177_v44 }
 0x581   : > { %v2109_v56 = vpop.f32.mrb[85].mxu0  ;;  %2322 = vmatpush1.bf16.msra.mxu1 %v2176_v4  ;;  %v2156_v46 = vmax.f32 %v2107_v43, 0.0  ;;  %v4632_v43 = vld [vmem:[%s5897_s2 + $0x160] sm:$0xff]  }
 0x582   : > { %v2111_v45 = vpop.f32.mrb[86].mxu0  ;;  %v2157_v13 = vmax.f32 %v2109_v56, 0.0 }
 0x583   : > { %v2158_v48 = vmax.f32 %v2111_v45, 0.0  ;;  %v2113_v49 = vpop.f32.mrb[87].mxu0 }
 0x584   : > { %v2159_v50 = vmax.f32 %v2113_v49, 0.0 }
 0x585   : > { %v2178_v52 = vpack.c.bf16 %v2158_v48, %v2156_v46  ;;  %v4633_v48 = vld [vmem:[%s5897_s2 + $0x168] sm:$0xff]  }
 0x586   : > { %v2179_v10 = vpack.c.bf16 %v2159_v50, %v2157_v13  ;;  %v4634_v50 = vld [vmem:[%s5897_s2 + $0x170] sm:$0xff]  }
 0x588   : > { %v2117_v53 = vpop.f32.mrb[88].mxu0  ;;  %2323 = vmatprep.subr.bf16.mxu1 %v2179_v10 }
 0x589   : > { %v2119_v54 = vpop.f32.mrb[89].mxu0  ;;  %2324 = vmatpush1.bf16.msra.mxu1 %v2178_v52  ;;  %v2160_v61 = vmax.f32 %v2117_v53, 0.0 }
 0x58a   : > { %v2121_v55 = vpop.f32.mrb[90].mxu0  ;;  %v2161_v21 = vmax.f32 %v2119_v54, 0.0  ;;  %v4635_v54 = vld [vmem:[%s5897_s2 + $0x178] sm:$0xff]  }
 0x58b   : > { %v2162_v58 = vmax.f32 %v2121_v55, 0.0  ;;  %v2123_v57 = vpop.f32.mrb[91].mxu0 }
 0x58c   : > { %v2163_v1 = vmax.f32 %v2123_v57, 0.0 }
 0x58d   : > { %v2180_v62 = vpack.c.bf16 %v2162_v58, %v2160_v61 }
 0x58e   : > { %v2181_v22 = vpack.c.bf16 %v2163_v1, %v2161_v21 }
 0x590   : > { %v2127_v23 = vpop.f32.mrb[92].mxu0  ;;  %2325 = vmatprep.subr.bf16.mxu1 %v2181_v22 }
 0x591   : > { %v2129_v24 = vpop.f32.mrb[93].mxu0  ;;  %2326 = vmatpush1.bf16.msra.mxu1 %v2180_v62  ;;  %v2164_v19 = vmax.f32 %v2127_v23, 0.0 }
 0x592   : > { %v2131_v11 = vpop.f32.mrb[94].mxu0  ;;  %v2165_v29 = vmax.f32 %v2129_v24, 0.0 }
 0x593   : > { %v2166_v25 = vmax.f32 %v2131_v11, 0.0  ;;  %v2133_v7 = vpop.f32.mrb[95].mxu0 }
 0x594   : > { %v2167_v30 = vmax.f32 %v2133_v7, 0.0 }
 0x595   : > { %v2182_v42 = vpack.c.bf16 %v2166_v25, %v2164_v19 }
 0x596   : > { %v2183_v31 = vpack.c.bf16 %v2167_v30, %v2165_v29 }
 0x598   : > { %2327 = vmatprep.subr.bf16.mxu1 %v2183_v31 }
 0x599   : > { %2328 = vmatpush1.bf16.msra.mxu1 %v2182_v42 }
 0x59a   : > { %2651 = vmatprep.subr.bf16.mxu1 %v5121_v60  ;;  %v4622_v60 = vld [vmem:[%s5897_s2 + $0x110] sm:$0xff]  }
 0x59c   : > { %2346 = vmatmul.mubr.bf16.vlgmr.msra.gmra.mrb[96].mxu1 %v4620_v12 }
 0x59d   : > { %2652 = vmatpush1.bf16.msra.mxu1 %v5119_v59  ;;  %2355 = vmatprep.mubr.bf16.mxu1 %v5902_v0  ;;  %v5372_v59 = vpop.permute.xlu1 %2544 }
 0x59e   : > { %2653 = vmatprep.subr.bf16.mxu1 %v5125_v9  ;;  %v4623_v9 = vld [vmem:[%s5897_s2 + $0x118] sm:$0xff]  }
 0x5a1   : > { %2654 = vmatpush1.bf16.msra.mxu1 %v5123_v6  ;;  %v5382_v6 = vpop.permute.xlu1 %2548 }
 0x5a2   : > { %2655 = vmatprep.subr.bf16.mxu1 %v5129_v18 }
 0x5a4   : > { %2356 = vmatmul.mubr.bf16.gmra.mrb[100].mxu1 %v4621_v14 }
 0x5a5   : > { %2656 = vmatpush1.bf16.msra.mxu1 %v5127_v17  ;;  %2365 = vmatprep.mubr.bf16.mxu1 %v5902_v0  ;;  %v5394_v17 = vpop.permute.xlu1 %2556 }
 0x5a6   : > { %2657 = vmatprep.subr.bf16.mxu1 %v5133_v33 }
 0x5a9   : > { %2658 = vmatpush1.bf16.msra.mxu1 %v5131_v28  ;;  %v5401_v18 = vpop.permute.xlu1 %2564  ;;  %v4624_v28 = vld [vmem:[%s5897_s2 + $0x120] sm:$0xff]  }
 0x5aa   : > { %2659 = vmatprep.subr.bf16.mxu1 %v5137_v37 }
 0x5ac   : > { %2366 = vmatmul.mubr.bf16.gmra.mrb[104].mxu1 %v4622_v60 }
 0x5ad   : > { %2660 = vmatpush1.bf16.msra.mxu1 %v5135_v36  ;;  %2375 = vmatprep.mubr.bf16.mxu1 %v5902_v0  ;;  %v5408_v33 = vpop.permute.xlu1 %2572  ;;  %v4625_v36 = vld [vmem:[%s5897_s2 + $0x128] sm:$0xff]  }
 0x5ae   : > { %2661 = vmatprep.subr.bf16.mxu1 %v5141_v63 }
 0x5b1   : > { %2662 = vmatpush1.bf16.msra.mxu1 %v5139_v51  ;;  %v5413_v37 = vpop.permute.xlu1 %2580  ;;  %v4626_v51 = vld [vmem:[%s5897_s2 + $0x130] sm:$0xff]  }
 0x5b2   : > { %2663 = vmatprep.subr.bf16.mxu1 %v5145_v8  ;;  %v4627_v8 = vld [vmem:[%s5897_s2 + $0x138] sm:$0xff]  }
 0x5b4   : > { %2376 = vmatmul.mubr.bf16.gmra.mrb[108].mxu1 %v4623_v9 }
 0x5b5   : > { %2664 = vmatpush1.bf16.msra.mxu1 %v5143_v15  ;;  %2385 = vmatprep.mubr.bf16.mxu1 %v5902_v0  ;;  %v5419_v63 = vpop.permute.xlu1 %2588 }
 0x5b6   : > { %2665 = vmatprep.subr.bf16.mxu1 %v5149_v47 }
 0x5b9   : > { %2666 = vmatpush1.bf16.msra.mxu1 %v5147_v38  ;;  %v5422_v15 = vpop.permute.xlu1 %2596  ;;  %v5427_v38 = vpop.permute.xlu0 %2540 }
 0x5bc   : > { %2386 = vmatmul.mubr.bf16.gmra.mrb[112].mxu1 %v4624_v28 }
 0x5bd   : > { %2395 = vmatprep.mubr.bf16.mxu1 %v5902_v0  ;;  %v5430_v47 = vpop.permute.xlu1 %2830  ;;  %v5435_v16 = vpop.permute.xlu0 %2552 }
 0x5c1   : > { %v5437_v20 = vpop.permute.xlu1 %2838  ;;  %v5440_v26 = vpop.permute.xlu0 %2560 }
 0x5c4   : > { %2396 = vmatmul.mubr.bf16.gmra.mrb[116].mxu1 %v4625_v36 }
 0x5c5   : > { %2405 = vmatprep.mubr.bf16.mxu1 %v5902_v0  ;;  %v5445_v32 = vpop.permute.xlu1 %2842  ;;  %v5448_v35 = vpop.permute.xlu0 %2568 }
 0x5c9   : > { %v5450_v3 = vpop.permute.xlu1 %2850  ;;  %v5455_v39 = vpop.permute.xlu0 %2576 }
 0x5cc   : > { %2406 = vmatmul.mubr.bf16.gmra.mrb[120].mxu1 %v4626_v51 }
 0x5cd   : > { %2415 = vmatprep.mubr.bf16.mxu1 %v5902_v0  ;;  %v5458_v5 = vpop.permute.xlu1 %2858  ;;  %v5463_v41 = vpop.permute.xlu0 %2584 }
 0x5d1   : > { %v5465_v4 = vpop.permute.xlu1 %2866  ;;  %v5468_v44 = vpop.permute.xlu0 %2592 }
 0x5d4   : > { %2416 = vmatmul.mubr.bf16.gmra.mrb[124].mxu1 %v4627_v8 }
 0x5d5   : > { %2683 = vmatprep.mubr.bf16.mxu1 %v5902_v0  ;;  %v5473_v56 = vpop.permute.xlu1 %2874  ;;  %v5476_v45 = vpop.permute.xlu0 %2600 }
 0x5d9   : > { %v5478_v46 = vpop.permute.xlu1 %2882  ;;  %v5483_v49 = vpop.permute.xlu0 %2834 }
 0x5dc   : > { %2684 = vmatmul.mubr.bf16.vlgmr.msra.gmra.mrb[128].mxu1 %v4628_v2 }
 0x5dd   : > { %2693 = vmatprep.mubr.bf16.mxu1 %v5902_v0  ;;  %v5486_v13 = vpop.permute.xlu1 %2890  ;;  %v5491_v52 = vpop.permute.xlu0 %2846 }
 0x5e1   : > { %v5493_v10 = vpop.permute.xlu1 %3124  ;;  %v5496_v53 = vpop.permute.xlu0 %2854 }
 0x5e4   : > { %2694 = vmatmul.mubr.bf16.gmra.mrb[132].mxu1 %v4629_v27 }
 0x5e5   : > { %2703 = vmatprep.mubr.bf16.mxu1 %v5902_v0  ;;  %v5501_v55 = vpop.permute.xlu1 %3128  ;;  %v5503_v61 = vpop.permute.xlu0 %2862 }
 0x5e9   : > { %v5506_v58 = vpop.permute.xlu1 %3136  ;;  %v5508_v57 = vpop.permute.xlu0 %2870 }
 0x5ec   : > { %2704 = vmatmul.mubr.bf16.gmra.mrb[136].mxu1 %v4630_v34 }
 0x5ed   : > { %2713 = vmatprep.mubr.bf16.mxu1 %v5902_v0  ;;  %v5510_v21 = vpop.permute.xlu1 %3144  ;;  %v5512_v1 = vpop.permute.xlu0 %2878 }
 0x5ee   : > { %5928 = vst [vmem:[#allocation2_spill] sm:$0xff] %v5510_v21 }
 0x5f1   : > { %v5514_v62 = vpop.permute.xlu1 %3152  ;;  %v5516_v22 = vpop.permute.xlu0 %2886 }
 0x5f2   : > { %5929 = vst [vmem:[#allocation3_spill] sm:$0xff] %v5514_v62 }
 0x5f4   : > { %2714 = vmatmul.mubr.bf16.gmra.mrb[140].mxu1 %v4631_v40 }
 0x5f5   : > { %2723 = vmatprep.mubr.bf16.mxu1 %v5902_v0  ;;  %v5518_v23 = vpop.permute.xlu1 %3160  ;;  %v5520_v24 = vpop.permute.xlu0 %3120 }
 0x5f6   : > { %5930 = vst [vmem:[#allocation4_spill] sm:$0xff] %v5518_v23 }
 0x5f9   : > { %v5522_v11 = vpop.permute.xlu1 %3168  ;;  %v5524_v19 = vpop.permute.xlu0 %3132 }
 0x5fa   : > { %5931 = vst [vmem:[#allocation5_spill] sm:$0xff] %v5522_v11 }
 0x5fc   : > { %2724 = vmatmul.mubr.bf16.gmra.mrb[144].mxu1 %v4632_v43 }
 0x5fd   : > { %2733 = vmatprep.mubr.bf16.mxu1 %v5902_v0  ;;  %v5526_v25 = vpop.permute.xlu1 %3176  ;;  %v5528_v7 = vpop.permute.xlu0 %3140 }
 0x5fe   : > { %5932 = vst [vmem:[#allocation6_spill] sm:$0xff] %v5526_v25 }
 0x601   : > { %v2203_v29 = vpop.permute.xlu1 %2202  ;;  %v5530_v30 = vpop.permute.xlu0 %3148 }
 0x602   : > { %5933 = vst [vmem:[#allocation7_spill] sm:$0xff] %v5530_v30 }
 0x604   : > { %2734 = vmatmul.mubr.bf16.gmra.mrb[148].mxu1 %v4633_v48 }
 0x605   : > { %2743 = vmatprep.mubr.bf16.mxu1 %v5902_v0  ;;  %v5532_v42 = vpop.permute.xlu1 %3636  ;;  %v5534_v31 = vpop.permute.xlu0 %3156 }
 0x606   : > { %5934 = vst [vmem:[#allocation8_spill] sm:$0xff] %v5532_v42  ;;  %5935 = vst [vmem:[#allocation9_spill] sm:$0xff] %v5534_v31 }
 0x609   : > { %v5536_v12 = vpop.permute.xlu1 %3640  ;;  %v5538_v14 = vpop.permute.xlu0 %3164 }
 0x60a   : > { %5936 = vst [vmem:[#allocation10_spill] sm:$0xff] %v5536_v12  ;;  %5937 = vst [vmem:[#allocation11_spill] sm:$0xff] %v5538_v14 }
 0x60c   : > { %2744 = vmatmul.mubr.bf16.gmra.mrb[152].mxu1 %v4634_v50 }
 0x60d   : > { %2753 = vmatprep.mubr.bf16.mxu1 %v5902_v0  ;;  %v2215_v60 = vpop.permute.xlu1 %2214  ;;  %v5540_v9 = vpop.permute.xlu0 %3172 }
 0x60e   : > { %5938 = vst [vmem:[#allocation12_spill] sm:$0xff] %v5540_v9 }
 0x611   : > { %v5542_v28 = vpop.permute.xlu1 %3648  ;;  %v5544_v36 = vpop.permute.xlu0 %3180 }
 0x612   : > { %5939 = vst [vmem:[#allocation13_spill] sm:$0xff] %v5542_v28  ;;  %5940 = vst [vmem:[#allocation14_spill] sm:$0xff] %v5544_v36 }
 0x614   : > { %2754 = vmatmul.mubr.bf16.gmra.mrb[156].mxu1 %v4635_v54 }
 0x615   : > { %3263 = vmatprep.mubr.bf16.mxu1 %v5902_v0  ;;  %v2219_v51 = vpop.permute.xlu1 %2218  ;;  %v5546_v8 = vpop.permute.xlu0 %3644 }
 0x616   : > { %5941 = vst [vmem:[#allocation15_spill] sm:$0xff] %v5546_v8 }
 0x619   : > { %v5548_v2 = vpop.permute.xlu1 %3652  ;;  %v5550_v27 = vpop.permute.xlu0 %3660 }
 0x61a   : > { %5942 = vst [vmem:[#allocation16_spill] sm:$0xff] %v5548_v2  ;;  %5943 = vst [vmem:[#allocation17_spill] sm:$0xff] %v5550_v27 }
 0x61d   : > { %v5552_v34 = vpop.permute.xlu1 %3656  ;;  %v5554_v40 = vpop.permute.xlu0 %3676 }
 0x61e   : > { %5944 = vst [vmem:[#allocation18_spill] sm:$0xff] %v5552_v34  ;;  %5945 = vst [vmem:[#allocation19_spill] sm:$0xff] %v5554_v40 }
 0x621   : > { %v2231_v43 = vpop.permute.xlu1 %2230  ;;  %v2207_v50 = vpop.permute.xlu0 %2206 }
 0x625   : > { %v5556_v42 = vpop.permute.xlu1 %3664  ;;  %v2211_v14 = vpop.permute.xlu0 %2210 }
 0x626   : > { %5946 = vst [vmem:[#allocation20_spill] sm:$0xff] %v5556_v42 }
 0x629   : > { %v2235_v23 = vpop.permute.xlu1 %2234 }
 0x66f   : > { %v2347_v48 = vpop.f32.mrb[96].mxu1 }
 0x670   : > { %v2349_v54 = vpop.f32.mrb[97].mxu1  ;;  %v2348_v0 = vadd.f32 %v2347_v48, %v2203_v29 }
 0x671   : > { %v2351_v12 = vpop.f32.mrb[98].mxu1  ;;  %v2350_v28 = vadd.f32 %v2349_v54, %v2203_v29 }
 0x672   : > { %v2353_v36 = vpop.f32.mrb[99].mxu1  ;;  %v2352_v25 = vadd.f32 %v2351_v12, %v2207_v50  ;;  %v2426_v9 = vmax.f32 %v2348_v0, 0.0 }
 0x673   : > { %v2354_v8 = vadd.f32 %v2353_v36, %v2207_v50  ;;  %v2427_v11 = vmax.f32 %v2350_v28, 0.0  ;;  %v5562_v28 = vpop.permute.xlu1 %3668 }
 0x674   : > { %v2428_v2 = vmax.f32 %v2352_v25, 0.0  ;;  %5948 = vst [vmem:[#allocation22_spill] sm:$0xff] %v5562_v28 }
 0x675   : > { %v2429_v27 = vmax.f32 %v2354_v8, 0.0 }
 0x676   : > { %v5558_v34 = vpack.c.bf16 %v2428_v2, %v2426_v9  ;;  %v2223_v2 = vpop.permute.xlu0 %2222 }
 0x677   : > { %v2357_v40 = vpop.f32.mrb[100].mxu1  ;;  %v5560_v31 = vpack.c.bf16 %v2429_v27, %v2427_v11 }
 0x678   : > { %5947 = vst [vmem:[#allocation21_spill] sm:$0xff] %v5558_v34  ;;  %v2359_v62 = vpop.f32.mrb[101].mxu1  ;;  %v2358_v48 = vadd.f32 %v2357_v40, %v2211_v14 }
 0x679   : > { %v2361_v30 = vpop.f32.mrb[102].mxu1  ;;  %v2360_v29 = vadd.f32 %v2359_v62, %v2211_v14 }
 0x67a   : > { %v2363_v54 = vpop.f32.mrb[103].mxu1  ;;  %v2362_v42 = vadd.f32 %v2361_v30, %v2215_v60  ;;  %v2430_v36 = vmax.f32 %v2358_v48, 0.0 }
 0x67b   : > { %v2364_v21 = vadd.f32 %v2363_v54, %v2215_v60  ;;  %v2431_v25 = vmax.f32 %v2360_v29, 0.0  ;;  %v5568_v60 = vpop.permute.xlu1 %3672  ;;  %v2227_v54 = vpop.permute.xlu0 %2226 }
 0x67c   : > { %v2432_v12 = vmax.f32 %v2362_v42, 0.0  ;;  %5950 = vst [vmem:[#allocation24_spill] sm:$0xff] %v5568_v60 }
 0x67d   : > { %v2433_v0 = vmax.f32 %v2364_v21, 0.0 }
 0x67e   : > { %v5564_v8 = vpack.c.bf16 %v2432_v12, %v2430_v36 }
 0x67f   : > { %v2367_v9 = vpop.f32.mrb[104].mxu1  ;;  %v5566_v50 = vpack.c.bf16 %v2433_v0, %v2431_v25 }
 0x680   : > { %5949 = vst [vmem:[#allocation23_spill] sm:$0xff] %v5564_v8  ;;  %v2369_v11 = vpop.f32.mrb[105].mxu1  ;;  %v2368_v27 = vadd.f32 %v2367_v9, %v2219_v51 }
 0x681   : > { %v2371_v40 = vpop.f32.mrb[106].mxu1  ;;  %v2370_v34 = vadd.f32 %v2369_v11, %v2219_v51  ;;  %v2247_v51 = vpop.permute.xlu1 %2246 }
 0x682   : > { %v2373_v62 = vpop.f32.mrb[107].mxu1  ;;  %v2372_v14 = vadd.f32 %v2371_v40, %v2223_v2  ;;  %v2434_v42 = vmax.f32 %v2368_v27, 0.0 }
 0x683   : > { %v2374_v30 = vadd.f32 %v2373_v62, %v2223_v2  ;;  %v2435_v48 = vmax.f32 %v2370_v34, 0.0 }
 0x684   : > { %v2436_v21 = vmax.f32 %v2372_v14, 0.0 }
 0x685   : > { %v2437_v29 = vmax.f32 %v2374_v30, 0.0  ;;  %v2239_v30 = vpop.permute.xlu0 %2238 }
 0x686   : > { %v5570_v12 = vpack.c.bf16 %v2436_v21, %v2434_v42  ;;  %v5576_v21 = vpop.permute.xlu1 %3680 }
 0x687   : > { %v2377_v36 = vpop.f32.mrb[108].mxu1  ;;  %v5572_v28 = vpack.c.bf16 %v2437_v29, %v2435_v48  ;;  %5954 = vst [vmem:[#allocation28_spill] sm:$0xff] %v5576_v21 }
 0x688   : > { %5951 = vst [vmem:[#allocation25_spill] sm:$0xff] %v5570_v12  ;;  %v2379_v0 = vpop.f32.mrb[109].mxu1  ;;  %v2378_v25 = vadd.f32 %v2377_v36, %v2227_v54 }
 0x689   : > { %5952 = vst [vmem:[#allocation26_spill] sm:$0xff] %v5572_v28  ;;  %v2381_v9 = vpop.f32.mrb[110].mxu1  ;;  %v2380_v8 = vadd.f32 %v2379_v0, %v2227_v54 }
 0x68a   : > { %v2383_v11 = vpop.f32.mrb[111].mxu1  ;;  %v2382_v40 = vadd.f32 %v2381_v9, %v2231_v43  ;;  %v2438_v60 = vmax.f32 %v2378_v25, 0.0 }
 0x68b   : > { %v2384_v2 = vadd.f32 %v2383_v11, %v2231_v43  ;;  %v2439_v14 = vmax.f32 %v2380_v8, 0.0  ;;  %v2243_v8 = vpop.permute.xlu0 %2242 }
 0x68c   : > { %v2440_v62 = vmax.f32 %v2382_v40, 0.0 }
 0x68d   : > { %v2441_v27 = vmax.f32 %v2384_v2, 0.0 }
 0x68e   : > { %v5574_v34 = vpack.c.bf16 %v2440_v62, %v2438_v60  ;;  %v2251_v60 = vpop.permute.xlu1 %2250 }
 0x68f   : > { %v2387_v42 = vpop.f32.mrb[112].mxu1  ;;  %v5578_v48 = vpack.c.bf16 %v2441_v27, %v2439_v14 }
 0x690   : > { %5953 = vst [vmem:[#allocation27_spill] sm:$0xff] %v5574_v34  ;;  %v2389_v29 = vpop.f32.mrb[113].mxu1  ;;  %v2388_v36 = vadd.f32 %v2387_v42, %v2235_v23 }
 0x691   : > { %5955 = vst [vmem:[#allocation29_spill] sm:$0xff] %v5578_v48  ;;  %v2391_v12 = vpop.f32.mrb[114].mxu1  ;;  %v2390_v54 = vadd.f32 %v2389_v29, %v2235_v23 }
 0x692   : > { %v2393_v0 = vpop.f32.mrb[115].mxu1  ;;  %v2392_v28 = vadd.f32 %v2391_v12, %v2239_v30  ;;  %v2442_v43 = vmax.f32 %v2388_v36, 0.0  ;;  %v5584_v12 = vpop.permute.xlu1 %3684 }
 0x693   : > { %v2394_v9 = vadd.f32 %v2393_v0, %v2239_v30  ;;  %v2443_v25 = vmax.f32 %v2390_v54, 0.0  ;;  %5957 = vst [vmem:[#allocation31_spill] sm:$0xff] %v5584_v12 }
 0x694   : > { %v2444_v11 = vmax.f32 %v2392_v28, 0.0 }
 0x695   : > { %v2445_v40 = vmax.f32 %v2394_v9, 0.0 }
 0x696   : > { %v5580_v2 = vpack.c.bf16 %v2444_v11, %v2442_v43  ;;  %v2255_v43 = vpop.permute.xlu0 %2254 }
 0x697   : > { %v2397_v62 = vpop.f32.mrb[116].mxu1  ;;  %v5582_v34 = vpack.c.bf16 %v2445_v40, %v2443_v25 }
 0x698   : > { %5956 = vst [vmem:[#allocation30_spill] sm:$0xff] %v5580_v2  ;;  %v2399_v27 = vpop.f32.mrb[117].mxu1  ;;  %v2398_v14 = vadd.f32 %v2397_v62, %v2243_v8 }
 0x699   : > { %v2401_v21 = vpop.f32.mrb[118].mxu1  ;;  %v2400_v42 = vadd.f32 %v2399_v27, %v2243_v8  ;;  %v5590_v8 = vpop.permute.xlu1 %3688 }
 0x69a   : > { %v2403_v48 = vpop.f32.mrb[119].mxu1  ;;  %v2402_v23 = vadd.f32 %v2401_v21, %v2247_v51  ;;  %v2446_v28 = vmax.f32 %v2398_v14, 0.0  ;;  %5960 = vst [vmem:[#allocation34_spill] sm:$0xff] %v5590_v8 }
 0x69b   : > { %v2404_v29 = vadd.f32 %v2403_v48, %v2247_v51  ;;  %v2447_v54 = vmax.f32 %v2400_v42, 0.0  ;;  %v2259_v42 = vpop.permute.xlu0 %2258 }
 0x69c   : > { %v2448_v30 = vmax.f32 %v2402_v23, 0.0 }
 0x69d   : > { %v2449_v36 = vmax.f32 %v2404_v29, 0.0  ;;  %v2263_v12 = vpop.permute.xlu1 %2262 }
 0x69e   : > { %v5586_v0 = vpack.c.bf16 %v2448_v30, %v2446_v28 }
 0x69f   : > { %v2407_v9 = vpop.f32.mrb[120].mxu1  ;;  %v5588_v11 = vpack.c.bf16 %v2449_v36, %v2447_v54 }
 0x6a0   : > { %5958 = vst [vmem:[#allocation32_spill] sm:$0xff] %v5586_v0  ;;  %v2409_v25 = vpop.f32.mrb[121].mxu1  ;;  %v2408_v40 = vadd.f32 %v2407_v9, %v2251_v60 }
 0x6a1   : > { %5959 = vst [vmem:[#allocation33_spill] sm:$0xff] %v5588_v11  ;;  %v2411_v62 = vpop.f32.mrb[122].mxu1  ;;  %v2410_v2 = vadd.f32 %v2409_v25, %v2251_v60 }
 0x6a2   : > { %v2413_v21 = vpop.f32.mrb[123].mxu1  ;;  %v2412_v51 = vadd.f32 %v2411_v62, %v2255_v43  ;;  %v2450_v27 = vmax.f32 %v2408_v40, 0.0 }
 0x6a3   : > { %v2414_v48 = vadd.f32 %v2413_v21, %v2255_v43  ;;  %v2451_v14 = vmax.f32 %v2410_v2, 0.0 }
 0x6a4   : > { %v2452_v23 = vmax.f32 %v2412_v51, 0.0 }
 0x6a5   : > { %v2453_v29 = vmax.f32 %v2414_v48, 0.0 }
 0x6a6   : > { %v5592_v30 = vpack.c.bf16 %v2452_v23, %v2450_v27 }
 0x6a7   : > { %v2417_v28 = vpop.f32.mrb[124].mxu1  ;;  %v5594_v36 = vpack.c.bf16 %v2453_v29, %v2451_v14 }
 0x6a8   : > { %v2419_v54 = vpop.f32.mrb[125].mxu1  ;;  %v2418_v9 = vadd.f32 %v2417_v28, %v2259_v42 }
 0x6a9   : > { %v2421_v0 = vpop.f32.mrb[126].mxu1  ;;  %v2420_v60 = vadd.f32 %v2419_v54, %v2259_v42 }
 0x6aa   : > { %v2423_v25 = vpop.f32.mrb[127].mxu1  ;;  %v2422_v8 = vadd.f32 %v2421_v0, %v2263_v12  ;;  %v2454_v43 = vmax.f32 %v2418_v9, 0.0 }
 0x6ab   : > { %v2424_v11 = vadd.f32 %v2423_v25, %v2263_v12  ;;  %v2455_v21 = vmax.f32 %v2420_v60, 0.0 }
 0x6ac   : > { %v2456_v62 = vmax.f32 %v2422_v8, 0.0 }
 0x6ad   : > { %v2457_v40 = vmax.f32 %v2424_v11, 0.0 }
 0x6ae   : > { %v5596_v2 = vpack.c.bf16 %v2456_v62, %v2454_v43 }
 0x6af   : > { %v2685_v51 = vpop.f32.mrb[128].mxu1  ;;  %v5598_v48 = vpack.c.bf16 %v2457_v40, %v2455_v21 }
 0x6b0   : > { %v2686_v27 = vadd.f32 %v2685_v51, %v5427_v38  ;;  %v2687_v23 = vpop.f32.mrb[129].mxu1 }
 0x6b1   : > { %v2688_v14 = vadd.f32 %v2687_v23, %v5427_v38  ;;  %v2689_v29 = vpop.f32.mrb[130].mxu1 }
 0x6b2   : > { %v2690_v42 = vadd.f32 %v2689_v29, %v5372_v59  ;;  %v2691_v28 = vpop.f32.mrb[131].mxu1  ;;  %v2764_v0 = vmax.f32 %v2686_v27, 0.0 }
 0x6b3   : > { %v2692_v12 = vadd.f32 %v2691_v28, %v5372_v59  ;;  %v2765_v11 = vmax.f32 %v2688_v14, 0.0 }
 0x6b4   : > { %v2766_v8 = vmax.f32 %v2690_v42, 0.0 }
 0x6b5   : > { %v2767_v54 = vmax.f32 %v2692_v12, 0.0 }
 0x6b6   : > { %v2796_v9 = vpack.c.bf16 %v2766_v8, %v2764_v0 }
 0x6b7   : > { %v2797_v60 = vpack.c.bf16 %v2767_v54, %v2765_v11  ;;  %v2695_v25 = vpop.f32.mrb[132].mxu1 }
 0x6b8   : > { %v2696_v62 = vadd.f32 %v2695_v25, %v5382_v6  ;;  %v2697_v43 = vpop.f32.mrb[133].mxu1 }
 0x6b9   : > { %v2698_v40 = vadd.f32 %v2697_v43, %v5382_v6  ;;  %v2699_v21 = vpop.f32.mrb[134].mxu1  ;;  %2941 = vmatprep.subr.bf16.mxu0 %v2797_v60 }
 0x6ba   : > { %v2700_v38 = vadd.f32 %v2699_v21, %v5435_v16  ;;  %v2701_v51 = vpop.f32.mrb[135].mxu1  ;;  %2942 = vmatpush1.bf16.msra.mxu0 %v2796_v9  ;;  %v2768_v27 = vmax.f32 %v2696_v62, 0.0 }
 0x6bb   : > { %v2702_v59 = vadd.f32 %v2701_v51, %v5435_v16  ;;  %v2769_v14 = vmax.f32 %v2698_v40, 0.0 }
 0x6bc   : > { %v2770_v23 = vmax.f32 %v2700_v38, 0.0 }
 0x6bd   : > { %v2771_v29 = vmax.f32 %v2702_v59, 0.0 }
 0x6be   : > { %v2798_v42 = vpack.c.bf16 %v2770_v23, %v2768_v27 }
 0x6bf   : > { %v2799_v28 = vpack.c.bf16 %v2771_v29, %v2769_v14  ;;  %v2705_v12 = vpop.f32.mrb[136].mxu1 }
 0x6c0   : > { %v2706_v0 = vadd.f32 %v2705_v12, %v5394_v17  ;;  %v2707_v8 = vpop.f32.mrb[137].mxu1 }
 0x6c1   : > { %v2708_v6 = vadd.f32 %v2707_v8, %v5394_v17  ;;  %v2709_v11 = vpop.f32.mrb[138].mxu1  ;;  %2943 = vmatprep.subr.bf16.mxu0 %v2799_v28 }
 0x6c2   : > { %v2710_v54 = vadd.f32 %v2709_v11, %v5440_v26  ;;  %v2711_v60 = vpop.f32.mrb[139].mxu1  ;;  %2944 = vmatpush1.bf16.msra.mxu0 %v2798_v42  ;;  %v2772_v9 = vmax.f32 %v2706_v0, 0.0 }
 0x6c3   : > { %v2712_v16 = vadd.f32 %v2711_v60, %v5440_v26  ;;  %v2773_v62 = vmax.f32 %v2708_v6, 0.0 }
 0x6c4   : > { %v2774_v25 = vmax.f32 %v2710_v54, 0.0 }
 0x6c5   : > { %v2775_v43 = vmax.f32 %v2712_v16, 0.0 }
 0x6c6   : > { %v2800_v40 = vpack.c.bf16 %v2774_v25, %v2772_v9 }
 0x6c7   : > { %v2801_v21 = vpack.c.bf16 %v2775_v43, %v2773_v62  ;;  %v2715_v38 = vpop.f32.mrb[140].mxu1 }
 0x6c8   : > { %v2716_v51 = vadd.f32 %v2715_v38, %v5401_v18  ;;  %v2717_v59 = vpop.f32.mrb[141].mxu1 }
 0x6c9   : > { %v2718_v17 = vadd.f32 %v2717_v59, %v5401_v18  ;;  %v2719_v27 = vpop.f32.mrb[142].mxu1  ;;  %2945 = vmatprep.subr.bf16.mxu0 %v2801_v21 }
 0x6ca   : > { %v2720_v23 = vadd.f32 %v2719_v27, %v5448_v35  ;;  %v2721_v14 = vpop.f32.mrb[143].mxu1  ;;  %2946 = vmatpush1.bf16.msra.mxu0 %v2800_v40  ;;  %v2776_v29 = vmax.f32 %v2716_v51, 0.0 }
 0x6cb   : > { %v2722_v26 = vadd.f32 %v2721_v14, %v5448_v35  ;;  %v2777_v28 = vmax.f32 %v2718_v17, 0.0 }
 0x6cc   : > { %v2778_v42 = vmax.f32 %v2720_v23, 0.0 }
 0x6cd   : > { %v2779_v12 = vmax.f32 %v2722_v26, 0.0 }
 0x6ce   : > { %v2802_v0 = vpack.c.bf16 %v2778_v42, %v2776_v29 }
 0x6cf   : > { %v2803_v8 = vpack.c.bf16 %v2779_v12, %v2777_v28  ;;  %v2725_v6 = vpop.f32.mrb[144].mxu1 }
 0x6d0   : > { %v2726_v11 = vadd.f32 %v2725_v6, %v5408_v33  ;;  %v2727_v54 = vpop.f32.mrb[145].mxu1 }
 0x6d1   : > { %v2728_v18 = vadd.f32 %v2727_v54, %v5408_v33  ;;  %v2729_v60 = vpop.f32.mrb[146].mxu1  ;;  %2947 = vmatprep.subr.bf16.mxu0 %v2803_v8 }
 0x6d2   : > { %v2730_v16 = vadd.f32 %v2729_v60, %v5455_v39  ;;  %v2731_v9 = vpop.f32.mrb[147].mxu1  ;;  %2948 = vmatpush1.bf16.msra.mxu0 %v2802_v0  ;;  %v2780_v25 = vmax.f32 %v2726_v11, 0.0 }
 0x6d3   : > { %v2732_v35 = vadd.f32 %v2731_v9, %v5455_v39  ;;  %v2781_v43 = vmax.f32 %v2728_v18, 0.0 }
 0x6d4   : > { %v2782_v62 = vmax.f32 %v2730_v16, 0.0 }
 0x6d5   : > { %v2783_v40 = vmax.f32 %v2732_v35, 0.0 }
 0x6d6   : > { %v2804_v21 = vpack.c.bf16 %v2782_v62, %v2780_v25 }
 0x6d7   : > { %v2805_v38 = vpack.c.bf16 %v2783_v40, %v2781_v43  ;;  %v2735_v51 = vpop.f32.mrb[148].mxu1 }
 0x6d8   : > { %v2736_v59 = vadd.f32 %v2735_v51, %v5413_v37  ;;  %v2737_v17 = vpop.f32.mrb[149].mxu1 }
 0x6d9   : > { %v2738_v33 = vadd.f32 %v2737_v17, %v5413_v37  ;;  %v2739_v27 = vpop.f32.mrb[150].mxu1  ;;  %2949 = vmatprep.subr.bf16.mxu0 %v2805_v38 }
 0x6da   : > { %v2740_v23 = vadd.f32 %v2739_v27, %v5463_v41  ;;  %v2741_v14 = vpop.f32.mrb[151].mxu1  ;;  %2950 = vmatpush1.bf16.msra.mxu0 %v2804_v21  ;;  %v2784_v26 = vmax.f32 %v2736_v59, 0.0 }
 0x6db   : > { %v2742_v39 = vadd.f32 %v2741_v14, %v5463_v41  ;;  %v2785_v42 = vmax.f32 %v2738_v33, 0.0 }
 0x6dc   : > { %v2786_v29 = vmax.f32 %v2740_v23, 0.0 }
 0x6dd   : > { %v2787_v28 = vmax.f32 %v2742_v39, 0.0 }
 0x6de   : > { %v2806_v12 = vpack.c.bf16 %v2786_v29, %v2784_v26  ;;  %v4636_v29 = vld [vmem:[%s5897_s2 + $0x180] sm:$0xff]  }
 0x6df   : > { %v2807_v0 = vpack.c.bf16 %v2787_v28, %v2785_v42  ;;  %v2745_v8 = vpop.f32.mrb[152].mxu1  ;;  %v4637_v42 = vld [vmem:[%s5897_s2 + $0x188] sm:$0xff]   ;;  %v4639_v28 = vld [vmem:[%s5897_s2 + $0x198] sm:$0xff]  }
 0x6e0   : > { %v2746_v6 = vadd.f32 %v2745_v8, %v5419_v63  ;;  %v2747_v11 = vpop.f32.mrb[153].mxu1  ;;  %v4642_v8 = vld [vmem:[%s5897_s2 + $0x1b0] sm:$0xff]  }
 0x6e1   : > { %v2748_v37 = vadd.f32 %v2747_v11, %v5419_v63  ;;  %v2749_v54 = vpop.f32.mrb[154].mxu1  ;;  %2951 = vmatprep.subr.bf16.mxu0 %v2807_v0  ;;  %v4641_v0 = vld [vmem:[%s5897_s2 + $0x1a8] sm:$0xff]  }
 0x6e2   : > { %v2750_v18 = vadd.f32 %v2749_v54, %v5468_v44  ;;  %v2751_v60 = vpop.f32.mrb[155].mxu1  ;;  %2952 = vmatpush1.bf16.msra.mxu0 %v2806_v12  ;;  %v2788_v16 = vmax.f32 %v2746_v6, 0.0  ;;  %v4640_v12 = vld [vmem:[%s5897_s2 + $0x1a0] sm:$0xff]   ;;  %v4643_v6 = vld [vmem:[%s5897_s2 + $0x1b8] sm:$0xff]  }
 0x6e3   : > { %v2752_v41 = vadd.f32 %v2751_v60, %v5468_v44  ;;  %v2789_v35 = vmax.f32 %v2748_v37, 0.0 }
 0x6e4   : > { %v2790_v9 = vmax.f32 %v2750_v18, 0.0 }
 0x6e5   : > { %v2791_v25 = vmax.f32 %v2752_v41, 0.0 }
 0x6e6   : > { %v2808_v62 = vpack.c.bf16 %v2790_v9, %v2788_v16 }
 0x6e7   : > { %v2809_v43 = vpack.c.bf16 %v2791_v25, %v2789_v35  ;;  %v2755_v40 = vpop.f32.mrb[156].mxu1 }
 0x6e8   : > { %v2756_v21 = vadd.f32 %v2755_v40, %v5422_v15  ;;  %v2757_v38 = vpop.f32.mrb[157].mxu1 }
 0x6e9   : > { %v2758_v63 = vadd.f32 %v2757_v38, %v5422_v15  ;;  %v2759_v51 = vpop.f32.mrb[158].mxu1  ;;  %2953 = vmatprep.subr.bf16.mxu0 %v2809_v43  ;;  %v5961_v15 = vmov 0  }
 0x6ea   : > { %v2760_v59 = vadd.f32 %v2759_v51, %v5476_v45  ;;  %v2761_v17 = vpop.f32.mrb[159].mxu1  ;;  %2954 = vmatpush1.bf16.msra.mxu0 %v2808_v62  ;;  %v2792_v33 = vmax.f32 %v2756_v21, 0.0 }
 0x6eb   : > { %v2762_v44 = vadd.f32 %v2761_v17, %v5476_v45  ;;  %v2793_v23 = vmax.f32 %v2758_v63, 0.0  ;;  %v4638_v45 = vld [vmem:[%s5897_s2 + $0x190] sm:$0xff]  }
 0x6ec   : > { %v2794_v27 = vmax.f32 %v2760_v59, 0.0 }
 0x6ed   : > { %v2795_v14 = vmax.f32 %v2762_v44, 0.0 }
 0x6ee   : > { %v2810_v39 = vpack.c.bf16 %v2794_v27, %v2792_v33 }
 0x6ef   : > { %v2811_v26 = vpack.c.bf16 %v2795_v14, %v2793_v23 }
 0x6f1   : > { %2955 = vmatprep.subr.bf16.mxu0 %v2811_v26 }
 0x6f2   : > { %2956 = vmatpush1.bf16.msra.mxu0 %v2810_v39 }
 0x6f5   : > { %2974 = vmatmul.mubr.bf16.vlgmr.msra.gmra.mrb[128].mxu0 %v4636_v29 }
 0x6f6   : > { %2983 = vmatprep.mubr.bf16.mxu0 %v5961_v15 }
 0x6fd   : > { %2984 = vmatmul.mubr.bf16.gmra.mrb[132].mxu0 %v4637_v42 }
 0x6fe   : > { %2993 = vmatprep.mubr.bf16.mxu0 %v5961_v15 }
 0x705   : > { %2994 = vmatmul.mubr.bf16.gmra.mrb[136].mxu0 %v4638_v45 }
 0x706   : > { %3003 = vmatprep.mubr.bf16.mxu0 %v5961_v15 }
 0x70d   : > { %3004 = vmatmul.mubr.bf16.gmra.mrb[140].mxu0 %v4639_v28 }
 0x70e   : > { %3013 = vmatprep.mubr.bf16.mxu0 %v5961_v15 }
 0x715   : > { %3014 = vmatmul.mubr.bf16.gmra.mrb[144].mxu0 %v4640_v12 }
 0x716   : > { %3023 = vmatprep.mubr.bf16.mxu0 %v5961_v15 }
 0x71d   : > { %3024 = vmatmul.mubr.bf16.gmra.mrb[148].mxu0 %v4641_v0 }
 0x71e   : > { %3033 = vmatprep.mubr.bf16.mxu0 %v5961_v15 }
 0x725   : > { %3034 = vmatmul.mubr.bf16.gmra.mrb[152].mxu0 %v4642_v8 }
 0x726   : > { %3043 = vmatprep.mubr.bf16.mxu0 %v5961_v15 }
 0x72d   : > { %3044 = vmatmul.mubr.bf16.gmra.mrb[156].mxu0 %v4643_v6 }
 0x72e   : > { %3489 = vmatprep.mubr.bf16.mxu0 %v5961_v15 }
 0x7c8   : > { %v2975_v11 = vpop.f32.mrb[128].mxu0 }
 0x7c9   : > { %v2976_v37 = vadd.f32 %v2975_v11, %v5430_v47  ;;  %v2977_v54 = vpop.f32.mrb[129].mxu0 }
 0x7ca   : > { %v2978_v18 = vadd.f32 %v2977_v54, %v5430_v47  ;;  %v2979_v60 = vpop.f32.mrb[130].mxu0 }
 0x7cb   : > { %v2980_v41 = vadd.f32 %v2979_v60, %v5483_v49  ;;  %v2981_v16 = vpop.f32.mrb[131].mxu0  ;;  %v3054_v35 = vmax.f32 %v2976_v37, 0.0 }
 0x7cc   : > { %v2982_v9 = vadd.f32 %v2981_v16, %v5483_v49  ;;  %v3055_v62 = vmax.f32 %v2978_v18, 0.0 }
 0x7cd   : > { %v3056_v25 = vmax.f32 %v2980_v41, 0.0 }
 0x7ce   : > { %v3057_v43 = vmax.f32 %v2982_v9, 0.0 }
 0x7cf   : > { %v3086_v40 = vpack.c.bf16 %v3056_v25, %v3054_v35 }
 0x7d0   : > { %v3087_v21 = vpack.c.bf16 %v3057_v43, %v3055_v62  ;;  %v2985_v38 = vpop.f32.mrb[132].mxu0 }
 0x7d1   : > { %v2986_v63 = vadd.f32 %v2985_v38, %v5437_v20  ;;  %v2987_v51 = vpop.f32.mrb[133].mxu0 }
 0x7d2   : > { %v2988_v59 = vadd.f32 %v2987_v51, %v5437_v20  ;;  %v2989_v17 = vpop.f32.mrb[134].mxu0  ;;  %3231 = vmatprep.subr.bf16.mxu1 %v3087_v21 }
 0x7d3   : > { %v2990_v47 = vadd.f32 %v2989_v17, %v5445_v32  ;;  %v2991_v44 = vpop.f32.mrb[135].mxu0  ;;  %3232 = vmatpush1.bf16.msra.mxu1 %v3086_v40  ;;  %v3058_v33 = vmax.f32 %v2986_v63, 0.0 }
 0x7d4   : > { %v2992_v49 = vadd.f32 %v2991_v44, %v5445_v32  ;;  %v3059_v23 = vmax.f32 %v2988_v59, 0.0 }
 0x7d5   : > { %v3060_v27 = vmax.f32 %v2990_v47, 0.0 }
 0x7d6   : > { %v3061_v14 = vmax.f32 %v2992_v49, 0.0 }
 0x7d7   : > { %v3088_v39 = vpack.c.bf16 %v3060_v27, %v3058_v33 }
 0x7d8   : > { %v3089_v26 = vpack.c.bf16 %v3061_v14, %v3059_v23  ;;  %v2995_v29 = vpop.f32.mrb[136].mxu0 }
 0x7d9   : > { %v2996_v42 = vadd.f32 %v2995_v29, %v5491_v52  ;;  %v2997_v45 = vpop.f32.mrb[137].mxu0 }
 0x7da   : > { %v2998_v20 = vadd.f32 %v2997_v45, %v5491_v52  ;;  %v2999_v28 = vpop.f32.mrb[138].mxu0  ;;  %3233 = vmatprep.subr.bf16.mxu1 %v3089_v26 }
 0x7db   : > { %v3000_v12 = vadd.f32 %v2999_v28, %v5450_v3  ;;  %v3001_v0 = vpop.f32.mrb[139].mxu0  ;;  %3234 = vmatpush1.bf16.msra.mxu1 %v3088_v39  ;;  %v3062_v8 = vmax.f32 %v2996_v42, 0.0 }
 0x7dc   : > { %v3002_v32 = vadd.f32 %v3001_v0, %v5450_v3  ;;  %v3063_v11 = vmax.f32 %v2998_v20, 0.0 }
 0x7dd   : > { %v3064_v6 = vmax.f32 %v3000_v12, 0.0 }
 0x7de   : > { %v3065_v37 = vmax.f32 %v3002_v32, 0.0 }
 0x7df   : > { %v3090_v54 = vpack.c.bf16 %v3064_v6, %v3062_v8 }
 0x7e0   : > { %v3091_v18 = vpack.c.bf16 %v3065_v37, %v3063_v11  ;;  %v3005_v60 = vpop.f32.mrb[140].mxu0 }
 0x7e1   : > { %v3006_v41 = vadd.f32 %v3005_v60, %v5496_v53  ;;  %v3007_v16 = vpop.f32.mrb[141].mxu0 }
 0x7e2   : > { %v3008_v52 = vadd.f32 %v3007_v16, %v5496_v53  ;;  %v3009_v9 = vpop.f32.mrb[142].mxu0  ;;  %3235 = vmatprep.subr.bf16.mxu1 %v3091_v18 }
 0x7e3   : > { %v3010_v35 = vadd.f32 %v3009_v9, %v5458_v5  ;;  %v3011_v25 = vpop.f32.mrb[143].mxu0  ;;  %3236 = vmatpush1.bf16.msra.mxu1 %v3090_v54  ;;  %v3066_v62 = vmax.f32 %v3006_v41, 0.0 }
 0x7e4   : > { %v3012_v3 = vadd.f32 %v3011_v25, %v5458_v5  ;;  %v3067_v40 = vmax.f32 %v3008_v52, 0.0 }
 0x7e5   : > { %v3068_v43 = vmax.f32 %v3010_v35, 0.0 }
 0x7e6   : > { %v3069_v21 = vmax.f32 %v3012_v3, 0.0 }
 0x7e7   : > { %v3092_v38 = vpack.c.bf16 %v3068_v43, %v3066_v62 }
 0x7e8   : > { %v3093_v63 = vpack.c.bf16 %v3069_v21, %v3067_v40  ;;  %v3015_v51 = vpop.f32.mrb[144].mxu0 }
 0x7e9   : > { %v3016_v59 = vadd.f32 %v3015_v51, %v5503_v61  ;;  %v3017_v17 = vpop.f32.mrb[145].mxu0 }
 0x7ea   : > { %v3018_v53 = vadd.f32 %v3017_v17, %v5503_v61  ;;  %v3019_v47 = vpop.f32.mrb[146].mxu0  ;;  %3237 = vmatprep.subr.bf16.mxu1 %v3093_v63 }
 0x7eb   : > { %v3020_v44 = vadd.f32 %v3019_v47, %v5465_v4  ;;  %v3021_v49 = vpop.f32.mrb[147].mxu0  ;;  %3238 = vmatpush1.bf16.msra.mxu1 %v3092_v38  ;;  %v3070_v33 = vmax.f32 %v3016_v59, 0.0 }
 0x7ec   : > { %v3022_v5 = vadd.f32 %v3021_v49, %v5465_v4  ;;  %v3071_v23 = vmax.f32 %v3018_v53, 0.0 }
 0x7ed   : > { %v3072_v27 = vmax.f32 %v3020_v44, 0.0 }
 0x7ee   : > { %v3073_v14 = vmax.f32 %v3022_v5, 0.0 }
 0x7ef   : > { %v3094_v39 = vpack.c.bf16 %v3072_v27, %v3070_v33  ;;  %v4644_v33 = vld [vmem:[%s5897_s2 + $0x1c0] sm:$0xff]   ;;  %v4647_v27 = vld [vmem:[%s5897_s2 + $0x1d8] sm:$0xff]  }
 0x7f0   : > { %v3095_v26 = vpack.c.bf16 %v3073_v14, %v3071_v23  ;;  %v3025_v29 = vpop.f32.mrb[148].mxu0  ;;  %v4648_v23 = vld [vmem:[%s5897_s2 + $0x1e0] sm:$0xff]   ;;  %v4649_v14 = vld [vmem:[%s5897_s2 + $0x1e8] sm:$0xff]  }
 0x7f1   : > { %v3026_v42 = vadd.f32 %v3025_v29, %v5508_v57  ;;  %v3027_v45 = vpop.f32.mrb[149].mxu0 }
 0x7f2   : > { %v3028_v61 = vadd.f32 %v3027_v45, %v5508_v57  ;;  %v3029_v20 = vpop.f32.mrb[150].mxu0  ;;  %3239 = vmatprep.subr.bf16.mxu1 %v3095_v26  ;;  %v4651_v26 = vld [vmem:[%s5897_s2 + $0x1f8] sm:$0xff]  }
 0x7f3   : > { %v3030_v28 = vadd.f32 %v3029_v20, %v5473_v56  ;;  %v3031_v12 = vpop.f32.mrb[151].mxu0  ;;  %3240 = vmatpush1.bf16.msra.mxu1 %v3094_v39  ;;  %v3074_v0 = vmax.f32 %v3026_v42, 0.0  ;;  %v4650_v39 = vld [vmem:[%s5897_s2 + $0x1f0] sm:$0xff]  }
 0x7f4   : > { %v3032_v4 = vadd.f32 %v3031_v12, %v5473_v56  ;;  %v3075_v8 = vmax.f32 %v3028_v61, 0.0 }
 0x7f5   : > { %v3076_v32 = vmax.f32 %v3030_v28, 0.0 }
 0x7f6   : > { %v3077_v6 = vmax.f32 %v3032_v4, 0.0 }
 0x7f7   : > { %v3096_v11 = vpack.c.bf16 %v3076_v32, %v3074_v0 }
 0x7f8   : > { %v3097_v37 = vpack.c.bf16 %v3077_v6, %v3075_v8  ;;  %v3035_v54 = vpop.f32.mrb[152].mxu0 }
 0x7f9   : > { %v3036_v18 = vadd.f32 %v3035_v54, %v5512_v1  ;;  %v3037_v60 = vpop.f32.mrb[153].mxu0 }
 0x7fa   : > { %v3038_v57 = vadd.f32 %v3037_v60, %v5512_v1  ;;  %v3039_v41 = vpop.f32.mrb[154].mxu0  ;;  %3241 = vmatprep.subr.bf16.mxu1 %v3097_v37 }
 0x7fb   : > { %v3040_v16 = vadd.f32 %v3039_v41, %v5478_v46  ;;  %v3041_v52 = vpop.f32.mrb[155].mxu0  ;;  %3242 = vmatpush1.bf16.msra.mxu1 %v3096_v11  ;;  %v3078_v9 = vmax.f32 %v3036_v18, 0.0 }
 0x7fc   : > { %v3042_v56 = vadd.f32 %v3041_v52, %v5478_v46  ;;  %v3079_v25 = vmax.f32 %v3038_v57, 0.0 }
 0x7fd   : > { %v3080_v35 = vmax.f32 %v3040_v16, 0.0 }
 0x7fe   : > { %v3081_v3 = vmax.f32 %v3042_v56, 0.0 }
 0x7ff   : > { %v3098_v62 = vpack.c.bf16 %v3080_v35, %v3078_v9 }
 0x800   : > { %v3099_v43 = vpack.c.bf16 %v3081_v3, %v3079_v25  ;;  %v3045_v40 = vpop.f32.mrb[156].mxu0 }
 0x801   : > { %v3046_v21 = vadd.f32 %v3045_v40, %v5516_v22  ;;  %v3047_v38 = vpop.f32.mrb[157].mxu0 }
 0x802   : > { %v3048_v1 = vadd.f32 %v3047_v38, %v5516_v22  ;;  %v3049_v63 = vpop.f32.mrb[158].mxu0  ;;  %3243 = vmatprep.subr.bf16.mxu1 %v3099_v43  ;;  %v4645_v22 = vld [vmem:[%s5897_s2 + $0x1c8] sm:$0xff]  }
 0x803   : > { %v3050_v51 = vadd.f32 %v3049_v63, %v5486_v13  ;;  %v3051_v59 = vpop.f32.mrb[159].mxu0  ;;  %3244 = vmatpush1.bf16.msra.mxu1 %v3098_v62  ;;  %v3082_v17 = vmax.f32 %v3046_v21, 0.0 }
 0x804   : > { %v3052_v46 = vadd.f32 %v3051_v59, %v5486_v13  ;;  %v3083_v47 = vmax.f32 %v3048_v1, 0.0  ;;  %v4646_v13 = vld [vmem:[%s5897_s2 + $0x1d0] sm:$0xff]  }
 0x805   : > { %v3084_v53 = vmax.f32 %v3050_v51, 0.0 }
 0x806   : > { %v3085_v44 = vmax.f32 %v3052_v46, 0.0 }
 0x807   : > { %v3100_v49 = vpack.c.bf16 %v3084_v53, %v3082_v17 }
 0x808   : > { %v3101_v5 = vpack.c.bf16 %v3085_v44, %v3083_v47  ;;  %v5962_v44 = vld [vmem:[#allocation2_spill] sm:$0xff] }
 0x80a   : > { %3245 = vmatprep.subr.bf16.mxu1 %v3101_v5 }
 0x80b   : > { %3246 = vmatpush1.bf16.msra.mxu1 %v3100_v49 }
 0x80e   : > { %3264 = vmatmul.mubr.bf16.vlgmr.msra.gmra.mrb[160].mxu1 %v4644_v33 }
 0x80f   : > { %3273 = vmatprep.mubr.bf16.mxu1 %v5961_v15 }
 0x816   : > { %3274 = vmatmul.mubr.bf16.gmra.mrb[164].mxu1 %v4645_v22  ;;  %v5963_v22 = vld [vmem:[#allocation7_spill] sm:$0xff] }
 0x817   : > { %3283 = vmatprep.mubr.bf16.mxu1 %v5961_v15 }
 0x81e   : > { %3284 = vmatmul.mubr.bf16.gmra.mrb[168].mxu1 %v4646_v13 }
 0x81f   : > { %3293 = vmatprep.mubr.bf16.mxu1 %v5961_v15 }
 0x826   : > { %3294 = vmatmul.mubr.bf16.gmra.mrb[172].mxu1 %v4647_v27 }
 0x827   : > { %3303 = vmatprep.mubr.bf16.mxu1 %v5961_v15 }
 0x82e   : > { %3304 = vmatmul.mubr.bf16.gmra.mrb[176].mxu1 %v4648_v23 }
 0x82f   : > { %3313 = vmatprep.mubr.bf16.mxu1 %v5961_v15 }
 0x836   : > { %3314 = vmatmul.mubr.bf16.gmra.mrb[180].mxu1 %v4649_v14 }
 0x837   : > { %3323 = vmatprep.mubr.bf16.mxu1 %v5961_v15 }
 0x83e   : > { %3324 = vmatmul.mubr.bf16.gmra.mrb[184].mxu1 %v4650_v39 }
 0x83f   : > { %3333 = vmatprep.mubr.bf16.mxu1 %v5961_v15 }
 0x846   : > { %3334 = vmatmul.mubr.bf16.gmra.mrb[188].mxu1 %v4651_v26 }
 0x847   : > { %3779 = vmatprep.mubr.bf16.mxu1 %v5961_v15 }
 0x8e1   : > { %v3265_v29 = vpop.f32.mrb[160].mxu1 }
 0x8e2   : > { %v3266_v42 = vadd.f32 %v3265_v29, %v5520_v24  ;;  %v3267_v45 = vpop.f32.mrb[161].mxu1 }
 0x8e3   : > { %v3268_v61 = vadd.f32 %v3267_v45, %v5520_v24  ;;  %v3269_v20 = vpop.f32.mrb[162].mxu1 }
 0x8e4   : > { %v3270_v28 = vadd.f32 %v3269_v20, %v5493_v10  ;;  %v3271_v12 = vpop.f32.mrb[163].mxu1  ;;  %v3344_v0 = vmax.f32 %v3266_v42, 0.0 }
 0x8e5   : > { %v3272_v4 = vadd.f32 %v3271_v12, %v5493_v10  ;;  %v3345_v8 = vmax.f32 %v3268_v61, 0.0  ;;  %v5964_v61 = vld [vmem:[#allocation3_spill] sm:$0xff] }
 0x8e6   : > { %v3346_v32 = vmax.f32 %v3270_v28, 0.0 }
 0x8e7   : > { %v3347_v6 = vmax.f32 %v3272_v4, 0.0 }
 0x8e8   : > { %v3376_v11 = vpack.c.bf16 %v3346_v32, %v3344_v0  ;;  %v5965_v0 = vld [vmem:[#allocation9_spill] sm:$0xff] }
 0x8e9   : > { %v3377_v37 = vpack.c.bf16 %v3347_v6, %v3345_v8  ;;  %v3275_v54 = vpop.f32.mrb[164].mxu1 }
 0x8ea   : > { %v3276_v18 = vadd.f32 %v3275_v54, %v5501_v55  ;;  %v3277_v60 = vpop.f32.mrb[165].mxu1 }
 0x8eb   : > { %v3278_v57 = vadd.f32 %v3277_v60, %v5501_v55  ;;  %v3279_v41 = vpop.f32.mrb[166].mxu1  ;;  %3457 = vmatprep.subr.bf16.mxu0 %v3377_v37 }
 0x8ec   : > { %v3280_v24 = vadd.f32 %v3279_v41, %v5524_v19  ;;  %v3281_v16 = vpop.f32.mrb[167].mxu1  ;;  %3458 = vmatpush1.bf16.msra.mxu0 %v3376_v11  ;;  %v3348_v52 = vmax.f32 %v3276_v18, 0.0 }
 0x8ed   : > { %v3282_v10 = vadd.f32 %v3281_v16, %v5524_v19  ;;  %v3349_v9 = vmax.f32 %v3278_v57, 0.0 }
 0x8ee   : > { %v3350_v56 = vmax.f32 %v3280_v24, 0.0  ;;  %v5966_v24 = vld [vmem:[#allocation4_spill] sm:$0xff] }
 0x8ef   : > { %v3351_v35 = vmax.f32 %v3282_v10, 0.0 }
 0x8f0   : > { %v3378_v25 = vpack.c.bf16 %v3350_v56, %v3348_v52 }
 0x8f1   : > { %v3379_v3 = vpack.c.bf16 %v3351_v35, %v3349_v9  ;;  %v3285_v62 = vpop.f32.mrb[168].mxu1  ;;  %v5967_v9 = vld [vmem:[#allocation11_spill] sm:$0xff] }
 0x8f2   : > { %v3286_v43 = vadd.f32 %v3285_v62, %v5506_v58  ;;  %v3287_v40 = vpop.f32.mrb[169].mxu1 }
 0x8f3   : > { %v3288_v55 = vadd.f32 %v3287_v40, %v5506_v58  ;;  %v3289_v21 = vpop.f32.mrb[170].mxu1  ;;  %3459 = vmatprep.subr.bf16.mxu0 %v3379_v3 }
 0x8f4   : > { %v3290_v38 = vadd.f32 %v3289_v21, %v5528_v7  ;;  %v3291_v1 = vpop.f32.mrb[171].mxu1  ;;  %3460 = vmatpush1.bf16.msra.mxu0 %v3378_v25  ;;  %v3352_v63 = vmax.f32 %v3286_v43, 0.0 }
 0x8f5   : > { %v3292_v19 = vadd.f32 %v3291_v1, %v5528_v7  ;;  %v3353_v59 = vmax.f32 %v3288_v55, 0.0 }
 0x8f6   : > { %v3354_v51 = vmax.f32 %v3290_v38, 0.0 }
 0x8f7   : > { %v3355_v46 = vmax.f32 %v3292_v19, 0.0  ;;  %v5968_v19 = vld [vmem:[#allocation5_spill] sm:$0xff] }
 0x8f8   : > { %v3380_v17 = vpack.c.bf16 %v3354_v51, %v3352_v63 }
 0x8f9   : > { %v3381_v53 = vpack.c.bf16 %v3355_v46, %v3353_v59  ;;  %v3295_v47 = vpop.f32.mrb[172].mxu1 }
 0x8fa   : > { %v3296_v49 = vadd.f32 %v3295_v47, %v5962_v44  ;;  %v3297_v5 = vpop.f32.mrb[173].mxu1 }
 0x8fb   : > { %v3298_v58 = vadd.f32 %v3297_v5, %v5962_v44  ;;  %v3299_v33 = vpop.f32.mrb[174].mxu1  ;;  %3461 = vmatprep.subr.bf16.mxu0 %v3381_v53 }
 0x8fc   : > { %v3300_v13 = vadd.f32 %v3299_v33, %v5963_v22  ;;  %v3301_v27 = vpop.f32.mrb[175].mxu1  ;;  %3462 = vmatpush1.bf16.msra.mxu0 %v3380_v17  ;;  %v3356_v23 = vmax.f32 %v3296_v49, 0.0  ;;  %v5969_v17 = vld [vmem:[#allocation12_spill] sm:$0xff] }
 0x8fd   : > { %v3302_v7 = vadd.f32 %v3301_v27, %v5963_v22  ;;  %v3357_v39 = vmax.f32 %v3298_v58, 0.0 }
 0x8fe   : > { %v3358_v14 = vmax.f32 %v3300_v13, 0.0 }
 0x8ff   : > { %v3359_v26 = vmax.f32 %v3302_v7, 0.0  ;;  %v5970_v7 = vld [vmem:[#allocation6_spill] sm:$0xff] }
 0x900   : > { %v3382_v29 = vpack.c.bf16 %v3358_v14, %v3356_v23 }
 0x901   : > { %v3383_v42 = vpack.c.bf16 %v3359_v26, %v3357_v39  ;;  %v3305_v45 = vpop.f32.mrb[176].mxu1 }
 0x902   : > { %v3306_v20 = vadd.f32 %v3305_v45, %v5964_v61  ;;  %v3307_v28 = vpop.f32.mrb[177].mxu1 }
 0x903   : > { %v3308_v12 = vadd.f32 %v3307_v28, %v5964_v61  ;;  %v3309_v4 = vpop.f32.mrb[178].mxu1  ;;  %3463 = vmatprep.subr.bf16.mxu0 %v3383_v42 }
 0x904   : > { %v3310_v32 = vadd.f32 %v3309_v4, %v5965_v0  ;;  %v3311_v8 = vpop.f32.mrb[179].mxu1  ;;  %3464 = vmatpush1.bf16.msra.mxu0 %v3382_v29  ;;  %v3360_v11 = vmax.f32 %v3306_v20, 0.0  ;;  %v5971_v29 = vld [vmem:[#allocation14_spill] sm:$0xff] }
 0x905   : > { %v3312_v6 = vadd.f32 %v3311_v8, %v5965_v0  ;;  %v3361_v54 = vmax.f32 %v3308_v12, 0.0  ;;  %v4652_v8 = vld [vmem:[%s5897_s2 + $0x200] sm:$0xff]  }
 0x906   : > { %v3362_v37 = vmax.f32 %v3310_v32, 0.0 }
 0x907   : > { %v3363_v18 = vmax.f32 %v3312_v6, 0.0  ;;  %v5972_v6 = vld [vmem:[#allocation21_spill] sm:$0xff] }
 0x908   : > { %v3384_v60 = vpack.c.bf16 %v3362_v37, %v3360_v11  ;;  %v4653_v11 = vld [vmem:[%s5897_s2 + $0x208] sm:$0xff]  }
 0x909   : > { %v3385_v57 = vpack.c.bf16 %v3363_v18, %v3361_v54  ;;  %v3315_v41 = vpop.f32.mrb[180].mxu1  ;;  %v5973_v37 = vld [vmem:[#allocation23_spill] sm:$0xff]  ;;  %v5974_v54 = vld [vmem:[#allocation26_spill] sm:$0xff]  ;;  %v5975_v18 = vld [vmem:[#allocation25_spill] sm:$0xff] }
 0x90a   : > { %v3316_v16 = vadd.f32 %v3315_v41, %v5966_v24  ;;  %v3317_v10 = vpop.f32.mrb[181].mxu1  ;;  %v5979_v41 = vld [vmem:[#allocation33_spill] sm:$0xff] }
 0x90b   : > { %v3318_v52 = vadd.f32 %v3317_v10, %v5966_v24  ;;  %v3319_v56 = vpop.f32.mrb[182].mxu1  ;;  %3465 = vmatprep.subr.bf16.mxu0 %v3385_v57  ;;  %v5978_v57 = vld [vmem:[#allocation30_spill] sm:$0xff]  ;;  %v4655_v24 = vld [vmem:[%s5897_s2 + $0x218] sm:$0xff]  }
 0x90c   : > { %v3320_v35 = vadd.f32 %v3319_v56, %v5967_v9  ;;  %v3321_v25 = vpop.f32.mrb[183].mxu1  ;;  %3466 = vmatpush1.bf16.msra.mxu0 %v3384_v60  ;;  %v3364_v62 = vmax.f32 %v3316_v16, 0.0  ;;  %v4654_v60 = vld [vmem:[%s5897_s2 + $0x210] sm:$0xff]  }
 0x90d   : > { %v3322_v3 = vadd.f32 %v3321_v25, %v5967_v9  ;;  %v3365_v40 = vmax.f32 %v3318_v52, 0.0  ;;  %v5980_v16 = vld [vmem:[#allocation32_spill] sm:$0xff] }
 0x90e   : > { %v3366_v43 = vmax.f32 %v3320_v35, 0.0 }
 0x90f   : > { %v3367_v55 = vmax.f32 %v3322_v3, 0.0 }
 0x910   : > { %v3386_v21 = vpack.c.bf16 %v3366_v43, %v3364_v62 }
 0x911   : > { %v3387_v38 = vpack.c.bf16 %v3367_v55, %v3365_v40  ;;  %v3325_v1 = vpop.f32.mrb[184].mxu1 }
 0x912   : > { %v3326_v63 = vadd.f32 %v3325_v1, %v5968_v19  ;;  %v3327_v51 = vpop.f32.mrb[185].mxu1 }
 0x913   : > { %v3328_v59 = vadd.f32 %v3327_v51, %v5968_v19  ;;  %v3329_v46 = vpop.f32.mrb[186].mxu1  ;;  %3467 = vmatprep.subr.bf16.mxu0 %v3387_v38 }
 0x914   : > { %v3330_v53 = vadd.f32 %v3329_v46, %v5969_v17  ;;  %v3331_v47 = vpop.f32.mrb[187].mxu1  ;;  %3468 = vmatpush1.bf16.msra.mxu0 %v3386_v21  ;;  %v3368_v49 = vmax.f32 %v3326_v63, 0.0 }
 0x915   : > { %v3332_v44 = vadd.f32 %v3331_v47, %v5969_v17  ;;  %v3369_v58 = vmax.f32 %v3328_v59, 0.0 }
 0x916   : > { %v3370_v5 = vmax.f32 %v3330_v53, 0.0 }
 0x917   : > { %v3371_v33 = vmax.f32 %v3332_v44, 0.0 }
 0x918   : > { %v3388_v22 = vpack.c.bf16 %v3370_v5, %v3368_v49 }
 0x919   : > { %v3389_v13 = vpack.c.bf16 %v3371_v33, %v3369_v58  ;;  %v3335_v27 = vpop.f32.mrb[188].mxu1 }
 0x91a   : > { %v3336_v23 = vadd.f32 %v3335_v27, %v5970_v7  ;;  %v3337_v14 = vpop.f32.mrb[189].mxu1 }
 0x91b   : > { %v3338_v39 = vadd.f32 %v3337_v14, %v5970_v7  ;;  %v3339_v26 = vpop.f32.mrb[190].mxu1  ;;  %3469 = vmatprep.subr.bf16.mxu0 %v3389_v13 }
 0x91c   : > { %v3340_v42 = vadd.f32 %v3339_v26, %v5971_v29  ;;  %v3341_v45 = vpop.f32.mrb[191].mxu1  ;;  %3470 = vmatpush1.bf16.msra.mxu0 %v3388_v22  ;;  %v3372_v20 = vmax.f32 %v3336_v23, 0.0 }
 0x91d   : > { %v3342_v61 = vadd.f32 %v3341_v45, %v5971_v29  ;;  %v3373_v12 = vmax.f32 %v3338_v39, 0.0 }
 0x91e   : > { %v3374_v28 = vmax.f32 %v3340_v42, 0.0 }
 0x91f   : > { %v3375_v4 = vmax.f32 %v3342_v61, 0.0 }
 0x920   : > { %v3390_v0 = vpack.c.bf16 %v3374_v28, %v3372_v20 }
 0x921   : > { %v3391_v32 = vpack.c.bf16 %v3375_v4, %v3373_v12 }
 0x923   : > { %3471 = vmatprep.subr.bf16.mxu0 %v3391_v32 }
 0x924   : > { %3472 = vmatpush1.bf16.msra.mxu0 %v3390_v0 }
 0x925   : > { %3915 = vmatprep.subr.bf16.mxu0 %v5560_v31  ;;  %v5976_v31 = vld [vmem:[#allocation29_spill] sm:$0xff] }
 0x927   : > { %3490 = vmatmul.mubr.bf16.vlgmr.msra.gmra.mrb[96].mxu0 %v4652_v8 }
 0x928   : > { %3916 = vmatpush1.bf16.msra.mxu0 %v5972_v6  ;;  %3499 = vmatprep.mubr.bf16.mxu0 %v5961_v15 }
 0x929   : > { %3917 = vmatprep.subr.bf16.mxu0 %v5566_v50  ;;  %v5977_v50 = vld [vmem:[#allocation27_spill] sm:$0xff] }
 0x92c   : > { %3918 = vmatpush1.bf16.msra.mxu0 %v5973_v37 }
 0x92d   : > { %3919 = vmatprep.subr.bf16.mxu0 %v5974_v54 }
 0x92f   : > { %3500 = vmatmul.mubr.bf16.gmra.mrb[100].mxu0 %v4653_v11 }
 0x930   : > { %3920 = vmatpush1.bf16.msra.mxu0 %v5975_v18  ;;  %3509 = vmatprep.mubr.bf16.mxu0 %v5961_v15 }
 0x931   : > { %3921 = vmatprep.subr.bf16.mxu0 %v5976_v31 }
 0x934   : > { %3922 = vmatpush1.bf16.msra.mxu0 %v5977_v50 }
 0x935   : > { %3923 = vmatprep.subr.bf16.mxu0 %v5582_v34  ;;  %v4656_v34 = vld [vmem:[%s5897_s2 + $0x220] sm:$0xff]  }
 0x937   : > { %3510 = vmatmul.mubr.bf16.gmra.mrb[104].mxu0 %v4654_v60 }
 0x938   : > { %3924 = vmatpush1.bf16.msra.mxu0 %v5978_v57  ;;  %3519 = vmatprep.mubr.bf16.mxu0 %v5961_v15 }
 0x939   : > { %3925 = vmatprep.subr.bf16.mxu0 %v5979_v41 }
 0x93c   : > { %3926 = vmatpush1.bf16.msra.mxu0 %v5980_v16 }
 0x93d   : > { %3927 = vmatprep.subr.bf16.mxu0 %v5594_v36  ;;  %v4657_v36 = vld [vmem:[%s5897_s2 + $0x228] sm:$0xff]  }
 0x93f   : > { %3520 = vmatmul.mubr.bf16.gmra.mrb[108].mxu0 %v4655_v24 }
 0x940   : > { %3928 = vmatpush1.bf16.msra.mxu0 %v5592_v30  ;;  %3529 = vmatprep.mubr.bf16.mxu0 %v5961_v15  ;;  %v4658_v30 = vld [vmem:[%s5897_s2 + $0x230] sm:$0xff]  }
 0x941   : > { %3929 = vmatprep.subr.bf16.mxu0 %v5598_v48 }
 0x944   : > { %3930 = vmatpush1.bf16.msra.mxu0 %v5596_v2  ;;  %v4659_v2 = vld [vmem:[%s5897_s2 + $0x238] sm:$0xff]  }
 0x947   : > { %3530 = vmatmul.mubr.bf16.gmra.mrb[112].mxu0 %v4656_v34 }
 0x948   : > { %3539 = vmatprep.mubr.bf16.mxu0 %v5961_v15 }
 0x94f   : > { %3540 = vmatmul.mubr.bf16.gmra.mrb[116].mxu0 %v4657_v36 }
 0x950   : > { %3549 = vmatprep.mubr.bf16.mxu0 %v5961_v15 }
 0x957   : > { %3550 = vmatmul.mubr.bf16.gmra.mrb[120].mxu0 %v4658_v30 }
 0x958   : > { %3559 = vmatprep.mubr.bf16.mxu0 %v5961_v15 }
 0x95f   : > { %3560 = vmatmul.mubr.bf16.gmra.mrb[124].mxu0 %v4659_v2 }
 0x960   : > { %3947 = vmatprep.mubr.bf16.mxu0 %v5961_v15 }
 0x9fa   : > { %v3491_v48 = vpop.f32.mrb[96].mxu0 }
 0x9fb   : > { %v3493_v10 = vpop.f32.mrb[97].mxu0  ;;  %v3570_v56 = vmax.f32 %v3491_v48, 0.0 }
 0x9fc   : > { %v3495_v52 = vpop.f32.mrb[98].mxu0  ;;  %v3571_v25 = vmax.f32 %v3493_v10, 0.0 }
 0x9fd   : > { %v3572_v9 = vmax.f32 %v3495_v52, 0.0  ;;  %v3497_v35 = vpop.f32.mrb[99].mxu0 }
 0x9fe   : > { %v3573_v3 = vmax.f32 %v3497_v35, 0.0 }
 0x9ff   : > { %v3602_v62 = vpack.c.bf16 %v3572_v9, %v3570_v56 }
 0xa00   : > { %v3603_v43 = vpack.c.bf16 %v3573_v3, %v3571_v25 }
 0xa02   : > { %v3501_v40 = vpop.f32.mrb[100].mxu0  ;;  %3747 = vmatprep.subr.bf16.mxu1 %v3603_v43 }
 0xa03   : > { %v3503_v55 = vpop.f32.mrb[101].mxu0  ;;  %3748 = vmatpush1.bf16.msra.mxu1 %v3602_v62  ;;  %v3574_v38 = vmax.f32 %v3501_v40, 0.0 }
 0xa04   : > { %v3505_v21 = vpop.f32.mrb[102].mxu0  ;;  %v3575_v63 = vmax.f32 %v3503_v55, 0.0 }
 0xa05   : > { %v3576_v1 = vmax.f32 %v3505_v21, 0.0  ;;  %v3507_v19 = vpop.f32.mrb[103].mxu0 }
 0xa06   : > { %v3577_v51 = vmax.f32 %v3507_v19, 0.0 }
 0xa07   : > { %v3604_v59 = vpack.c.bf16 %v3576_v1, %v3574_v38 }
 0xa08   : > { %v3605_v46 = vpack.c.bf16 %v3577_v51, %v3575_v63  ;;  %v4660_v51 = vld [vmem:[%s5897_s2 + $0x240] sm:$0xff]  }
 0xa0a   : > { %v3511_v17 = vpop.f32.mrb[104].mxu0  ;;  %3749 = vmatprep.subr.bf16.mxu1 %v3605_v46  ;;  %v4662_v46 = vld [vmem:[%s5897_s2 + $0x250] sm:$0xff]  }
 0xa0b   : > { %v3513_v53 = vpop.f32.mrb[105].mxu0  ;;  %3750 = vmatpush1.bf16.msra.mxu1 %v3604_v59  ;;  %v3578_v44 = vmax.f32 %v3511_v17, 0.0  ;;  %v4661_v59 = vld [vmem:[%s5897_s2 + $0x248] sm:$0xff]   ;;  %v4663_v17 = vld [vmem:[%s5897_s2 + $0x258] sm:$0xff]  }
 0xa0c   : > { %v3515_v47 = vpop.f32.mrb[106].mxu0  ;;  %v3579_v58 = vmax.f32 %v3513_v53, 0.0  ;;  %v4664_v53 = vld [vmem:[%s5897_s2 + $0x260] sm:$0xff]  }
 0xa0d   : > { %v3580_v49 = vmax.f32 %v3515_v47, 0.0  ;;  %v3517_v5 = vpop.f32.mrb[107].mxu0  ;;  %v4665_v47 = vld [vmem:[%s5897_s2 + $0x268] sm:$0xff]  }
 0xa0e   : > { %v3581_v33 = vmax.f32 %v3517_v5, 0.0  ;;  %v3908_v5 = vld [vmem:[%s5899_s4] sm:$0xf] }
 0xa0f   : > { %v3606_v22 = vpack.c.bf16 %v3580_v49, %v3578_v44  ;;  %v4666_v44 = vld [vmem:[%s5897_s2 + $0x270] sm:$0xff]   ;;  %v4667_v49 = vld [vmem:[%s5897_s2 + $0x278] sm:$0xff]   ;;  %3948 = vmatmul.mubr.bf16.vlgmr.msra.gmra.mrb[160].mxu0 %v3908_v5 }
 0xa10   : > { %v3607_v13 = vpack.c.bf16 %v3581_v33, %v3579_v58  ;;  %v3909_v58 = vld [vmem:[%s5900_s5] sm:$0xff]  ;;  %v4421_v33 = vld [vmem:[%s5900_s5 + $0x8] sm:$0xff] }
 0xa11   : > { %3912 = vperm.xlu1 %4554, %v3909_v58   ;;  %3962 = vperm.xlu0 %4555, %v4421_v33  }
 0xa12   : > { %v3521_v27 = vpop.f32.mrb[108].mxu0  ;;  %3751 = vmatprep.subr.bf16.mxu1 %v3607_v13  ;;  %v5981_v13 = vld [vmem:[#allocation8_spill] sm:$0xff] }
 0xa13   : > { %v3523_v7 = vpop.f32.mrb[109].mxu0  ;;  %3752 = vmatpush1.bf16.msra.mxu1 %v3606_v22  ;;  %v3582_v14 = vmax.f32 %v3521_v27, 0.0 }
 0xa14   : > { %v3525_v23 = vpop.f32.mrb[110].mxu0  ;;  %v3583_v29 = vmax.f32 %v3523_v7, 0.0 }
 0xa15   : > { %v3584_v39 = vmax.f32 %v3525_v23, 0.0  ;;  %v3527_v26 = vpop.f32.mrb[111].mxu0 }
 0xa16   : > { %v3585_v42 = vmax.f32 %v3527_v26, 0.0 }
 0xa17   : > { %v3608_v45 = vpack.c.bf16 %v3584_v39, %v3582_v14  ;;  %v5982_v14 = vld [vmem:[#allocation10_spill] sm:$0xff] }
 0xa18   : > { %v3609_v61 = vpack.c.bf16 %v3585_v42, %v3583_v29 }
 0xa1a   : > { %v3531_v20 = vpop.f32.mrb[112].mxu0  ;;  %3753 = vmatprep.subr.bf16.mxu1 %v3609_v61 }
 0xa1b   : > { %v3533_v28 = vpop.f32.mrb[113].mxu0  ;;  %3754 = vmatpush1.bf16.msra.mxu1 %v3608_v45  ;;  %v3586_v4 = vmax.f32 %v3531_v20, 0.0 }
 0xa1c   : > { %v3535_v12 = vpop.f32.mrb[114].mxu0  ;;  %v3587_v8 = vmax.f32 %v3533_v28, 0.0 }
 0xa1d   : > { %v3588_v0 = vmax.f32 %v3535_v12, 0.0  ;;  %v3537_v32 = vpop.f32.mrb[115].mxu0 }
 0xa1e   : > { %v3589_v6 = vmax.f32 %v3537_v32, 0.0 }
 0xa1f   : > { %v3610_v11 = vpack.c.bf16 %v3588_v0, %v3586_v4  ;;  %v5983_v0 = vld [vmem:[#allocation15_spill] sm:$0xff] }
 0xa20   : > { %v3611_v37 = vpack.c.bf16 %v3589_v6, %v3587_v8 }
 0xa22   : > { %v3541_v54 = vpop.f32.mrb[116].mxu0  ;;  %3755 = vmatprep.subr.bf16.mxu1 %v3611_v37  ;;  %v5984_v37 = vld [vmem:[#allocation13_spill] sm:$0xff] }
 0xa23   : > { %v3543_v18 = vpop.f32.mrb[117].mxu0  ;;  %3756 = vmatpush1.bf16.msra.mxu1 %v3610_v11  ;;  %v3590_v60 = vmax.f32 %v3541_v54, 0.0 }
 0xa24   : > { %v3545_v31 = vpop.f32.mrb[118].mxu0  ;;  %v3591_v41 = vmax.f32 %v3543_v18, 0.0 }
 0xa25   : > { %v3592_v50 = vmax.f32 %v3545_v31, 0.0  ;;  %v3547_v57 = vpop.f32.mrb[119].mxu0 }
 0xa26   : > { %v3593_v24 = vmax.f32 %v3547_v57, 0.0 }
 0xa27   : > { %v3612_v16 = vpack.c.bf16 %v3592_v50, %v3590_v60 }
 0xa28   : > { %v3613_v34 = vpack.c.bf16 %v3593_v24, %v3591_v41 }
 0xa2a   : > { %v3551_v36 = vpop.f32.mrb[120].mxu0  ;;  %3757 = vmatprep.subr.bf16.mxu1 %v3613_v34 }
 0xa2b   : > { %v3553_v30 = vpop.f32.mrb[121].mxu0  ;;  %3758 = vmatpush1.bf16.msra.mxu1 %v3612_v16  ;;  %v3594_v48 = vmax.f32 %v3551_v36, 0.0  ;;  %v5985_v36 = vld [vmem:[#allocation16_spill] sm:$0xff] }
 0xa2c   : > { %v3555_v2 = vpop.f32.mrb[122].mxu0  ;;  %v3595_v56 = vmax.f32 %v3553_v30, 0.0 }
 0xa2d   : > { %v3596_v10 = vmax.f32 %v3555_v2, 0.0  ;;  %v3557_v52 = vpop.f32.mrb[123].mxu0 }
 0xa2e   : > { %v3597_v9 = vmax.f32 %v3557_v52, 0.0  ;;  %v5986_v52 = vld [vmem:[#allocation18_spill] sm:$0xff] }
 0xa2f   : > { %v3614_v35 = vpack.c.bf16 %v3596_v10, %v3594_v48 }
 0xa30   : > { %v3615_v25 = vpack.c.bf16 %v3597_v9, %v3595_v56 }
 0xa32   : > { %v3561_v3 = vpop.f32.mrb[124].mxu0  ;;  %3759 = vmatprep.subr.bf16.mxu1 %v3615_v25 }
 0xa33   : > { %v3563_v62 = vpop.f32.mrb[125].mxu0  ;;  %3760 = vmatpush1.bf16.msra.mxu1 %v3614_v35  ;;  %v3598_v40 = vmax.f32 %v3561_v3, 0.0 }
 0xa34   : > { %v3565_v43 = vpop.f32.mrb[126].mxu0  ;;  %v3599_v38 = vmax.f32 %v3563_v62, 0.0 }
 0xa35   : > { %v3600_v55 = vmax.f32 %v3565_v43, 0.0  ;;  %v3567_v21 = vpop.f32.mrb[127].mxu0 }
 0xa36   : > { %v3601_v1 = vmax.f32 %v3567_v21, 0.0 }
 0xa37   : > { %v3616_v19 = vpack.c.bf16 %v3600_v55, %v3598_v40 }
 0xa38   : > { %v3617_v63 = vpack.c.bf16 %v3601_v1, %v3599_v38  ;;  %v5987_v38 = vld [vmem:[#allocation17_spill] sm:$0xff] }
 0xa3a   : > { %3761 = vmatprep.subr.bf16.mxu1 %v3617_v63 }
 0xa3b   : > { %3762 = vmatpush1.bf16.msra.mxu1 %v3616_v19 }
 0xa3e   : > { %3780 = vmatmul.mubr.bf16.vlgmr.msra.gmra.mrb[192].mxu1 %v4660_v51 }
 0xa3f   : > { %3789 = vmatprep.mubr.bf16.mxu1 %v5961_v15 }
 0xa46   : > { %3790 = vmatmul.mubr.bf16.gmra.mrb[196].mxu1 %v4661_v59  ;;  %v5988_v59 = vld [vmem:[#allocation20_spill] sm:$0xff] }
 0xa47   : > { %3799 = vmatprep.mubr.bf16.mxu1 %v5961_v15 }
 0xa4e   : > { %3800 = vmatmul.mubr.bf16.gmra.mrb[200].mxu1 %v4662_v46 }
 0xa4f   : > { %3809 = vmatprep.mubr.bf16.mxu1 %v5961_v15 }
 0xa56   : > { %3810 = vmatmul.mubr.bf16.gmra.mrb[204].mxu1 %v4663_v17 }
 0xa57   : > { %3819 = vmatprep.mubr.bf16.mxu1 %v5961_v15 }
 0xa5e   : > { %3820 = vmatmul.mubr.bf16.gmra.mrb[208].mxu1 %v4664_v53 }
 0xa5f   : > { %3829 = vmatprep.mubr.bf16.mxu1 %v5961_v15 }
 0xa66   : > { %3830 = vmatmul.mubr.bf16.gmra.mrb[212].mxu1 %v4665_v47 }
 0xa67   : > { %3839 = vmatprep.mubr.bf16.mxu1 %v5961_v15 }
 0xa6e   : > { %3840 = vmatmul.mubr.bf16.gmra.mrb[216].mxu1 %v4666_v44 }
 0xa6f   : > { %3849 = vmatprep.mubr.bf16.mxu1 %v5961_v15 }
 0xa76   : > { %3850 = vmatmul.mubr.bf16.gmra.mrb[220].mxu1 %v4667_v49 }
 0xa77   : > { %3997 = vmatprep.mubr.bf16.mxu1 %v5961_v15 }
 0xb11   : > { %v3781_v22 = vpop.f32.mrb[192].mxu1 }
 0xb12   : > { %v3782_v27 = vadd.f32 %v3781_v22, %v5981_v13  ;;  %v3783_v7 = vpop.f32.mrb[193].mxu1 }
 0xb13   : > { %v3784_v15 = vadd.f32 %v3783_v7, %v5981_v13  ;;  %v3785_v23 = vpop.f32.mrb[194].mxu1  ;;  %v5989_v13 = vld [vmem:[#allocation22_spill] sm:$0xff] }
 0xb14   : > { %v3786_v39 = vadd.f32 %v3785_v23, %v5982_v14  ;;  %v3787_v26 = vpop.f32.mrb[195].mxu1  ;;  %v3860_v42 = vmax.f32 %v3782_v27, 0.0 }
 0xb15   : > { %v3788_v29 = vadd.f32 %v3787_v26, %v5982_v14  ;;  %v3861_v61 = vmax.f32 %v3784_v15, 0.0  ;;  %v5990_v14 = vld [vmem:[#allocation24_spill] sm:$0xff] }
 0xb16   : > { %v3862_v45 = vmax.f32 %v3786_v39, 0.0 }
 0xb17   : > { %v3863_v20 = vmax.f32 %v3788_v29, 0.0 }
 0xb18   : > { %v3892_v28 = vpack.c.bf16 %v3862_v45, %v3860_v42 }
 0xb19   : > { %v3893_v12 = vpack.c.bf16 %v3863_v20, %v3861_v61  ;;  %v3791_v4 = vpop.f32.mrb[196].mxu1 }
 0xb1a   : > { %v3792_v32 = vadd.f32 %v3791_v4, %v5983_v0  ;;  %v3793_v8 = vpop.f32.mrb[197].mxu1 }
 0xb1b   : > { %v3794_v6 = vadd.f32 %v3793_v8, %v5983_v0  ;;  %v3795_v11 = vpop.f32.mrb[198].mxu1  ;;  %3965 = vmatprep.subr.bf16.mxu1 %v3893_v12  ;;  %v5991_v0 = vld [vmem:[#allocation19_spill] sm:$0xff] }
 0xb1c   : > { %v3796_v54 = vadd.f32 %v3795_v11, %v5984_v37  ;;  %v3797_v18 = vpop.f32.mrb[199].mxu1  ;;  %3966 = vmatpush1.bf16.msra.mxu1 %v3892_v28  ;;  %v3864_v60 = vmax.f32 %v3792_v32, 0.0 }
 0xb1d   : > { %v3798_v31 = vadd.f32 %v3797_v18, %v5984_v37  ;;  %v3865_v57 = vmax.f32 %v3794_v6, 0.0  ;;  %v5992_v37 = vld [vmem:[#allocation28_spill] sm:$0xff] }
 0xb1e   : > { %v3866_v50 = vmax.f32 %v3796_v54, 0.0 }
 0xb1f   : > { %v3867_v41 = vmax.f32 %v3798_v31, 0.0 }
 0xb20   : > { %v3894_v24 = vpack.c.bf16 %v3866_v50, %v3864_v60 }
 0xb21   : > { %v3895_v16 = vpack.c.bf16 %v3867_v41, %v3865_v57  ;;  %v3801_v34 = vpop.f32.mrb[200].mxu1 }
 0xb22   : > { %v3802_v30 = vadd.f32 %v3801_v34, %v5985_v36  ;;  %v3803_v2 = vpop.f32.mrb[201].mxu1 }
 0xb23   : > { %v3804_v48 = vadd.f32 %v3803_v2, %v5985_v36  ;;  %v3805_v10 = vpop.f32.mrb[202].mxu1  ;;  %3967 = vmatprep.subr.bf16.mxu1 %v3895_v16  ;;  %v5993_v36 = vld [vmem:[#allocation31_spill] sm:$0xff] }
 0xb24   : > { %v3806_v56 = vadd.f32 %v3805_v10, %v5986_v52  ;;  %v3807_v9 = vpop.f32.mrb[203].mxu1  ;;  %3968 = vmatpush1.bf16.msra.mxu1 %v3894_v24  ;;  %v3868_v25 = vmax.f32 %v3802_v30, 0.0 }
 0xb25   : > { %v3808_v35 = vadd.f32 %v3807_v9, %v5986_v52  ;;  %v3869_v62 = vmax.f32 %v3804_v48, 0.0  ;;  %v5994_v52 = vld [vmem:[#allocation34_spill] sm:$0xff] }
 0xb26   : > { %v3870_v3 = vmax.f32 %v3806_v56, 0.0 }
 0xb27   : > { %v3871_v43 = vmax.f32 %v3808_v35, 0.0 }
 0xb28   : > { %v3896_v40 = vpack.c.bf16 %v3870_v3, %v3868_v25 }
 0xb29   : > { %v3897_v55 = vpack.c.bf16 %v3871_v43, %v3869_v62  ;;  %v3811_v21 = vpop.f32.mrb[204].mxu1 }
 0xb2a   : > { %v3812_v1 = vadd.f32 %v3811_v21, %v5987_v38  ;;  %v3813_v19 = vpop.f32.mrb[205].mxu1 }
 0xb2b   : > { %v3814_v63 = vadd.f32 %v3813_v19, %v5987_v38  ;;  %v3815_v51 = vpop.f32.mrb[206].mxu1  ;;  %3969 = vmatprep.subr.bf16.mxu1 %v3897_v55 }
 0xb2c   : > { %v3816_v46 = vadd.f32 %v3815_v51, %v5988_v59  ;;  %v3817_v17 = vpop.f32.mrb[207].mxu1  ;;  %3970 = vmatpush1.bf16.msra.mxu1 %v3896_v40  ;;  %v3872_v47 = vmax.f32 %v3812_v1, 0.0  ;;  %v3693_v40 = vpop.permute.xlu0 %3692 }
 0xb2d   : > { %v3818_v53 = vadd.f32 %v3817_v17, %v5988_v59  ;;  %v3873_v49 = vmax.f32 %v3814_v63, 0.0  ;;  %v3697_v1 = vpop.permute.xlu1 %3696 }
 0xb2e   : > { %v3874_v44 = vmax.f32 %v3816_v46, 0.0 }
 0xb2f   : > { %v3875_v5 = vmax.f32 %v3818_v53, 0.0 }
 0xb30   : > { %v3898_v58 = vpack.c.bf16 %v3874_v44, %v3872_v47 }
 0xb31   : > { %v3899_v33 = vpack.c.bf16 %v3875_v5, %v3873_v49  ;;  %v3821_v22 = vpop.f32.mrb[208].mxu1 }
 0xb32   : > { %v3822_v27 = vadd.f32 %v3821_v22, %v5989_v13  ;;  %v3823_v7 = vpop.f32.mrb[209].mxu1  ;;  %v4420_v22 = vld [vmem:[%s5899_s4 + $0x4] sm:$0xf] }
 0xb33   : > { %v3824_v15 = vadd.f32 %v3823_v7, %v5989_v13  ;;  %v3825_v23 = vpop.f32.mrb[210].mxu1  ;;  %3971 = vmatprep.subr.bf16.mxu1 %v3899_v33  ;;  %v3949_v13 = vpop.f32.mrb[160].mxu0 }
 0xb34   : > { %v3826_v39 = vadd.f32 %v3825_v23, %v5990_v14  ;;  %v3827_v26 = vpop.f32.mrb[211].mxu1  ;;  %3972 = vmatpush1.bf16.msra.mxu1 %v3898_v58  ;;  %v3876_v42 = vmax.f32 %v3822_v27, 0.0  ;;  %v3951_v27 = vpop.f32.mrb[161].mxu0 }
 0xb35   : > { %v3828_v29 = vadd.f32 %v3827_v26, %v5990_v14  ;;  %v3877_v61 = vmax.f32 %v3824_v15, 0.0  ;;  %v3953_v7 = vpop.f32.mrb[162].mxu0  ;;  %v3913_v23 = vpop.permute.xlu1 %3912 }
 0xb36   : > { %v3878_v45 = vmax.f32 %v3826_v39, 0.0  ;;  %v3954_v15 = vpop.f32.mrb[163].mxu0  ;;  %v3950_v14 = vadd.f32 %v3949_v13, %v3913_v23  ;;  %v3952_v39 = vadd.f32 %v3951_v27, %v3913_v23  ;;  %v3963_v26 = vpop.permute.xlu0 %3962 }
 0xb37   : > { %v3879_v20 = vmax.f32 %v3828_v29, 0.0 }
 0xb38   : > { %v3900_v28 = vpack.c.bf16 %v3878_v45, %v3876_v42  ;;  %v4684_v45 = vld [vmem:[%s4787_s8] sm:$0xff] }
 0xb39   : > { %v3901_v12 = vpack.c.bf16 %v3879_v20, %v3877_v61  ;;  %v3831_v4 = vpop.f32.mrb[212].mxu1  ;;  %v4006_v61 = vadd.f32 %v4684_v45, %v3950_v14 }
 0xb3a   : > { %v3832_v32 = vadd.f32 %v3831_v4, %v5991_v0  ;;  %v3833_v8 = vpop.f32.mrb[213].mxu1 }
 0xb3b   : > { %v3834_v6 = vadd.f32 %v3833_v8, %v5991_v0  ;;  %v3835_v11 = vpop.f32.mrb[214].mxu1  ;;  %3973 = vmatprep.subr.bf16.mxu1 %v3901_v12  ;;  %v4685_v12 = vld [vmem:[%s4787_s8 + $0x8] sm:$0xff] }
 0xb3c   : > { %v3836_v54 = vadd.f32 %v3835_v11, %v5992_v37  ;;  %v3837_v18 = vpop.f32.mrb[215].mxu1  ;;  %3974 = vmatpush1.bf16.msra.mxu1 %v3900_v28  ;;  %v3880_v60 = vmax.f32 %v3832_v32, 0.0  ;;  %v4007_v4 = vadd.f32 %v4685_v12, %v3952_v39 }
 0xb3d   : > { %v3838_v31 = vadd.f32 %v3837_v18, %v5992_v37  ;;  %v3881_v57 = vmax.f32 %v3834_v6, 0.0 }
 0xb3e   : > { %v3882_v50 = vmax.f32 %v3836_v54, 0.0 }
 0xb3f   : > { %v3883_v41 = vmax.f32 %v3838_v31, 0.0 }
 0xb40   : > { %v3902_v24 = vpack.c.bf16 %v3882_v50, %v3880_v60 }
 0xb41   : > { %v3903_v16 = vpack.c.bf16 %v3883_v41, %v3881_v57  ;;  %v3841_v34 = vpop.f32.mrb[216].mxu1 }
 0xb42   : > { %v3842_v30 = vadd.f32 %v3841_v34, %v5993_v36  ;;  %v3843_v2 = vpop.f32.mrb[217].mxu1 }
 0xb43   : > { %3975 = vmatprep.subr.bf16.mxu1 %v3903_v16  ;;  %v3844_v48 = vadd.f32 %v3843_v2, %v5993_v36  ;;  %v3845_v10 = vpop.f32.mrb[218].mxu1 }
 0xb44   : > { %3976 = vmatpush1.bf16.msra.mxu1 %v3902_v24  ;;  %v3846_v56 = vadd.f32 %v3845_v10, %v5994_v52  ;;  %v3847_v9 = vpop.f32.mrb[219].mxu1  ;;  %v3884_v25 = vmax.f32 %v3842_v30, 0.0 }
 0xb45   : > { %v3848_v35 = vadd.f32 %v3847_v9, %v5994_v52  ;;  %v3885_v62 = vmax.f32 %v3844_v48, 0.0 }
 0xb46   : > { %v3886_v3 = vmax.f32 %v3846_v56, 0.0 }
 0xb47   : > { %v3887_v43 = vmax.f32 %v3848_v35, 0.0 }
 0xb48   : > { %v3904_v55 = vpack.c.bf16 %v3886_v3, %v3884_v25 }
 0xb49   : > { %v3905_v21 = vpack.c.bf16 %v3887_v43, %v3885_v62  ;;  %v3851_v38 = vpop.f32.mrb[220].mxu1 }
 0xb4a   : > { %v3853_v19 = vpop.f32.mrb[221].mxu1  ;;  %v3852_v63 = vadd.f32 %v3851_v38, %v3693_v40 }
 0xb4b   : > { %3977 = vmatprep.subr.bf16.mxu1 %v3905_v21  ;;  %v3855_v51 = vpop.f32.mrb[222].mxu1  ;;  %v3854_v59 = vadd.f32 %v3853_v19, %v3693_v40 }
 0xb4c   : > { %3978 = vmatpush1.bf16.msra.mxu1 %v3904_v55  ;;  %v3856_v46 = vadd.f32 %v3855_v51, %v3697_v1  ;;  %v3857_v17 = vpop.f32.mrb[223].mxu1  ;;  %v3888_v44 = vmax.f32 %v3852_v63, 0.0 }
 0xb4d   : > { %v3858_v53 = vadd.f32 %v3857_v17, %v3697_v1  ;;  %v3889_v49 = vmax.f32 %v3854_v59, 0.0 }
 0xb4e   : > { %v3890_v47 = vmax.f32 %v3856_v46, 0.0 }
 0xb4f   : > { %v3891_v5 = vmax.f32 %v3858_v53, 0.0 }
 0xb50   : > { %v3906_v58 = vpack.c.bf16 %v3890_v47, %v3888_v44 }
 0xb51   : > { %v3907_v33 = vpack.c.bf16 %v3891_v5, %v3889_v49 }
 0xb53   : > { %3979 = vmatprep.subr.bf16.mxu1 %v3907_v33 }
 0xb54   : > { %3980 = vmatpush1.bf16.msra.mxu1 %v3906_v58 }
 0xb57   : > { %3998 = vmatmul.mubr.bf16.vlgmr.msra.gmra.mrb[224].mxu1 %v4420_v22 }
 0xc2a   : > { %v3999_v29 = vpop.f32.mrb[224].mxu1 }
 0xc2b   : > { %v4001_v42 = vpop.f32.mrb[225].mxu1  ;;  %v4000_v20 = vadd.f32 %v3999_v29, %v3963_v26 }
 0xc2c   : > { %v4003_v28 = vpop.f32.mrb[226].mxu1  ;;  %v4002_v0 = vadd.f32 %v4001_v42, %v3963_v26 }
 0xc2d   : > { %v4010_v32 = vrot.slane %v4000_v20, 5  ;;  %v4004_v8 = vpop.f32.mrb[227].mxu1 }
 0xc2e   : > { %v4011_v6 = vrot.slane %v4002_v0, 5 }
 0xc2f   : > { %v4015_v11 = vsel %vm4014_vm2, %v4006_v61, %v4010_v32 }
 0xc30   : > { %v4016_v37 = vsel %vm4014_vm2, %v4007_v4, %v4011_v6  ;;  %v4018_v54 = vsel %vm4017_vm3, %v4015_v11, 0.0 }
 0xc31   : > { %v4019_v18 = vsel %vm4017_vm3, %v4016_v37, 0.0  ;;  %4020 = vst [vmem:[%s309_s19] sm:$0xff] %v4018_v54 }
 0xc32   : > { %4021 = vst [vmem:[%s309_s19 + $0x8] sm:$0xff] %v4019_v18 }
 0xc33 PF: > { %s16_s23 = sadd.s32 1, %s4708_s23   ;;  %s5995_s21 = smov %s4704_s22 }
 0xc34   : > { %p13_p5 = scmp.ge.s32.totalorder %s16_s23, 4   ;;  %s5996_s22 = smov %s5998_s24 }
 0xc36   :  { %15 = sbr.rel (!%p13_p5) target bundleno = 2 (0x2), region = 88 }

</bundles_post_ra>
